<compile_context>
chip_gen: v6e
topology: v6e:2x2x1
jax: 0.10.0
libtpu: 0.0.40
codegen_flags: <defaults>
</compile_context>

<pallas_src>
import functools

import jax
import jax.numpy as jnp
from jax.experimental import pallas as pl
from jax.experimental.pallas import tpu as pltpu


def _inception_kernel(xf_ref, wb_ref, wbr_ref, wmp_ref, bbr_ref, bmp_ref,
                      o_ref, zp_ref, xpad_ref, r_ref,
                      *, Bt, L, Kmax, lpad_max, n_filters, cdt):
    F = n_filters
    C_in = xf_ref.shape[0]
    C_b = zp_ref.shape[1]
    rpad_max = Kmax - 1 - lpad_max

    xf = xf_ref[...]                                      # (C_in, Bt*L) f32

    # ---- bottleneck Conv1d(C_in -> C_b, k=1, bias=False): one channel matmul over the
    #      whole Bt*L-wide lane slab.
    zb = jnp.dot(wb_ref[...], xf.astype(cdt),
                 preferred_element_type=jnp.float32)      # (C_b, Bt*L) f32

    # ---- padded bottleneck scratch shared by all three kernel sizes:
    #      zp[b] = [0_(lpad_max) | zb_b | 0_(rpad_max)].  Pads re-zeroed every step
    #      (tiny; keeps the kernel correct under megacore grid splitting).
    for b in range(Bt):
        if lpad_max:
            zp_ref[b, :, 0:lpad_max] = jnp.zeros((C_b, lpad_max), cdt)
        if rpad_max:
            zp_ref[b, :, lpad_max + L:lpad_max + L + rpad_max] = (
                jnp.zeros((C_b, rpad_max), cdt))
        zp_ref[b, :, lpad_max:lpad_max + L] = zb[:, b * L:(b + 1) * L].astype(cdt)

    # ---- im2col: R[dk*C_b:(dk+1)*C_b, b*L:(b+1)*L] = zp[b, :, dk:dk+L]
    #      (destination rows/lanes are 32-/128-aligned -> plain stores; only the source
    #       read is lane-rotated).
    for b in range(Bt):
        for dk in range(Kmax):
            r_ref[dk * C_b:(dk + 1) * C_b, b * L:(b + 1) * L] = zp_ref[b, :, dk:dk + L]

    # ---- all three padding='same' convs (+ folded BN scale): ONE MXU matmul with a
    #      Kmax*C_b-deep contraction; accumulation stays inside the systolic array.
    zbr = jnp.dot(wbr_ref[...], r_ref[...],
                  preferred_element_type=jnp.float32)     # (3F, Bt*L) f32
    o_ref[0:3 * F, :] = jnp.maximum(zbr + bbr_ref[...], 0.0).astype(o_ref.dtype)

    # ---- MaxPool1d(kernel=3, stride=1, padding=1) branch, per batch item so the window
    #      never leaks across a batch boundary, then Conv1d(C_in -> F, k=1) (+ folded BN).
    for b in range(Bt):
        xpad_ref[b, :, 0:1] = jnp.full((C_in, 1), -jnp.inf, jnp.float32)
        xpad_ref[b, :, L + 1:L + 2] = jnp.full((C_in, 1), -jnp.inf, jnp.float32)
        xpad_ref[b, :, 1:L + 1] = xf[:, b * L:(b + 1) * L]
    for b in range(Bt):
        xp = xpad_ref[b]                                  # (C_in, L+2) f32
        mp = jnp.maximum(jnp.maximum(xp[:, 0:L], xp[:, 1:L + 1]), xp[:, 2:L + 2])
        z4 = jnp.dot(wmp_ref[...], mp.astype(cdt),
                     preferred_element_type=jnp.float32)  # (F, L) f32
        o_ref[3 * F:4 * F, b * L:(b + 1) * L] = jnp.maximum(
            z4 + bmp_ref[...], 0.0).astype(o_ref.dtype)


def inception_forward(x, w_bottleneck, w1, w2, w3, w_maxpool,
                      gamma, beta, running_mean, running_var,
                      *, kernel_sizes=(10, 20, 40), eps=1e-5,
                      block_batch=1, compute_dtype=jnp.float32):
    """Fused Pallas forward of Inception(in_channels>1, use_hybrid=False,
    return_indices=False) in eval mode (running-stats BatchNorm).

    x                            : (B, C_in, L) f32, L a multiple of 128 (lane-dense)
    w_bottleneck                 : (C_b, C_in, 1)   torch Conv1d weight layout
    w1 / w2 / w3                 : (F, C_b, K_i)    torch Conv1d weight layout
    w_maxpool                    : (F, C_in, 1)
    gamma/beta/mean/var          : (4F,)
    block_batch                  : batch items fused per grid step (Bt)
    compute_dtype                : MXU operand dtype (jnp.bfloat16 recommended on v6e/v7x)
    """
    B, C_in, L = x.shape
    C_b = w_bottleneck.shape[0]
    F = w_maxpool.shape[0]
    assert C_in > 1, "in_channels == 1 (pass-through bottleneck) not implemented"
    assert len(kernel_sizes) == 3
    assert L % 128 == 0, "keep the length lane-dense (multiple of 128)"
    assert B % block_batch == 0
    Bt = block_batch
    Kmax = max(kernel_sizes)
    lpad_max = (Kmax - 1) // 2
    Lpad = L + Kmax - 1
    f32 = jnp.float32

    # ---- fold eval-mode BatchNorm into the conv weights + a per-channel bias ----
    # TODO(synk): training-mode BatchNorm (batch statistics over (B, L)) not implemented.
    scale = (gamma.astype(f32) * jax.lax.rsqrt(running_var.astype(f32) + eps))   # (4F,)
    bias = beta.astype(f32) - running_mean.astype(f32) * scale                    # (4F,)

    # ---- fuse the three 'same' convs into one (3F, Kmax*C_b) weight: branch i's taps sit
    # at offset lpad_max - (K_i-1)//2 so all branches read the SAME padded buffer.
    # (PyTorch padding='same': left = (K-1)//2, right = K-1-left, incl. even K.)
    w_comb = jnp.zeros((3 * F, Kmax, C_b), f32)
    for i, (w, K) in enumerate(zip((w1, w2, w3), kernel_sizes)):
        off = lpad_max - (K - 1) // 2
        wk = jnp.transpose(w.astype(f32), (0, 2, 1))                   # (F, K, C_b)
        wk = wk * scale[i * F:(i + 1) * F, None, None]
        w_comb = w_comb.at[i * F:(i + 1) * F, off:off + K, :].set(wk)
    w_comb = w_comb.reshape(3 * F, Kmax * C_b).astype(compute_dtype)

    wb = w_bottleneck[:, :, 0].astype(compute_dtype)                   # (C_b, C_in)
    wmp = (w_maxpool[:, :, 0].astype(f32) * scale[3 * F:, None]).astype(compute_dtype)
    bias_br = bias[:3 * F].reshape(3 * F, 1)
    bias_mp = bias[3 * F:].reshape(F, 1)

    # lane-dense flat layout: channels on sublanes, (batch, time) flattened on lanes.
    xf = jnp.transpose(x, (1, 0, 2)).reshape(C_in, B * L)

    kernel = functools.partial(_inception_kernel, Bt=Bt, L=L, Kmax=Kmax,
                               lpad_max=lpad_max, n_filters=F, cdt=compute_dtype)

    # TODO(synk): for long sequences, tile L with a halo of Kmax-1 and budget the im2col
    # scratch against v7x's 64 MiB physical / 32 MiB scoped VMEM (smallest generation).
    yf = pl.pallas_call(
        kernel,
        out_shape=jax.ShapeDtypeStruct((4 * F, B * L), x.dtype),
        grid_spec=pltpu.PrefetchScalarGridSpec(
            num_scalar_prefetch=0,
            grid=(B // Bt,),
            in_specs=[
                pl.BlockSpec((C_in, Bt * L), lambda g: (0, g)),        # activations
                pl.BlockSpec((C_b, C_in), lambda g: (0, 0)),           # weights: DMA'd once
                pl.BlockSpec((3 * F, Kmax * C_b), lambda g: (0, 0)),
                pl.BlockSpec((F, C_in), lambda g: (0, 0)),
                pl.BlockSpec((3 * F, 1), lambda g: (0, 0)),
                pl.BlockSpec((F, 1), lambda g: (0, 0)),
            ],
            out_specs=pl.BlockSpec((4 * F, Bt * L), lambda g: (0, g)),
            scratch_shapes=[
                pltpu.VMEM((Bt, C_b, Lpad), compute_dtype),            # zero-padded bottleneck
                pltpu.VMEM((Bt, C_in, L + 2), jnp.float32),            # -inf padded maxpool in
                pltpu.VMEM((Kmax * C_b, Bt * L), compute_dtype),       # im2col matrix
            ],
        ),
        compiler_params=pltpu.CompilerParams(
            dimension_semantics=("parallel",),
        ),
    )(xf, wb, w_comb, wmp, bias_br, bias_mp)

    # (4F, B*L) -> (B, 4F, L): pure layout plumbing outside the kernel.
    return jnp.transpose(yf.reshape(4 * F, B, L), (1, 0, 2))


def _reference_forward(x, wb_oik, w1_oik, w2_oik, w3_oik, wmp_oik,
                       gamma, beta, mean, var, eps, precision):
    def conv_same(inp, w):
        k = w.shape[-1]
        lp = (k - 1) // 2
        return jax.lax.conv_general_dilated(
            inp, w, window_strides=(1,), padding=[(lp, k - 1 - lp)],
            dimension_numbers=("NCH", "OIH", "NCH"), precision=precision)

    zb = conv_same(x, wb_oik)
    mp = jax.lax.reduce_window(x, -jnp.inf, jax.lax.max,
                               (1, 1, 3), (1, 1, 1),
                               [(0, 0), (0, 0), (1, 1)])
    z = jnp.concatenate([conv_same(zb, w1_oik), conv_same(zb, w2_oik),
                         conv_same(zb, w3_oik), conv_same(mp, wmp_oik)], axis=1)
    inv = 1.0 / jnp.sqrt(var + eps)
    zn = (z - mean[None, :, None]) * (gamma * inv)[None, :, None] + beta[None, :, None]
    return jnp.maximum(zn, 0.0)


if __name__ == "__main__":
    key = jax.random.PRNGKey(0)
    B, C_in, L = 4, 4, 128            # small shapes, lane-dense length
    n_filters, C_b = 8, 32
    kernel_sizes = (10, 20, 40)       # module defaults
    eps = 1e-5

    ks = jax.random.split(key, 10)
    x = jax.random.normal(ks[0], (B, C_in, L), jnp.float32)

    # torch-layout weights (out_channels, in_channels, K)
    wb_oik = 0.3 * jax.random.normal(ks[1], (C_b, C_in, 1), jnp.float32)
    w1_oik = 0.1 * jax.random.normal(ks[2], (n_filters, C_b, kernel_sizes[0]), jnp.float32)
    w2_oik = 0.1 * jax.random.normal(ks[3], (n_filters, C_b, kernel_sizes[1]), jnp.float32)
    w3_oik = 0.1 * jax.random.normal(ks[4], (n_filters, C_b, kernel_sizes[2]), jnp.float32)
    wmp_oik = 0.3 * jax.random.normal(ks[5], (n_filters, C_in, 1), jnp.float32)

    gamma = 1.0 + 0.1 * jax.random.normal(ks[6], (4 * n_filters,), jnp.float32)
    beta = 0.1 * jax.random.normal(ks[7], (4 * n_filters,), jnp.float32)
    mean = 0.1 * jax.random.normal(ks[8], (4 * n_filters,), jnp.float32)
    var = jax.random.uniform(ks[9], (4 * n_filters,), jnp.float32, 0.5, 1.5)

    ref_hi = _reference_forward(x, wb_oik, w1_oik, w2_oik, w3_oik, wmp_oik,
                                gamma, beta, mean, var, eps,
                                jax.lax.Precision.HIGHEST)
    ref_lo = _reference_forward(x, wb_oik, w1_oik, w2_oik, w3_oik, wmp_oik,
                                gamma, beta, mean, var, eps,
                                jax.lax.Precision.DEFAULT)
    # Adaptive f32 tolerance: 2e-3 when this platform's f32 matmuls are exact, scaled by
    # the platform's own default-precision truncation otherwise (never looser than 5e-2).
    plat_trunc = float(jnp.max(jnp.abs(ref_hi - ref_lo)))
    f32_tol = min(5e-2, max(2e-3, 4.0 * plat_trunc))

    # f32 path, 2 batch items per grid step -> 2 parallel grid steps (both v7x cores).
    y = inception_forward(x, wb_oik, w1_oik, w2_oik, w3_oik, wmp_oik,
                          gamma, beta, mean, var,
                          kernel_sizes=kernel_sizes, eps=eps,
                          block_batch=2, compute_dtype=jnp.float32)
    y = jax.block_until_ready(y)
    assert y.shape == (B, 4 * n_filters, L), y.shape
    assert y.dtype == x.dtype
    err = float(jnp.max(jnp.abs(y - ref_hi)))
    assert err < f32_tol, f"f32 max abs error {err} (tol {f32_tol})"

    # bf16 MXU-operand path (v6e/v7x knob): element-wise + accumulation stay f32.
    y16 = inception_forward(x, wb_oik, w1_oik, w2_oik, w3_oik, wmp_oik,
                            gamma, beta, mean, var,
                            kernel_sizes=kernel_sizes, eps=eps,
                            block_batch=1, compute_dtype=jnp.bfloat16)
    y16 = jax.block_until_ready(y16)
    err16 = float(jnp.max(jnp.abs(y16 - ref_hi)))
    assert err16 < 1e-1, f"bf16 max abs error {err16}"

    print("KERNEL_OK")
</pallas_src>

<mosaic_0001>
module attributes {stable_mosaic.version = 11 : i64} {
  func.func @_inception_kernel(%arg0: i32, %arg1: memref<4x256xf32, #tpu.memory_space<vmem>>, %arg2: memref<32x4xf32, #tpu.memory_space<vmem>>, %arg3: memref<24x1280xf32, #tpu.memory_space<vmem>>, %arg4: memref<8x4xf32, #tpu.memory_space<vmem>>, %arg5: memref<24x1xf32, #tpu.memory_space<vmem>>, %arg6: memref<8x1xf32, #tpu.memory_space<vmem>>, %arg7: memref<32x256xf32, #tpu.memory_space<vmem>>, %arg8: memref<2x32x167xf32, #tpu.memory_space<vmem>>, %arg9: memref<2x4x130xf32, #tpu.memory_space<vmem>>, %arg10: memref<1280x256xf32, #tpu.memory_space<vmem>>) attributes {dimension_semantics = [#tpu.dimension_semantics<parallel>], iteration_bounds = array<i64: 2>, scalar_prefetch = 0 : i64, scratch_operands = 3 : i64, tpu.core_type = #tpu.core_type<tc>, window_params = [{transform_indices = @transform_0, window_bounds = array<i64: 4, 256>}, {pipeline_mode = #tpu.pipeline_mode<synchronous>, transform_indices = @transform_1, window_bounds = array<i64: 32, 4>}, {pipeline_mode = #tpu.pipeline_mode<synchronous>, transform_indices = @transform_2, window_bounds = array<i64: 24, 1280>}, {pipeline_mode = #tpu.pipeline_mode<synchronous>, transform_indices = @transform_3, window_bounds = array<i64: 8, 4>}, {pipeline_mode = #tpu.pipeline_mode<synchronous>, transform_indices = @transform_4, window_bounds = array<i64: 24, 1>}, {pipeline_mode = #tpu.pipeline_mode<synchronous>, transform_indices = @transform_5, window_bounds = array<i64: 8, 1>}, {transform_indices = @transform_6, window_bounds = array<i64: 32, 256>}]} {
    %c0 = arith.constant 0 : index
    %c0_0 = arith.constant 0 : index
    %0 = vector.load %arg1[%c0, %c0_0] : memref<4x256xf32, #tpu.memory_space<vmem>>, vector<4x256xf32>
    %c0_1 = arith.constant 0 : index
    %c0_2 = arith.constant 0 : index
    %1 = vector.load %arg2[%c0_1, %c0_2] : memref<32x4xf32, #tpu.memory_space<vmem>>, vector<32x4xf32>
    %cst = arith.constant dense<0.000000e+00> : vector<32x256xf32>
    %2 = tpu.matmul %1, %0, %cst {dimension_numbers = #tpu.dot_dimension_numbers<[1], [0], [0], [1], [0, 0, 1, 1], [], []>} : vector<32x4xf32>, vector<4x256xf32>, vector<32x256xf32> -> vector<32x256xf32>
    %cst_3 = arith.constant 0.000000e+00 : f32
    %3 = vector.broadcast %cst_3 : f32 to vector<32x19xf32>
    %c0_4 = arith.constant 0 : index
    %c0_5 = arith.constant 0 : index
    %c0_6 = arith.constant 0 : index
    %4 = vector.load %arg8[%c0_4, %c0_5, %c0_6] : memref<2x32x167xf32, #tpu.memory_space<vmem>>, vector<1x32x19xf32>
    %5 = vector.shape_cast %4 : vector<1x32x19xf32> to vector<32x19xf32>
    %6 = vector.shape_cast %3 : vector<32x19xf32> to vector<1x32x19xf32>
    tpu.vector_store %arg8[%c0_4, %c0_5, %c0_6], %6 {strides = array<i32>} : memref<2x32x167xf32, #tpu.memory_space<vmem>>, vector<1x32x19xf32>,
    %cst_7 = arith.constant 0.000000e+00 : f32
    %7 = vector.broadcast %cst_7 : f32 to vector<32x20xf32>
    %c0_8 = arith.constant 0 : index
    %c0_9 = arith.constant 0 : index
    %c147 = arith.constant 147 : index
    %8 = vector.load %arg8[%c0_8, %c0_9, %c147] : memref<2x32x167xf32, #tpu.memory_space<vmem>>, vector<1x32x20xf32>
    %9 = vector.shape_cast %8 : vector<1x32x20xf32> to vector<32x20xf32>
    %10 = vector.shape_cast %7 : vector<32x20xf32> to vector<1x32x20xf32>
    tpu.vector_store %arg8[%c0_8, %c0_9, %c147], %10 {strides = array<i32>} : memref<2x32x167xf32, #tpu.memory_space<vmem>>, vector<1x32x20xf32>,
    %11 = vector.extract_strided_slice %2 {offsets = [0, 0], sizes = [32, 128], strides = [1, 1]} : vector<32x256xf32> to vector<32x128xf32>
    %c0_10 = arith.constant 0 : index
    %c0_11 = arith.constant 0 : index
    %c19 = arith.constant 19 : index
    %12 = vector.load %arg8[%c0_10, %c0_11, %c19] : memref<2x32x167xf32, #tpu.memory_space<vmem>>, vector<1x32x128xf32>
    %13 = vector.shape_cast %12 : vector<1x32x128xf32> to vector<32x128xf32>
    %14 = vector.shape_cast %11 : vector<32x128xf32> to vector<1x32x128xf32>
    tpu.vector_store %arg8[%c0_10, %c0_11, %c19], %14 {strides = array<i32>} : memref<2x32x167xf32, #tpu.memory_space<vmem>>, vector<1x32x128xf32>,
    %cst_12 = arith.constant 0.000000e+00 : f32
    %15 = vector.broadcast %cst_12 : f32 to vector<32x19xf32>
    %c1 = arith.constant 1 : index
    %c0_13 = arith.constant 0 : index
    %c0_14 = arith.constant 0 : index
    %16 = vector.load %arg8[%c1, %c0_13, %c0_14] : memref<2x32x167xf32, #tpu.memory_space<vmem>>, vector<1x32x19xf32>
    %17 = vector.shape_cast %16 : vector<1x32x19xf32> to vector<32x19xf32>
    %18 = vector.shape_cast %15 : vector<32x19xf32> to vector<1x32x19xf32>
    tpu.vector_store %arg8[%c1, %c0_13, %c0_14], %18 {strides = array<i32>} : memref<2x32x167xf32, #tpu.memory_space<vmem>>, vector<1x32x19xf32>,
    %cst_15 = arith.constant 0.000000e+00 : f32
    %19 = vector.broadcast %cst_15 : f32 to vector<32x20xf32>
    %c1_16 = arith.constant 1 : index
    %c0_17 = arith.constant 0 : index
    %c147_18 = arith.constant 147 : index
    %20 = vector.load %arg8[%c1_16, %c0_17, %c147_18] : memref<2x32x167xf32, #tpu.memory_space<vmem>>, vector<1x32x20xf32>
    %21 = vector.shape_cast %20 : vector<1x32x20xf32> to vector<32x20xf32>
    %22 = vector.shape_cast %19 : vector<32x20xf32> to vector<1x32x20xf32>
    tpu.vector_store %arg8[%c1_16, %c0_17, %c147_18], %22 {strides = array<i32>} : memref<2x32x167xf32, #tpu.memory_space<vmem>>, vector<1x32x20xf32>,
    %23 = vector.extract_strided_slice %2 {offsets = [0, 128], sizes = [32, 128], strides = [1, 1]} : vector<32x256xf32> to vector<32x128xf32>
    %c1_19 = arith.constant 1 : index
    %c0_20 = arith.constant 0 : index
    %c19_21 = arith.constant 19 : index
    %24 = vector.load %arg8[%c1_19, %c0_20, %c19_21] : memref<2x32x167xf32, #tpu.memory_space<vmem>>, vector<1x32x128xf32>
    %25 = vector.shape_cast %24 : vector<1x32x128xf32> to vector<32x128xf32>
    %26 = vector.shape_cast %23 : vector<32x128xf32> to vector<1x32x128xf32>
    tpu.vector_store %arg8[%c1_19, %c0_20, %c19_21], %26 {strides = array<i32>} : memref<2x32x167xf32, #tpu.memory_space<vmem>>, vector<1x32x128xf32>,
    %c0_22 = arith.constant 0 : index
    %c0_23 = arith.constant 0 : index
    %c0_24 = arith.constant 0 : index
    %27 = vector.load %arg8[%c0_22, %c0_23, %c0_24] : memref<2x32x167xf32, #tpu.memory_space<vmem>>, vector<1x32x128xf32>
    %28 = vector.shape_cast %27 : vector<1x32x128xf32> to vector<32x128xf32>
    %c0_25 = arith.constant 0 : index
    %c0_26 = arith.constant 0 : index
    %29 = vector.load %arg10[%c0_25, %c0_26] : memref<1280x256xf32, #tpu.memory_space<vmem>>, vector<32x128xf32>
    tpu.vector_store %arg10[%c0_25, %c0_26], %28 {strides = array<i32>} : memref<1280x256xf32, #tpu.memory_space<vmem>>, vector<32x128xf32>,
    %c0_27 = arith.constant 0 : index
    %c0_28 = arith.constant 0 : index
    %c1_29 = arith.constant 1 : index
    %30 = vector.load %arg8[%c0_27, %c0_28, %c1_29] : memref<2x32x167xf32, #tpu.memory_space<vmem>>, vector<1x32x128xf32>
    %31 = vector.shape_cast %30 : vector<1x32x128xf32> to vector<32x128xf32>
    %c32 = arith.constant 32 : index
    %c0_30 = arith.constant 0 : index
    %32 = vector.load %arg10[%c32, %c0_30] : memref<1280x256xf32, #tpu.memory_space<vmem>>, vector<32x128xf32>
    tpu.vector_store %arg10[%c32, %c0_30], %31 {strides = array<i32>} : memref<1280x256xf32, #tpu.memory_space<vmem>>, vector<32x128xf32>,
    %c0_31 = arith.constant 0 : index
    %c0_32 = arith.constant 0 : index
    %c2 = arith.constant 2 : index
    %33 = vector.load %arg8[%c0_31, %c0_32, %c2] : memref<2x32x167xf32, #tpu.memory_space<vmem>>, vector<1x32x128xf32>
    %34 = vector.shape_cast %33 : vector<1x32x128xf32> to vector<32x128xf32>
    %c64 = arith.constant 64 : index
    %c0_33 = arith.constant 0 : index
    %35 = vector.load %arg10[%c64, %c0_33] : memref<1280x256xf32, #tpu.memory_space<vmem>>, vector<32x128xf32>
    tpu.vector_store %arg10[%c64, %c0_33], %34 {strides = array<i32>} : memref<1280x256xf32, #tpu.memory_space<vmem>>, vector<32x128xf32>,
    %c0_34 = arith.constant 0 : index
    %c0_35 = arith.constant 0 : index
    %c3 = arith.constant 3 : index
    %36 = vector.load %arg8[%c0_34, %c0_35, %c3] : memref<2x32x167xf32, #tpu.memory_space<vmem>>, vector<1x32x128xf32>
    %37 = vector.shape_cast %36 : vector<1x32x128xf32> to vector<32x128xf32>
    %c96 = arith.constant 96 : index
    %c0_36 = arith.constant 0 : index
    %38 = vector.load %arg10[%c96, %c0_36] : memref<1280x256xf32, #tpu.memory_space<vmem>>, vector<32x128xf32>
    tpu.vector_store %arg10[%c96, %c0_36], %37 {strides = array<i32>} : memref<1280x256xf32, #tpu.memory_space<vmem>>, vector<32x128xf32>,
    %c0_37 = arith.constant 0 : index
    %c0_38 = arith.constant 0 : index
    %c4 = arith.constant 4 : index
    %39 = vector.load %arg8[%c0_37, %c0_38, %c4] : memref<2x32x167xf32, #tpu.memory_space<vmem>>, vector<1x32x128xf32>
    %40 = vector.shape_cast %39 : vector<1x32x128xf32> to vector<32x128xf32>
    %c128 = arith.constant 128 : index
    %c0_39 = arith.constant 0 : index
    %41 = vector.load %arg10[%c128, %c0_39] : memref<1280x256xf32, #tpu.memory_space<vmem>>, vector<32x128xf32>
    tpu.vector_store %arg10[%c128, %c0_39], %40 {strides = array<i32>} : memref<1280x256xf32, #tpu.memory_space<vmem>>, vector<32x128xf32>,
    %c0_40 = arith.constant 0 : index
    %c0_41 = arith.constant 0 : index
    %c5 = arith.constant 5 : index
    %42 = vector.load %arg8[%c0_40, %c0_41, %c5] : memref<2x32x167xf32, #tpu.memory_space<vmem>>, vector<1x32x128xf32>
    %43 = vector.shape_cast %42 : vector<1x32x128xf32> to vector<32x128xf32>
    %c160 = arith.constant 160 : index
    %c0_42 = arith.constant 0 : index
    %44 = vector.load %arg10[%c160, %c0_42] : memref<1280x256xf32, #tpu.memory_space<vmem>>, vector<32x128xf32>
    tpu.vector_store %arg10[%c160, %c0_42], %43 {strides = array<i32>} : memref<1280x256xf32, #tpu.memory_space<vmem>>, vector<32x128xf32>,
    %c0_43 = arith.constant 0 : index
    %c0_44 = arith.constant 0 : index
    %c6 = arith.constant 6 : index
    %45 = vector.load %arg8[%c0_43, %c0_44, %c6] : memref<2x32x167xf32, #tpu.memory_space<vmem>>, vector<1x32x128xf32>
    %46 = vector.shape_cast %45 : vector<1x32x128xf32> to vector<32x128xf32>
    %c192 = arith.constant 192 : index
    %c0_45 = arith.constant 0 : index
    %47 = vector.load %arg10[%c192, %c0_45] : memref<1280x256xf32, #tpu.memory_space<vmem>>, vector<32x128xf32>
    tpu.vector_store %arg10[%c192, %c0_45], %46 {strides = array<i32>} : memref<1280x256xf32, #tpu.memory_space<vmem>>, vector<32x128xf32>,
    %c0_46 = arith.constant 0 : index
    %c0_47 = arith.constant 0 : index
    %c7 = arith.constant 7 : index
    %48 = vector.load %arg8[%c0_46, %c0_47, %c7] : memref<2x32x167xf32, #tpu.memory_space<vmem>>, vector<1x32x128xf32>
    %49 = vector.shape_cast %48 : vector<1x32x128xf32> to vector<32x128xf32>
    %c224 = arith.constant 224 : index
    %c0_48 = arith.constant 0 : index
    %50 = vector.load %arg10[%c224, %c0_48] : memref<1280x256xf32, #tpu.memory_space<vmem>>, vector<32x128xf32>
    tpu.vector_store %arg10[%c224, %c0_48], %49 {strides = array<i32>} : memref<1280x256xf32, #tpu.memory_space<vmem>>, vector<32x128xf32>,
    %c0_49 = arith.constant 0 : index
    %c0_50 = arith.constant 0 : index
    %c8 = arith.constant 8 : index
    %51 = vector.load %arg8[%c0_49, %c0_50, %c8] : memref<2x32x167xf32, #tpu.memory_space<vmem>>, vector<1x32x128xf32>
    %52 = vector.shape_cast %51 : vector<1x32x128xf32> to vector<32x128xf32>
    %c256 = arith.constant 256 : index
    %c0_51 = arith.constant 0 : index
    %53 = vector.load %arg10[%c256, %c0_51] : memref<1280x256xf32, #tpu.memory_space<vmem>>, vector<32x128xf32>
    tpu.vector_store %arg10[%c256, %c0_51], %52 {strides = array<i32>} : memref<1280x256xf32, #tpu.memory_space<vmem>>, vector<32x128xf32>,
    %c0_52 = arith.constant 0 : index
    %c0_53 = arith.constant 0 : index
    %c9 = arith.constant 9 : index
    %54 = vector.load %arg8[%c0_52, %c0_53, %c9] : memref<2x32x167xf32, #tpu.memory_space<vmem>>, vector<1x32x128xf32>
    %55 = vector.shape_cast %54 : vector<1x32x128xf32> to vector<32x128xf32>
    %c288 = arith.constant 288 : index
    %c0_54 = arith.constant 0 : index
    %56 = vector.load %arg10[%c288, %c0_54] : memref<1280x256xf32, #tpu.memory_space<vmem>>, vector<32x128xf32>
    tpu.vector_store %arg10[%c288, %c0_54], %55 {strides = array<i32>} : memref<1280x256xf32, #tpu.memory_space<vmem>>, vector<32x128xf32>,
    %c0_55 = arith.constant 0 : index
    %c0_56 = arith.constant 0 : index
    %c10 = arith.constant 10 : index
    %57 = vector.load %arg8[%c0_55, %c0_56, %c10] : memref<2x32x167xf32, #tpu.memory_space<vmem>>, vector<1x32x128xf32>
    %58 = vector.shape_cast %57 : vector<1x32x128xf32> to vector<32x128xf32>
    %c320 = arith.constant 320 : index
    %c0_57 = arith.constant 0 : index
    %59 = vector.load %arg10[%c320, %c0_57] : memref<1280x256xf32, #tpu.memory_space<vmem>>, vector<32x128xf32>
    tpu.vector_store %arg10[%c320, %c0_57], %58 {strides = array<i32>} : memref<1280x256xf32, #tpu.memory_space<vmem>>, vector<32x128xf32>,
    %c0_58 = arith.constant 0 : index
    %c0_59 = arith.constant 0 : index
    %c11 = arith.constant 11 : index
    %60 = vector.load %arg8[%c0_58, %c0_59, %c11] : memref<2x32x167xf32, #tpu.memory_space<vmem>>, vector<1x32x128xf32>
    %61 = vector.shape_cast %60 : vector<1x32x128xf32> to vector<32x128xf32>
    %c352 = arith.constant 352 : index
    %c0_60 = arith.constant 0 : index
    %62 = vector.load %arg10[%c352, %c0_60] : memref<1280x256xf32, #tpu.memory_space<vmem>>, vector<32x128xf32>
    tpu.vector_store %arg10[%c352, %c0_60], %61 {strides = array<i32>} : memref<1280x256xf32, #tpu.memory_space<vmem>>, vector<32x128xf32>,
    %c0_61 = arith.constant 0 : index
    %c0_62 = arith.constant 0 : index
    %c12 = arith.constant 12 : index
    %63 = vector.load %arg8[%c0_61, %c0_62, %c12] : memref<2x32x167xf32, #tpu.memory_space<vmem>>, vector<1x32x128xf32>
    %64 = vector.shape_cast %63 : vector<1x32x128xf32> to vector<32x128xf32>
    %c384 = arith.constant 384 : index
    %c0_63 = arith.constant 0 : index
    %65 = vector.load %arg10[%c384, %c0_63] : memref<1280x256xf32, #tpu.memory_space<vmem>>, vector<32x128xf32>
    tpu.vector_store %arg10[%c384, %c0_63], %64 {strides = array<i32>} : memref<1280x256xf32, #tpu.memory_space<vmem>>, vector<32x128xf32>,
    %c0_64 = arith.constant 0 : index
    %c0_65 = arith.constant 0 : index
    %c13 = arith.constant 13 : index
    %66 = vector.load %arg8[%c0_64, %c0_65, %c13] : memref<2x32x167xf32, #tpu.memory_space<vmem>>, vector<1x32x128xf32>
    %67 = vector.shape_cast %66 : vector<1x32x128xf32> to vector<32x128xf32>
    %c416 = arith.constant 416 : index
    %c0_66 = arith.constant 0 : index
    %68 = vector.load %arg10[%c416, %c0_66] : memref<1280x256xf32, #tpu.memory_space<vmem>>, vector<32x128xf32>
    tpu.vector_store %arg10[%c416, %c0_66], %67 {strides = array<i32>} : memref<1280x256xf32, #tpu.memory_space<vmem>>, vector<32x128xf32>,
    %c0_67 = arith.constant 0 : index
    %c0_68 = arith.constant 0 : index
    %c14 = arith.constant 14 : index
    %69 = vector.load %arg8[%c0_67, %c0_68, %c14] : memref<2x32x167xf32, #tpu.memory_space<vmem>>, vector<1x32x128xf32>
    %70 = vector.shape_cast %69 : vector<1x32x128xf32> to vector<32x128xf32>
    %c448 = arith.constant 448 : index
    %c0_69 = arith.constant 0 : index
    %71 = vector.load %arg10[%c448, %c0_69] : memref<1280x256xf32, #tpu.memory_space<vmem>>, vector<32x128xf32>
    tpu.vector_store %arg10[%c448, %c0_69], %70 {strides = array<i32>} : memref<1280x256xf32, #tpu.memory_space<vmem>>, vector<32x128xf32>,
    %c0_70 = arith.constant 0 : index
    %c0_71 = arith.constant 0 : index
    %c15 = arith.constant 15 : index
    %72 = vector.load %arg8[%c0_70, %c0_71, %c15] : memref<2x32x167xf32, #tpu.memory_space<vmem>>, vector<1x32x128xf32>
    %73 = vector.shape_cast %72 : vector<1x32x128xf32> to vector<32x128xf32>
    %c480 = arith.constant 480 : index
    %c0_72 = arith.constant 0 : index
    %74 = vector.load %arg10[%c480, %c0_72] : memref<1280x256xf32, #tpu.memory_space<vmem>>, vector<32x128xf32>
    tpu.vector_store %arg10[%c480, %c0_72], %73 {strides = array<i32>} : memref<1280x256xf32, #tpu.memory_space<vmem>>, vector<32x128xf32>,
    %c0_73 = arith.constant 0 : index
    %c0_74 = arith.constant 0 : index
    %c16 = arith.constant 16 : index
    %75 = vector.load %arg8[%c0_73, %c0_74, %c16] : memref<2x32x167xf32, #tpu.memory_space<vmem>>, vector<1x32x128xf32>
    %76 = vector.shape_cast %75 : vector<1x32x128xf32> to vector<32x128xf32>
    %c512 = arith.constant 512 : index
    %c0_75 = arith.constant 0 : index
    %77 = vector.load %arg10[%c512, %c0_75] : memref<1280x256xf32, #tpu.memory_space<vmem>>, vector<32x128xf32>
    tpu.vector_store %arg10[%c512, %c0_75], %76 {strides = array<i32>} : memref<1280x256xf32, #tpu.memory_space<vmem>>, vector<32x128xf32>,
    %c0_76 = arith.constant 0 : index
    %c0_77 = arith.constant 0 : index
    %c17 = arith.constant 17 : index
    %78 = vector.load %arg8[%c0_76, %c0_77, %c17] : memref<2x32x167xf32, #tpu.memory_space<vmem>>, vector<1x32x128xf32>
    %79 = vector.shape_cast %78 : vector<1x32x128xf32> to vector<32x128xf32>
    %c544 = arith.constant 544 : index
    %c0_78 = arith.constant 0 : index
    %80 = vector.load %arg10[%c544, %c0_78] : memref<1280x256xf32, #tpu.memory_space<vmem>>, vector<32x128xf32>
    tpu.vector_store %arg10[%c544, %c0_78], %79 {strides = array<i32>} : memref<1280x256xf32, #tpu.memory_space<vmem>>, vector<32x128xf32>,
    %c0_79 = arith.constant 0 : index
    %c0_80 = arith.constant 0 : index
    %c18 = arith.constant 18 : index
    %81 = vector.load %arg8[%c0_79, %c0_80, %c18] : memref<2x32x167xf32, #tpu.memory_space<vmem>>, vector<1x32x128xf32>
    %82 = vector.shape_cast %81 : vector<1x32x128xf32> to vector<32x128xf32>
    %c576 = arith.constant 576 : index
    %c0_81 = arith.constant 0 : index
    %83 = vector.load %arg10[%c576, %c0_81] : memref<1280x256xf32, #tpu.memory_space<vmem>>, vector<32x128xf32>
    tpu.vector_store %arg10[%c576, %c0_81], %82 {strides = array<i32>} : memref<1280x256xf32, #tpu.memory_space<vmem>>, vector<32x128xf32>,
    %c0_82 = arith.constant 0 : index
    %c0_83 = arith.constant 0 : index
    %c19_84 = arith.constant 19 : index
    %84 = vector.load %arg8[%c0_82, %c0_83, %c19_84] : memref<2x32x167xf32, #tpu.memory_space<vmem>>, vector<1x32x128xf32>
    %85 = vector.shape_cast %84 : vector<1x32x128xf32> to vector<32x128xf32>
    %c608 = arith.constant 608 : index
    %c0_85 = arith.constant 0 : index
    %86 = vector.load %arg10[%c608, %c0_85] : memref<1280x256xf32, #tpu.memory_space<vmem>>, vector<32x128xf32>
    tpu.vector_store %arg10[%c608, %c0_85], %85 {strides = array<i32>} : memref<1280x256xf32, #tpu.memory_space<vmem>>, vector<32x128xf32>,
    %c0_86 = arith.constant 0 : index
    %c0_87 = arith.constant 0 : index
    %c20 = arith.constant 20 : index
    %87 = vector.load %arg8[%c0_86, %c0_87, %c20] : memref<2x32x167xf32, #tpu.memory_space<vmem>>, vector<1x32x128xf32>
    %88 = vector.shape_cast %87 : vector<1x32x128xf32> to vector<32x128xf32>
    %c640 = arith.constant 640 : index
    %c0_88 = arith.constant 0 : index
    %89 = vector.load %arg10[%c640, %c0_88] : memref<1280x256xf32, #tpu.memory_space<vmem>>, vector<32x128xf32>
    tpu.vector_store %arg10[%c640, %c0_88], %88 {strides = array<i32>} : memref<1280x256xf32, #tpu.memory_space<vmem>>, vector<32x128xf32>,
    %c0_89 = arith.constant 0 : index
    %c0_90 = arith.constant 0 : index
    %c21 = arith.constant 21 : index
    %90 = vector.load %arg8[%c0_89, %c0_90, %c21] : memref<2x32x167xf32, #tpu.memory_space<vmem>>, vector<1x32x128xf32>
    %91 = vector.shape_cast %90 : vector<1x32x128xf32> to vector<32x128xf32>
    %c672 = arith.constant 672 : index
    %c0_91 = arith.constant 0 : index
    %92 = vector.load %arg10[%c672, %c0_91] : memref<1280x256xf32, #tpu.memory_space<vmem>>, vector<32x128xf32>
    tpu.vector_store %arg10[%c672, %c0_91], %91 {strides = array<i32>} : memref<1280x256xf32, #tpu.memory_space<vmem>>, vector<32x128xf32>,
    %c0_92 = arith.constant 0 : index
    %c0_93 = arith.constant 0 : index
    %c22 = arith.constant 22 : index
    %93 = vector.load %arg8[%c0_92, %c0_93, %c22] : memref<2x32x167xf32, #tpu.memory_space<vmem>>, vector<1x32x128xf32>
    %94 = vector.shape_cast %93 : vector<1x32x128xf32> to vector<32x128xf32>
    %c704 = arith.constant 704 : index
    %c0_94 = arith.constant 0 : index
    %95 = vector.load %arg10[%c704, %c0_94] : memref<1280x256xf32, #tpu.memory_space<vmem>>, vector<32x128xf32>
    tpu.vector_store %arg10[%c704, %c0_94], %94 {strides = array<i32>} : memref<1280x256xf32, #tpu.memory_space<vmem>>, vector<32x128xf32>,
    %c0_95 = arith.constant 0 : index
    %c0_96 = arith.constant 0 : index
    %c23 = arith.constant 23 : index
    %96 = vector.load %arg8[%c0_95, %c0_96, %c23] : memref<2x32x167xf32, #tpu.memory_space<vmem>>, vector<1x32x128xf32>
    %97 = vector.shape_cast %96 : vector<1x32x128xf32> to vector<32x128xf32>
    %c736 = arith.constant 736 : index
    %c0_97 = arith.constant 0 : index
    %98 = vector.load %arg10[%c736, %c0_97] : memref<1280x256xf32, #tpu.memory_space<vmem>>, vector<32x128xf32>
    tpu.vector_store %arg10[%c736, %c0_97], %97 {strides = array<i32>} : memref<1280x256xf32, #tpu.memory_space<vmem>>, vector<32x128xf32>,
    %c0_98 = arith.constant 0 : index
    %c0_99 = arith.constant 0 : index
    %c24 = arith.constant 24 : index
    %99 = vector.load %arg8[%c0_98, %c0_99, %c24] : memref<2x32x167xf32, #tpu.memory_space<vmem>>, vector<1x32x128xf32>
    %100 = vector.shape_cast %99 : vector<1x32x128xf32> to vector<32x128xf32>
    %c768 = arith.constant 768 : index
    %c0_100 = arith.constant 0 : index
    %101 = vector.load %arg10[%c768, %c0_100] : memref<1280x256xf32, #tpu.memory_space<vmem>>, vector<32x128xf32>
    tpu.vector_store %arg10[%c768, %c0_100], %100 {strides = array<i32>} : memref<1280x256xf32, #tpu.memory_space<vmem>>, vector<32x128xf32>,
    %c0_101 = arith.constant 0 : index
    %c0_102 = arith.constant 0 : index
    %c25 = arith.constant 25 : index
    %102 = vector.load %arg8[%c0_101, %c0_102, %c25] : memref<2x32x167xf32, #tpu.memory_space<vmem>>, vector<1x32x128xf32>
    %103 = vector.shape_cast %102 : vector<1x32x128xf32> to vector<32x128xf32>
    %c800 = arith.constant 800 : index
    %c0_103 = arith.constant 0 : index
    %104 = vector.load %arg10[%c800, %c0_103] : memref<1280x256xf32, #tpu.memory_space<vmem>>, vector<32x128xf32>
    tpu.vector_store %arg10[%c800, %c0_103], %103 {strides = array<i32>} : memref<1280x256xf32, #tpu.memory_space<vmem>>, vector<32x128xf32>,
    %c0_104 = arith.constant 0 : index
    %c0_105 = arith.constant 0 : index
    %c26 = arith.constant 26 : index
    %105 = vector.load %arg8[%c0_104, %c0_105, %c26] : memref<2x32x167xf32, #tpu.memory_space<vmem>>, vector<1x32x128xf32>
    %106 = vector.shape_cast %105 : vector<1x32x128xf32> to vector<32x128xf32>
    %c832 = arith.constant 832 : index
    %c0_106 = arith.constant 0 : index
    %107 = vector.load %arg10[%c832, %c0_106] : memref<1280x256xf32, #tpu.memory_space<vmem>>, vector<32x128xf32>
    tpu.vector_store %arg10[%c832, %c0_106], %106 {strides = array<i32>} : memref<1280x256xf32, #tpu.memory_space<vmem>>, vector<32x128xf32>,
    %c0_107 = arith.constant 0 : index
    %c0_108 = arith.constant 0 : index
    %c27 = arith.constant 27 : index
    %108 = vector.load %arg8[%c0_107, %c0_108, %c27] : memref<2x32x167xf32, #tpu.memory_space<vmem>>, vector<1x32x128xf32>
    %109 = vector.shape_cast %108 : vector<1x32x128xf32> to vector<32x128xf32>
    %c864 = arith.constant 864 : index
    %c0_109 = arith.constant 0 : index
    %110 = vector.load %arg10[%c864, %c0_109] : memref<1280x256xf32, #tpu.memory_space<vmem>>, vector<32x128xf32>
    tpu.vector_store %arg10[%c864, %c0_109], %109 {strides = array<i32>} : memref<1280x256xf32, #tpu.memory_space<vmem>>, vector<32x128xf32>,
    %c0_110 = arith.constant 0 : index
    %c0_111 = arith.constant 0 : index
    %c28 = arith.constant 28 : index
    %111 = vector.load %arg8[%c0_110, %c0_111, %c28] : memref<2x32x167xf32, #tpu.memory_space<vmem>>, vector<1x32x128xf32>
    %112 = vector.shape_cast %111 : vector<1x32x128xf32> to vector<32x128xf32>
    %c896 = arith.constant 896 : index
    %c0_112 = arith.constant 0 : index
    %113 = vector.load %arg10[%c896, %c0_112] : memref<1280x256xf32, #tpu.memory_space<vmem>>, vector<32x128xf32>
    tpu.vector_store %arg10[%c896, %c0_112], %112 {strides = array<i32>} : memref<1280x256xf32, #tpu.memory_space<vmem>>, vector<32x128xf32>,
    %c0_113 = arith.constant 0 : index
    %c0_114 = arith.constant 0 : index
    %c29 = arith.constant 29 : index
    %114 = vector.load %arg8[%c0_113, %c0_114, %c29] : memref<2x32x167xf32, #tpu.memory_space<vmem>>, vector<1x32x128xf32>
    %115 = vector.shape_cast %114 : vector<1x32x128xf32> to vector<32x128xf32>
    %c928 = arith.constant 928 : index
    %c0_115 = arith.constant 0 : index
    %116 = vector.load %arg10[%c928, %c0_115] : memref<1280x256xf32, #tpu.memory_space<vmem>>, vector<32x128xf32>
    tpu.vector_store %arg10[%c928, %c0_115], %115 {strides = array<i32>} : memref<1280x256xf32, #tpu.memory_space<vmem>>, vector<32x128xf32>,
    %c0_116 = arith.constant 0 : index
    %c0_117 = arith.constant 0 : index
    %c30 = arith.constant 30 : index
    %117 = vector.load %arg8[%c0_116, %c0_117, %c30] : memref<2x32x167xf32, #tpu.memory_space<vmem>>, vector<1x32x128xf32>
    %118 = vector.shape_cast %117 : vector<1x32x128xf32> to vector<32x128xf32>
    %c960 = arith.constant 960 : index
    %c0_118 = arith.constant 0 : index
    %119 = vector.load %arg10[%c960, %c0_118] : memref<1280x256xf32, #tpu.memory_space<vmem>>, vector<32x128xf32>
    tpu.vector_store %arg10[%c960, %c0_118], %118 {strides = array<i32>} : memref<1280x256xf32, #tpu.memory_space<vmem>>, vector<32x128xf32>,
    %c0_119 = arith.constant 0 : index
    %c0_120 = arith.constant 0 : index
    %c31 = arith.constant 31 : index
    %120 = vector.load %arg8[%c0_119, %c0_120, %c31] : memref<2x32x167xf32, #tpu.memory_space<vmem>>, vector<1x32x128xf32>
    %121 = vector.shape_cast %120 : vector<1x32x128xf32> to vector<32x128xf32>
    %c992 = arith.constant 992 : index
    %c0_121 = arith.constant 0 : index
    %122 = vector.load %arg10[%c992, %c0_121] : memref<1280x256xf32, #tpu.memory_space<vmem>>, vector<32x128xf32>
    tpu.vector_store %arg10[%c992, %c0_121], %121 {strides = array<i32>} : memref<1280x256xf32, #tpu.memory_space<vmem>>, vector<32x128xf32>,
    %c0_122 = arith.constant 0 : index
    %c0_123 = arith.constant 0 : index
    %c32_124 = arith.constant 32 : index
    %123 = vector.load %arg8[%c0_122, %c0_123, %c32_124] : memref<2x32x167xf32, #tpu.memory_space<vmem>>, vector<1x32x128xf32>
    %124 = vector.shape_cast %123 : vector<1x32x128xf32> to vector<32x128xf32>
    %c1024 = arith.constant 1024 : index
    %c0_125 = arith.constant 0 : index
    %125 = vector.load %arg10[%c1024, %c0_125] : memref<1280x256xf32, #tpu.memory_space<vmem>>, vector<32x128xf32>
    tpu.vector_store %arg10[%c1024, %c0_125], %124 {strides = array<i32>} : memref<1280x256xf32, #tpu.memory_space<vmem>>, vector<32x128xf32>,
    %c0_126 = arith.constant 0 : index
    %c0_127 = arith.constant 0 : index
    %c33 = arith.constant 33 : index
    %126 = vector.load %arg8[%c0_126, %c0_127, %c33] : memref<2x32x167xf32, #tpu.memory_space<vmem>>, vector<1x32x128xf32>
    %127 = vector.shape_cast %126 : vector<1x32x128xf32> to vector<32x128xf32>
    %c1056 = arith.constant 1056 : index
    %c0_128 = arith.constant 0 : index
    %128 = vector.load %arg10[%c1056, %c0_128] : memref<1280x256xf32, #tpu.memory_space<vmem>>, vector<32x128xf32>
    tpu.vector_store %arg10[%c1056, %c0_128], %127 {strides = array<i32>} : memref<1280x256xf32, #tpu.memory_space<vmem>>, vector<32x128xf32>,
    %c0_129 = arith.constant 0 : index
    %c0_130 = arith.constant 0 : index
    %c34 = arith.constant 34 : index
    %129 = vector.load %arg8[%c0_129, %c0_130, %c34] : memref<2x32x167xf32, #tpu.memory_space<vmem>>, vector<1x32x128xf32>
    %130 = vector.shape_cast %129 : vector<1x32x128xf32> to vector<32x128xf32>
    %c1088 = arith.constant 1088 : index
    %c0_131 = arith.constant 0 : index
    %131 = vector.load %arg10[%c1088, %c0_131] : memref<1280x256xf32, #tpu.memory_space<vmem>>, vector<32x128xf32>
    tpu.vector_store %arg10[%c1088, %c0_131], %130 {strides = array<i32>} : memref<1280x256xf32, #tpu.memory_space<vmem>>, vector<32x128xf32>,
    %c0_132 = arith.constant 0 : index
    %c0_133 = arith.constant 0 : index
    %c35 = arith.constant 35 : index
    %132 = vector.load %arg8[%c0_132, %c0_133, %c35] : memref<2x32x167xf32, #tpu.memory_space<vmem>>, vector<1x32x128xf32>
    %133 = vector.shape_cast %132 : vector<1x32x128xf32> to vector<32x128xf32>
    %c1120 = arith.constant 1120 : index
    %c0_134 = arith.constant 0 : index
    %134 = vector.load %arg10[%c1120, %c0_134] : memref<1280x256xf32, #tpu.memory_space<vmem>>, vector<32x128xf32>
    tpu.vector_store %arg10[%c1120, %c0_134], %133 {strides = array<i32>} : memref<1280x256xf32, #tpu.memory_space<vmem>>, vector<32x128xf32>,
    %c0_135 = arith.constant 0 : index
    %c0_136 = arith.constant 0 : index
    %c36 = arith.constant 36 : index
    %135 = vector.load %arg8[%c0_135, %c0_136, %c36] : memref<2x32x167xf32, #tpu.memory_space<vmem>>, vector<1x32x128xf32>
    %136 = vector.shape_cast %135 : vector<1x32x128xf32> to vector<32x128xf32>
    %c1152 = arith.constant 1152 : index
    %c0_137 = arith.constant 0 : index
    %137 = vector.load %arg10[%c1152, %c0_137] : memref<1280x256xf32, #tpu.memory_space<vmem>>, vector<32x128xf32>
    tpu.vector_store %arg10[%c1152, %c0_137], %136 {strides = array<i32>} : memref<1280x256xf32, #tpu.memory_space<vmem>>, vector<32x128xf32>,
    %c0_138 = arith.constant 0 : index
    %c0_139 = arith.constant 0 : index
    %c37 = arith.constant 37 : index
    %138 = vector.load %arg8[%c0_138, %c0_139, %c37] : memref<2x32x167xf32, #tpu.memory_space<vmem>>, vector<1x32x128xf32>
    %139 = vector.shape_cast %138 : vector<1x32x128xf32> to vector<32x128xf32>
    %c1184 = arith.constant 1184 : index
    %c0_140 = arith.constant 0 : index
    %140 = vector.load %arg10[%c1184, %c0_140] : memref<1280x256xf32, #tpu.memory_space<vmem>>, vector<32x128xf32>
    tpu.vector_store %arg10[%c1184, %c0_140], %139 {strides = array<i32>} : memref<1280x256xf32, #tpu.memory_space<vmem>>, vector<32x128xf32>,
    %c0_141 = arith.constant 0 : index
    %c0_142 = arith.constant 0 : index
    %c38 = arith.constant 38 : index
    %141 = vector.load %arg8[%c0_141, %c0_142, %c38] : memref<2x32x167xf32, #tpu.memory_space<vmem>>, vector<1x32x128xf32>
    %142 = vector.shape_cast %141 : vector<1x32x128xf32> to vector<32x128xf32>
    %c1216 = arith.constant 1216 : index
    %c0_143 = arith.constant 0 : index
    %143 = vector.load %arg10[%c1216, %c0_143] : memref<1280x256xf32, #tpu.memory_space<vmem>>, vector<32x128xf32>
    tpu.vector_store %arg10[%c1216, %c0_143], %142 {strides = array<i32>} : memref<1280x256xf32, #tpu.memory_space<vmem>>, vector<32x128xf32>,
    %c0_144 = arith.constant 0 : index
    %c0_145 = arith.constant 0 : index
    %c39 = arith.constant 39 : index
    %144 = vector.load %arg8[%c0_144, %c0_145, %c39] : memref<2x32x167xf32, #tpu.memory_space<vmem>>, vector<1x32x128xf32>
    %145 = vector.shape_cast %144 : vector<1x32x128xf32> to vector<32x128xf32>
    %c1248 = arith.constant 1248 : index
    %c0_146 = arith.constant 0 : index
    %146 = vector.load %arg10[%c1248, %c0_146] : memref<1280x256xf32, #tpu.memory_space<vmem>>, vector<32x128xf32>
    tpu.vector_store %arg10[%c1248, %c0_146], %145 {strides = array<i32>} : memref<1280x256xf32, #tpu.memory_space<vmem>>, vector<32x128xf32>,
    %c1_147 = arith.constant 1 : index
    %c0_148 = arith.constant 0 : index
    %c0_149 = arith.constant 0 : index
    %147 = vector.load %arg8[%c1_147, %c0_148, %c0_149] : memref<2x32x167xf32, #tpu.memory_space<vmem>>, vector<1x32x128xf32>
    %148 = vector.shape_cast %147 : vector<1x32x128xf32> to vector<32x128xf32>
    %c0_150 = arith.constant 0 : index
    %c128_151 = arith.constant 128 : index
    %149 = vector.load %arg10[%c0_150, %c128_151] : memref<1280x256xf32, #tpu.memory_space<vmem>>, vector<32x128xf32>
    tpu.vector_store %arg10[%c0_150, %c128_151], %148 {strides = array<i32>} : memref<1280x256xf32, #tpu.memory_space<vmem>>, vector<32x128xf32>,
    %c1_152 = arith.constant 1 : index
    %c0_153 = arith.constant 0 : index
    %c1_154 = arith.constant 1 : index
    %150 = vector.load %arg8[%c1_152, %c0_153, %c1_154] : memref<2x32x167xf32, #tpu.memory_space<vmem>>, vector<1x32x128xf32>
    %151 = vector.shape_cast %150 : vector<1x32x128xf32> to vector<32x128xf32>
    %c32_155 = arith.constant 32 : index
    %c128_156 = arith.constant 128 : index
    %152 = vector.load %arg10[%c32_155, %c128_156] : memref<1280x256xf32, #tpu.memory_space<vmem>>, vector<32x128xf32>
    tpu.vector_store %arg10[%c32_155, %c128_156], %151 {strides = array<i32>} : memref<1280x256xf32, #tpu.memory_space<vmem>>, vector<32x128xf32>,
    %c1_157 = arith.constant 1 : index
    %c0_158 = arith.constant 0 : index
    %c2_159 = arith.constant 2 : index
    %153 = vector.load %arg8[%c1_157, %c0_158, %c2_159] : memref<2x32x167xf32, #tpu.memory_space<vmem>>, vector<1x32x128xf32>
    %154 = vector.shape_cast %153 : vector<1x32x128xf32> to vector<32x128xf32>
    %c64_160 = arith.constant 64 : index
    %c128_161 = arith.constant 128 : index
    %155 = vector.load %arg10[%c64_160, %c128_161] : memref<1280x256xf32, #tpu.memory_space<vmem>>, vector<32x128xf32>
    tpu.vector_store %arg10[%c64_160, %c128_161], %154 {strides = array<i32>} : memref<1280x256xf32, #tpu.memory_space<vmem>>, vector<32x128xf32>,
    %c1_162 = arith.constant 1 : index
    %c0_163 = arith.constant 0 : index
    %c3_164 = arith.constant 3 : index
    %156 = vector.load %arg8[%c1_162, %c0_163, %c3_164] : memref<2x32x167xf32, #tpu.memory_space<vmem>>, vector<1x32x128xf32>
    %157 = vector.shape_cast %156 : vector<1x32x128xf32> to vector<32x128xf32>
    %c96_165 = arith.constant 96 : index
    %c128_166 = arith.constant 128 : index
    %158 = vector.load %arg10[%c96_165, %c128_166] : memref<1280x256xf32, #tpu.memory_space<vmem>>, vector<32x128xf32>
    tpu.vector_store %arg10[%c96_165, %c128_166], %157 {strides = array<i32>} : memref<1280x256xf32, #tpu.memory_space<vmem>>, vector<32x128xf32>,
    %c1_167 = arith.constant 1 : index
    %c0_168 = arith.constant 0 : index
    %c4_169 = arith.constant 4 : index
    %159 = vector.load %arg8[%c1_167, %c0_168, %c4_169] : memref<2x32x167xf32, #tpu.memory_space<vmem>>, vector<1x32x128xf32>
    %160 = vector.shape_cast %159 : vector<1x32x128xf32> to vector<32x128xf32>
    %c128_170 = arith.constant 128 : index
    %c128_171 = arith.constant 128 : index
    %161 = vector.load %arg10[%c128_170, %c128_171] : memref<1280x256xf32, #tpu.memory_space<vmem>>, vector<32x128xf32>
    tpu.vector_store %arg10[%c128_170, %c128_171], %160 {strides = array<i32>} : memref<1280x256xf32, #tpu.memory_space<vmem>>, vector<32x128xf32>,
    %c1_172 = arith.constant 1 : index
    %c0_173 = arith.constant 0 : index
    %c5_174 = arith.constant 5 : index
    %162 = vector.load %arg8[%c1_172, %c0_173, %c5_174] : memref<2x32x167xf32, #tpu.memory_space<vmem>>, vector<1x32x128xf32>
    %163 = vector.shape_cast %162 : vector<1x32x128xf32> to vector<32x128xf32>
    %c160_175 = arith.constant 160 : index
    %c128_176 = arith.constant 128 : index
    %164 = vector.load %arg10[%c160_175, %c128_176] : memref<1280x256xf32, #tpu.memory_space<vmem>>, vector<32x128xf32>
    tpu.vector_store %arg10[%c160_175, %c128_176], %163 {strides = array<i32>} : memref<1280x256xf32, #tpu.memory_space<vmem>>, vector<32x128xf32>,
    %c1_177 = arith.constant 1 : index
    %c0_178 = arith.constant 0 : index
    %c6_179 = arith.constant 6 : index
    %165 = vector.load %arg8[%c1_177, %c0_178, %c6_179] : memref<2x32x167xf32, #tpu.memory_space<vmem>>, vector<1x32x128xf32>
    %166 = vector.shape_cast %165 : vector<1x32x128xf32> to vector<32x128xf32>
    %c192_180 = arith.constant 192 : index
    %c128_181 = arith.constant 128 : index
    %167 = vector.load %arg10[%c192_180, %c128_181] : memref<1280x256xf32, #tpu.memory_space<vmem>>, vector<32x128xf32>
    tpu.vector_store %arg10[%c192_180, %c128_181], %166 {strides = array<i32>} : memref<1280x256xf32, #tpu.memory_space<vmem>>, vector<32x128xf32>,
    %c1_182 = arith.constant 1 : index
    %c0_183 = arith.constant 0 : index
    %c7_184 = arith.constant 7 : index
    %168 = vector.load %arg8[%c1_182, %c0_183, %c7_184] : memref<2x32x167xf32, #tpu.memory_space<vmem>>, vector<1x32x128xf32>
    %169 = vector.shape_cast %168 : vector<1x32x128xf32> to vector<32x128xf32>
    %c224_185 = arith.constant 224 : index
    %c128_186 = arith.constant 128 : index
    %170 = vector.load %arg10[%c224_185, %c128_186] : memref<1280x256xf32, #tpu.memory_space<vmem>>, vector<32x128xf32>
    tpu.vector_store %arg10[%c224_185, %c128_186], %169 {strides = array<i32>} : memref<1280x256xf32, #tpu.memory_space<vmem>>, vector<32x128xf32>,
    %c1_187 = arith.constant 1 : index
    %c0_188 = arith.constant 0 : index
    %c8_189 = arith.constant 8 : index
    %171 = vector.load %arg8[%c1_187, %c0_188, %c8_189] : memref<2x32x167xf32, #tpu.memory_space<vmem>>, vector<1x32x128xf32>
    %172 = vector.shape_cast %171 : vector<1x32x128xf32> to vector<32x128xf32>
    %c256_190 = arith.constant 256 : index
    %c128_191 = arith.constant 128 : index
    %173 = vector.load %arg10[%c256_190, %c128_191] : memref<1280x256xf32, #tpu.memory_space<vmem>>, vector<32x128xf32>
    tpu.vector_store %arg10[%c256_190, %c128_191], %172 {strides = array<i32>} : memref<1280x256xf32, #tpu.memory_space<vmem>>, vector<32x128xf32>,
    %c1_192 = arith.constant 1 : index
    %c0_193 = arith.constant 0 : index
    %c9_194 = arith.constant 9 : index
    %174 = vector.load %arg8[%c1_192, %c0_193, %c9_194] : memref<2x32x167xf32, #tpu.memory_space<vmem>>, vector<1x32x128xf32>
    %175 = vector.shape_cast %174 : vector<1x32x128xf32> to vector<32x128xf32>
    %c288_195 = arith.constant 288 : index
    %c128_196 = arith.constant 128 : index
    %176 = vector.load %arg10[%c288_195, %c128_196] : memref<1280x256xf32, #tpu.memory_space<vmem>>, vector<32x128xf32>
    tpu.vector_store %arg10[%c288_195, %c128_196], %175 {strides = array<i32>} : memref<1280x256xf32, #tpu.memory_space<vmem>>, vector<32x128xf32>,
    %c1_197 = arith.constant 1 : index
    %c0_198 = arith.constant 0 : index
    %c10_199 = arith.constant 10 : index
    %177 = vector.load %arg8[%c1_197, %c0_198, %c10_199] : memref<2x32x167xf32, #tpu.memory_space<vmem>>, vector<1x32x128xf32>
    %178 = vector.shape_cast %177 : vector<1x32x128xf32> to vector<32x128xf32>
    %c320_200 = arith.constant 320 : index
    %c128_201 = arith.constant 128 : index
    %179 = vector.load %arg10[%c320_200, %c128_201] : memref<1280x256xf32, #tpu.memory_space<vmem>>, vector<32x128xf32>
    tpu.vector_store %arg10[%c320_200, %c128_201], %178 {strides = array<i32>} : memref<1280x256xf32, #tpu.memory_space<vmem>>, vector<32x128xf32>,
    %c1_202 = arith.constant 1 : index
    %c0_203 = arith.constant 0 : index
    %c11_204 = arith.constant 11 : index
    %180 = vector.load %arg8[%c1_202, %c0_203, %c11_204] : memref<2x32x167xf32, #tpu.memory_space<vmem>>, vector<1x32x128xf32>
    %181 = vector.shape_cast %180 : vector<1x32x128xf32> to vector<32x128xf32>
    %c352_205 = arith.constant 352 : index
    %c128_206 = arith.constant 128 : index
    %182 = vector.load %arg10[%c352_205, %c128_206] : memref<1280x256xf32, #tpu.memory_space<vmem>>, vector<32x128xf32>
    tpu.vector_store %arg10[%c352_205, %c128_206], %181 {strides = array<i32>} : memref<1280x256xf32, #tpu.memory_space<vmem>>, vector<32x128xf32>,
    %c1_207 = arith.constant 1 : index
    %c0_208 = arith.constant 0 : index
    %c12_209 = arith.constant 12 : index
    %183 = vector.load %arg8[%c1_207, %c0_208, %c12_209] : memref<2x32x167xf32, #tpu.memory_space<vmem>>, vector<1x32x128xf32>
    %184 = vector.shape_cast %183 : vector<1x32x128xf32> to vector<32x128xf32>
    %c384_210 = arith.constant 384 : index
    %c128_211 = arith.constant 128 : index
    %185 = vector.load %arg10[%c384_210, %c128_211] : memref<1280x256xf32, #tpu.memory_space<vmem>>, vector<32x128xf32>
    tpu.vector_store %arg10[%c384_210, %c128_211], %184 {strides = array<i32>} : memref<1280x256xf32, #tpu.memory_space<vmem>>, vector<32x128xf32>,
    %c1_212 = arith.constant 1 : index
    %c0_213 = arith.constant 0 : index
    %c13_214 = arith.constant 13 : index
    %186 = vector.load %arg8[%c1_212, %c0_213, %c13_214] : memref<2x32x167xf32, #tpu.memory_space<vmem>>, vector<1x32x128xf32>
    %187 = vector.shape_cast %186 : vector<1x32x128xf32> to vector<32x128xf32>
    %c416_215 = arith.constant 416 : index
    %c128_216 = arith.constant 128 : index
    %188 = vector.load %arg10[%c416_215, %c128_216] : memref<1280x256xf32, #tpu.memory_space<vmem>>, vector<32x128xf32>
    tpu.vector_store %arg10[%c416_215, %c128_216], %187 {strides = array<i32>} : memref<1280x256xf32, #tpu.memory_space<vmem>>, vector<32x128xf32>,
    %c1_217 = arith.constant 1 : index
    %c0_218 = arith.constant 0 : index
    %c14_219 = arith.constant 14 : index
    %189 = vector.load %arg8[%c1_217, %c0_218, %c14_219] : memref<2x32x167xf32, #tpu.memory_space<vmem>>, vector<1x32x128xf32>
    %190 = vector.shape_cast %189 : vector<1x32x128xf32> to vector<32x128xf32>
    %c448_220 = arith.constant 448 : index
    %c128_221 = arith.constant 128 : index
    %191 = vector.load %arg10[%c448_220, %c128_221] : memref<1280x256xf32, #tpu.memory_space<vmem>>, vector<32x128xf32>
    tpu.vector_store %arg10[%c448_220, %c128_221], %190 {strides = array<i32>} : memref<1280x256xf32, #tpu.memory_space<vmem>>, vector<32x128xf32>,
    %c1_222 = arith.constant 1 : index
    %c0_223 = arith.constant 0 : index
    %c15_224 = arith.constant 15 : index
    %192 = vector.load %arg8[%c1_222, %c0_223, %c15_224] : memref<2x32x167xf32, #tpu.memory_space<vmem>>, vector<1x32x128xf32>
    %193 = vector.shape_cast %192 : vector<1x32x128xf32> to vector<32x128xf32>
    %c480_225 = arith.constant 480 : index
    %c128_226 = arith.constant 128 : index
    %194 = vector.load %arg10[%c480_225, %c128_226] : memref<1280x256xf32, #tpu.memory_space<vmem>>, vector<32x128xf32>
    tpu.vector_store %arg10[%c480_225, %c128_226], %193 {strides = array<i32>} : memref<1280x256xf32, #tpu.memory_space<vmem>>, vector<32x128xf32>,
    %c1_227 = arith.constant 1 : index
    %c0_228 = arith.constant 0 : index
    %c16_229 = arith.constant 16 : index
    %195 = vector.load %arg8[%c1_227, %c0_228, %c16_229] : memref<2x32x167xf32, #tpu.memory_space<vmem>>, vector<1x32x128xf32>
    %196 = vector.shape_cast %195 : vector<1x32x128xf32> to vector<32x128xf32>
    %c512_230 = arith.constant 512 : index
    %c128_231 = arith.constant 128 : index
    %197 = vector.load %arg10[%c512_230, %c128_231] : memref<1280x256xf32, #tpu.memory_space<vmem>>, vector<32x128xf32>
    tpu.vector_store %arg10[%c512_230, %c128_231], %196 {strides = array<i32>} : memref<1280x256xf32, #tpu.memory_space<vmem>>, vector<32x128xf32>,
    %c1_232 = arith.constant 1 : index
    %c0_233 = arith.constant 0 : index
    %c17_234 = arith.constant 17 : index
    %198 = vector.load %arg8[%c1_232, %c0_233, %c17_234] : memref<2x32x167xf32, #tpu.memory_space<vmem>>, vector<1x32x128xf32>
    %199 = vector.shape_cast %198 : vector<1x32x128xf32> to vector<32x128xf32>
    %c544_235 = arith.constant 544 : index
    %c128_236 = arith.constant 128 : index
    %200 = vector.load %arg10[%c544_235, %c128_236] : memref<1280x256xf32, #tpu.memory_space<vmem>>, vector<32x128xf32>
    tpu.vector_store %arg10[%c544_235, %c128_236], %199 {strides = array<i32>} : memref<1280x256xf32, #tpu.memory_space<vmem>>, vector<32x128xf32>,
    %c1_237 = arith.constant 1 : index
    %c0_238 = arith.constant 0 : index
    %c18_239 = arith.constant 18 : index
    %201 = vector.load %arg8[%c1_237, %c0_238, %c18_239] : memref<2x32x167xf32, #tpu.memory_space<vmem>>, vector<1x32x128xf32>
    %202 = vector.shape_cast %201 : vector<1x32x128xf32> to vector<32x128xf32>
    %c576_240 = arith.constant 576 : index
    %c128_241 = arith.constant 128 : index
    %203 = vector.load %arg10[%c576_240, %c128_241] : memref<1280x256xf32, #tpu.memory_space<vmem>>, vector<32x128xf32>
    tpu.vector_store %arg10[%c576_240, %c128_241], %202 {strides = array<i32>} : memref<1280x256xf32, #tpu.memory_space<vmem>>, vector<32x128xf32>,
    %c1_242 = arith.constant 1 : index
    %c0_243 = arith.constant 0 : index
    %c19_244 = arith.constant 19 : index
    %204 = vector.load %arg8[%c1_242, %c0_243, %c19_244] : memref<2x32x167xf32, #tpu.memory_space<vmem>>, vector<1x32x128xf32>
    %205 = vector.shape_cast %204 : vector<1x32x128xf32> to vector<32x128xf32>
    %c608_245 = arith.constant 608 : index
    %c128_246 = arith.constant 128 : index
    %206 = vector.load %arg10[%c608_245, %c128_246] : memref<1280x256xf32, #tpu.memory_space<vmem>>, vector<32x128xf32>
    tpu.vector_store %arg10[%c608_245, %c128_246], %205 {strides = array<i32>} : memref<1280x256xf32, #tpu.memory_space<vmem>>, vector<32x128xf32>,
    %c1_247 = arith.constant 1 : index
    %c0_248 = arith.constant 0 : index
    %c20_249 = arith.constant 20 : index
    %207 = vector.load %arg8[%c1_247, %c0_248, %c20_249] : memref<2x32x167xf32, #tpu.memory_space<vmem>>, vector<1x32x128xf32>
    %208 = vector.shape_cast %207 : vector<1x32x128xf32> to vector<32x128xf32>
    %c640_250 = arith.constant 640 : index
    %c128_251 = arith.constant 128 : index
    %209 = vector.load %arg10[%c640_250, %c128_251] : memref<1280x256xf32, #tpu.memory_space<vmem>>, vector<32x128xf32>
    tpu.vector_store %arg10[%c640_250, %c128_251], %208 {strides = array<i32>} : memref<1280x256xf32, #tpu.memory_space<vmem>>, vector<32x128xf32>,
    %c1_252 = arith.constant 1 : index
    %c0_253 = arith.constant 0 : index
    %c21_254 = arith.constant 21 : index
    %210 = vector.load %arg8[%c1_252, %c0_253, %c21_254] : memref<2x32x167xf32, #tpu.memory_space<vmem>>, vector<1x32x128xf32>
    %211 = vector.shape_cast %210 : vector<1x32x128xf32> to vector<32x128xf32>
    %c672_255 = arith.constant 672 : index
    %c128_256 = arith.constant 128 : index
    %212 = vector.load %arg10[%c672_255, %c128_256] : memref<1280x256xf32, #tpu.memory_space<vmem>>, vector<32x128xf32>
    tpu.vector_store %arg10[%c672_255, %c128_256], %211 {strides = array<i32>} : memref<1280x256xf32, #tpu.memory_space<vmem>>, vector<32x128xf32>,
    %c1_257 = arith.constant 1 : index
    %c0_258 = arith.constant 0 : index
    %c22_259 = arith.constant 22 : index
    %213 = vector.load %arg8[%c1_257, %c0_258, %c22_259] : memref<2x32x167xf32, #tpu.memory_space<vmem>>, vector<1x32x128xf32>
    %214 = vector.shape_cast %213 : vector<1x32x128xf32> to vector<32x128xf32>
    %c704_260 = arith.constant 704 : index
    %c128_261 = arith.constant 128 : index
    %215 = vector.load %arg10[%c704_260, %c128_261] : memref<1280x256xf32, #tpu.memory_space<vmem>>, vector<32x128xf32>
    tpu.vector_store %arg10[%c704_260, %c128_261], %214 {strides = array<i32>} : memref<1280x256xf32, #tpu.memory_space<vmem>>, vector<32x128xf32>,
    %c1_262 = arith.constant 1 : index
    %c0_263 = arith.constant 0 : index
    %c23_264 = arith.constant 23 : index
    %216 = vector.load %arg8[%c1_262, %c0_263, %c23_264] : memref<2x32x167xf32, #tpu.memory_space<vmem>>, vector<1x32x128xf32>
    %217 = vector.shape_cast %216 : vector<1x32x128xf32> to vector<32x128xf32>
    %c736_265 = arith.constant 736 : index
    %c128_266 = arith.constant 128 : index
    %218 = vector.load %arg10[%c736_265, %c128_266] : memref<1280x256xf32, #tpu.memory_space<vmem>>, vector<32x128xf32>
    tpu.vector_store %arg10[%c736_265, %c128_266], %217 {strides = array<i32>} : memref<1280x256xf32, #tpu.memory_space<vmem>>, vector<32x128xf32>,
    %c1_267 = arith.constant 1 : index
    %c0_268 = arith.constant 0 : index
    %c24_269 = arith.constant 24 : index
    %219 = vector.load %arg8[%c1_267, %c0_268, %c24_269] : memref<2x32x167xf32, #tpu.memory_space<vmem>>, vector<1x32x128xf32>
    %220 = vector.shape_cast %219 : vector<1x32x128xf32> to vector<32x128xf32>
    %c768_270 = arith.constant 768 : index
    %c128_271 = arith.constant 128 : index
    %221 = vector.load %arg10[%c768_270, %c128_271] : memref<1280x256xf32, #tpu.memory_space<vmem>>, vector<32x128xf32>
    tpu.vector_store %arg10[%c768_270, %c128_271], %220 {strides = array<i32>} : memref<1280x256xf32, #tpu.memory_space<vmem>>, vector<32x128xf32>,
    %c1_272 = arith.constant 1 : index
    %c0_273 = arith.constant 0 : index
    %c25_274 = arith.constant 25 : index
    %222 = vector.load %arg8[%c1_272, %c0_273, %c25_274] : memref<2x32x167xf32, #tpu.memory_space<vmem>>, vector<1x32x128xf32>
    %223 = vector.shape_cast %222 : vector<1x32x128xf32> to vector<32x128xf32>
    %c800_275 = arith.constant 800 : index
    %c128_276 = arith.constant 128 : index
    %224 = vector.load %arg10[%c800_275, %c128_276] : memref<1280x256xf32, #tpu.memory_space<vmem>>, vector<32x128xf32>
    tpu.vector_store %arg10[%c800_275, %c128_276], %223 {strides = array<i32>} : memref<1280x256xf32, #tpu.memory_space<vmem>>, vector<32x128xf32>,
    %c1_277 = arith.constant 1 : index
    %c0_278 = arith.constant 0 : index
    %c26_279 = arith.constant 26 : index
    %225 = vector.load %arg8[%c1_277, %c0_278, %c26_279] : memref<2x32x167xf32, #tpu.memory_space<vmem>>, vector<1x32x128xf32>
    %226 = vector.shape_cast %225 : vector<1x32x128xf32> to vector<32x128xf32>
    %c832_280 = arith.constant 832 : index
    %c128_281 = arith.constant 128 : index
    %227 = vector.load %arg10[%c832_280, %c128_281] : memref<1280x256xf32, #tpu.memory_space<vmem>>, vector<32x128xf32>
    tpu.vector_store %arg10[%c832_280, %c128_281], %226 {strides = array<i32>} : memref<1280x256xf32, #tpu.memory_space<vmem>>, vector<32x128xf32>,
    %c1_282 = arith.constant 1 : index
    %c0_283 = arith.constant 0 : index
    %c27_284 = arith.constant 27 : index
    %228 = vector.load %arg8[%c1_282, %c0_283, %c27_284] : memref<2x32x167xf32, #tpu.memory_space<vmem>>, vector<1x32x128xf32>
    %229 = vector.shape_cast %228 : vector<1x32x128xf32> to vector<32x128xf32>
    %c864_285 = arith.constant 864 : index
    %c128_286 = arith.constant 128 : index
    %230 = vector.load %arg10[%c864_285, %c128_286] : memref<1280x256xf32, #tpu.memory_space<vmem>>, vector<32x128xf32>
    tpu.vector_store %arg10[%c864_285, %c128_286], %229 {strides = array<i32>} : memref<1280x256xf32, #tpu.memory_space<vmem>>, vector<32x128xf32>,
    %c1_287 = arith.constant 1 : index
    %c0_288 = arith.constant 0 : index
    %c28_289 = arith.constant 28 : index
    %231 = vector.load %arg8[%c1_287, %c0_288, %c28_289] : memref<2x32x167xf32, #tpu.memory_space<vmem>>, vector<1x32x128xf32>
    %232 = vector.shape_cast %231 : vector<1x32x128xf32> to vector<32x128xf32>
    %c896_290 = arith.constant 896 : index
    %c128_291 = arith.constant 128 : index
    %233 = vector.load %arg10[%c896_290, %c128_291] : memref<1280x256xf32, #tpu.memory_space<vmem>>, vector<32x128xf32>
    tpu.vector_store %arg10[%c896_290, %c128_291], %232 {strides = array<i32>} : memref<1280x256xf32, #tpu.memory_space<vmem>>, vector<32x128xf32>,
    %c1_292 = arith.constant 1 : index
    %c0_293 = arith.constant 0 : index
    %c29_294 = arith.constant 29 : index
    %234 = vector.load %arg8[%c1_292, %c0_293, %c29_294] : memref<2x32x167xf32, #tpu.memory_space<vmem>>, vector<1x32x128xf32>
    %235 = vector.shape_cast %234 : vector<1x32x128xf32> to vector<32x128xf32>
    %c928_295 = arith.constant 928 : index
    %c128_296 = arith.constant 128 : index
    %236 = vector.load %arg10[%c928_295, %c128_296] : memref<1280x256xf32, #tpu.memory_space<vmem>>, vector<32x128xf32>
    tpu.vector_store %arg10[%c928_295, %c128_296], %235 {strides = array<i32>} : memref<1280x256xf32, #tpu.memory_space<vmem>>, vector<32x128xf32>,
    %c1_297 = arith.constant 1 : index
    %c0_298 = arith.constant 0 : index
    %c30_299 = arith.constant 30 : index
    %237 = vector.load %arg8[%c1_297, %c0_298, %c30_299] : memref<2x32x167xf32, #tpu.memory_space<vmem>>, vector<1x32x128xf32>
    %238 = vector.shape_cast %237 : vector<1x32x128xf32> to vector<32x128xf32>
    %c960_300 = arith.constant 960 : index
    %c128_301 = arith.constant 128 : index
    %239 = vector.load %arg10[%c960_300, %c128_301] : memref<1280x256xf32, #tpu.memory_space<vmem>>, vector<32x128xf32>
    tpu.vector_store %arg10[%c960_300, %c128_301], %238 {strides = array<i32>} : memref<1280x256xf32, #tpu.memory_space<vmem>>, vector<32x128xf32>,
    %c1_302 = arith.constant 1 : index
    %c0_303 = arith.constant 0 : index
    %c31_304 = arith.constant 31 : index
    %240 = vector.load %arg8[%c1_302, %c0_303, %c31_304] : memref<2x32x167xf32, #tpu.memory_space<vmem>>, vector<1x32x128xf32>
    %241 = vector.shape_cast %240 : vector<1x32x128xf32> to vector<32x128xf32>
    %c992_305 = arith.constant 992 : index
    %c128_306 = arith.constant 128 : index
    %242 = vector.load %arg10[%c992_305, %c128_306] : memref<1280x256xf32, #tpu.memory_space<vmem>>, vector<32x128xf32>
    tpu.vector_store %arg10[%c992_305, %c128_306], %241 {strides = array<i32>} : memref<1280x256xf32, #tpu.memory_space<vmem>>, vector<32x128xf32>,
    %c1_307 = arith.constant 1 : index
    %c0_308 = arith.constant 0 : index
    %c32_309 = arith.constant 32 : index
    %243 = vector.load %arg8[%c1_307, %c0_308, %c32_309] : memref<2x32x167xf32, #tpu.memory_space<vmem>>, vector<1x32x128xf32>
    %244 = vector.shape_cast %243 : vector<1x32x128xf32> to vector<32x128xf32>
    %c1024_310 = arith.constant 1024 : index
    %c128_311 = arith.constant 128 : index
    %245 = vector.load %arg10[%c1024_310, %c128_311] : memref<1280x256xf32, #tpu.memory_space<vmem>>, vector<32x128xf32>
    tpu.vector_store %arg10[%c1024_310, %c128_311], %244 {strides = array<i32>} : memref<1280x256xf32, #tpu.memory_space<vmem>>, vector<32x128xf32>,
    %c1_312 = arith.constant 1 : index
    %c0_313 = arith.constant 0 : index
    %c33_314 = arith.constant 33 : index
    %246 = vector.load %arg8[%c1_312, %c0_313, %c33_314] : memref<2x32x167xf32, #tpu.memory_space<vmem>>, vector<1x32x128xf32>
    %247 = vector.shape_cast %246 : vector<1x32x128xf32> to vector<32x128xf32>
    %c1056_315 = arith.constant 1056 : index
    %c128_316 = arith.constant 128 : index
    %248 = vector.load %arg10[%c1056_315, %c128_316] : memref<1280x256xf32, #tpu.memory_space<vmem>>, vector<32x128xf32>
    tpu.vector_store %arg10[%c1056_315, %c128_316], %247 {strides = array<i32>} : memref<1280x256xf32, #tpu.memory_space<vmem>>, vector<32x128xf32>,
    %c1_317 = arith.constant 1 : index
    %c0_318 = arith.constant 0 : index
    %c34_319 = arith.constant 34 : index
    %249 = vector.load %arg8[%c1_317, %c0_318, %c34_319] : memref<2x32x167xf32, #tpu.memory_space<vmem>>, vector<1x32x128xf32>
    %250 = vector.shape_cast %249 : vector<1x32x128xf32> to vector<32x128xf32>
    %c1088_320 = arith.constant 1088 : index
    %c128_321 = arith.constant 128 : index
    %251 = vector.load %arg10[%c1088_320, %c128_321] : memref<1280x256xf32, #tpu.memory_space<vmem>>, vector<32x128xf32>
    tpu.vector_store %arg10[%c1088_320, %c128_321], %250 {strides = array<i32>} : memref<1280x256xf32, #tpu.memory_space<vmem>>, vector<32x128xf32>,
    %c1_322 = arith.constant 1 : index
    %c0_323 = arith.constant 0 : index
    %c35_324 = arith.constant 35 : index
    %252 = vector.load %arg8[%c1_322, %c0_323, %c35_324] : memref<2x32x167xf32, #tpu.memory_space<vmem>>, vector<1x32x128xf32>
    %253 = vector.shape_cast %252 : vector<1x32x128xf32> to vector<32x128xf32>
    %c1120_325 = arith.constant 1120 : index
    %c128_326 = arith.constant 128 : index
    %254 = vector.load %arg10[%c1120_325, %c128_326] : memref<1280x256xf32, #tpu.memory_space<vmem>>, vector<32x128xf32>
    tpu.vector_store %arg10[%c1120_325, %c128_326], %253 {strides = array<i32>} : memref<1280x256xf32, #tpu.memory_space<vmem>>, vector<32x128xf32>,
    %c1_327 = arith.constant 1 : index
    %c0_328 = arith.constant 0 : index
    %c36_329 = arith.constant 36 : index
    %255 = vector.load %arg8[%c1_327, %c0_328, %c36_329] : memref<2x32x167xf32, #tpu.memory_space<vmem>>, vector<1x32x128xf32>
    %256 = vector.shape_cast %255 : vector<1x32x128xf32> to vector<32x128xf32>
    %c1152_330 = arith.constant 1152 : index
    %c128_331 = arith.constant 128 : index
    %257 = vector.load %arg10[%c1152_330, %c128_331] : memref<1280x256xf32, #tpu.memory_space<vmem>>, vector<32x128xf32>
    tpu.vector_store %arg10[%c1152_330, %c128_331], %256 {strides = array<i32>} : memref<1280x256xf32, #tpu.memory_space<vmem>>, vector<32x128xf32>,
    %c1_332 = arith.constant 1 : index
    %c0_333 = arith.constant 0 : index
    %c37_334 = arith.constant 37 : index
    %258 = vector.load %arg8[%c1_332, %c0_333, %c37_334] : memref<2x32x167xf32, #tpu.memory_space<vmem>>, vector<1x32x128xf32>
    %259 = vector.shape_cast %258 : vector<1x32x128xf32> to vector<32x128xf32>
    %c1184_335 = arith.constant 1184 : index
    %c128_336 = arith.constant 128 : index
    %260 = vector.load %arg10[%c1184_335, %c128_336] : memref<1280x256xf32, #tpu.memory_space<vmem>>, vector<32x128xf32>
    tpu.vector_store %arg10[%c1184_335, %c128_336], %259 {strides = array<i32>} : memref<1280x256xf32, #tpu.memory_space<vmem>>, vector<32x128xf32>,
    %c1_337 = arith.constant 1 : index
    %c0_338 = arith.constant 0 : index
    %c38_339 = arith.constant 38 : index
    %261 = vector.load %arg8[%c1_337, %c0_338, %c38_339] : memref<2x32x167xf32, #tpu.memory_space<vmem>>, vector<1x32x128xf32>
    %262 = vector.shape_cast %261 : vector<1x32x128xf32> to vector<32x128xf32>
    %c1216_340 = arith.constant 1216 : index
    %c128_341 = arith.constant 128 : index
    %263 = vector.load %arg10[%c1216_340, %c128_341] : memref<1280x256xf32, #tpu.memory_space<vmem>>, vector<32x128xf32>
    tpu.vector_store %arg10[%c1216_340, %c128_341], %262 {strides = array<i32>} : memref<1280x256xf32, #tpu.memory_space<vmem>>, vector<32x128xf32>,
    %c1_342 = arith.constant 1 : index
    %c0_343 = arith.constant 0 : index
    %c39_344 = arith.constant 39 : index
    %264 = vector.load %arg8[%c1_342, %c0_343, %c39_344] : memref<2x32x167xf32, #tpu.memory_space<vmem>>, vector<1x32x128xf32>
    %265 = vector.shape_cast %264 : vector<1x32x128xf32> to vector<32x128xf32>
    %c1248_345 = arith.constant 1248 : index
    %c128_346 = arith.constant 128 : index
    %266 = vector.load %arg10[%c1248_345, %c128_346] : memref<1280x256xf32, #tpu.memory_space<vmem>>, vector<32x128xf32>
    tpu.vector_store %arg10[%c1248_345, %c128_346], %265 {strides = array<i32>} : memref<1280x256xf32, #tpu.memory_space<vmem>>, vector<32x128xf32>,
    %c0_347 = arith.constant 0 : index
    %c0_348 = arith.constant 0 : index
    %267 = vector.load %arg3[%c0_347, %c0_348] : memref<24x1280xf32, #tpu.memory_space<vmem>>, vector<24x1280xf32>
    %c0_349 = arith.constant 0 : index
    %c0_350 = arith.constant 0 : index
    %268 = vector.load %arg10[%c0_349, %c0_350] : memref<1280x256xf32, #tpu.memory_space<vmem>>, vector<1280x256xf32>
    %cst_351 = arith.constant dense<0.000000e+00> : vector<24x256xf32>
    %269 = tpu.matmul %267, %268, %cst_351 {dimension_numbers = #tpu.dot_dimension_numbers<[1], [0], [0], [1], [0, 0, 1, 1], [], []>} : vector<24x1280xf32>, vector<1280x256xf32>, vector<24x256xf32> -> vector<24x256xf32>
    %c0_352 = arith.constant 0 : index
    %c0_353 = arith.constant 0 : index
    %270 = vector.load %arg5[%c0_352, %c0_353] : memref<24x1xf32, #tpu.memory_space<vmem>>, vector<24x1xf32>
    %271 = vector.broadcast %270 : vector<24x1xf32> to vector<24x256xf32>
    %272 = arith.addf %269, %271 : vector<24x256xf32>
    %cst_354 = arith.constant 0.000000e+00 : f32
    %273 = vector.broadcast %cst_354 : f32 to vector<24x256xf32>
    %274 = arith.maximumf %272, %273 : vector<24x256xf32>
    %c0_355 = arith.constant 0 : index
    %c0_356 = arith.constant 0 : index
    %275 = vector.load %arg7[%c0_355, %c0_356] : memref<32x256xf32, #tpu.memory_space<vmem>>, vector<24x256xf32>
    tpu.vector_store %arg7[%c0_355, %c0_356], %274 {strides = array<i32>} : memref<32x256xf32, #tpu.memory_space<vmem>>, vector<24x256xf32>,
    %cst_357 = arith.constant 0xFF800000 : f32
    %276 = vector.broadcast %cst_357 : f32 to vector<4x1xf32>
    %c0_358 = arith.constant 0 : index
    %c0_359 = arith.constant 0 : index
    %c0_360 = arith.constant 0 : index
    %277 = vector.load %arg9[%c0_358, %c0_359, %c0_360] : memref<2x4x130xf32, #tpu.memory_space<vmem>>, vector<1x4x1xf32>
    %278 = vector.shape_cast %277 : vector<1x4x1xf32> to vector<4x1xf32>
    %279 = vector.shape_cast %276 : vector<4x1xf32> to vector<1x4x1xf32>
    tpu.vector_store %arg9[%c0_358, %c0_359, %c0_360], %279 {strides = array<i32>} : memref<2x4x130xf32, #tpu.memory_space<vmem>>, vector<1x4x1xf32>,
    %cst_361 = arith.constant 0xFF800000 : f32
    %280 = vector.broadcast %cst_361 : f32 to vector<4x1xf32>
    %c0_362 = arith.constant 0 : index
    %c0_363 = arith.constant 0 : index
    %c129 = arith.constant 129 : index
    %281 = vector.load %arg9[%c0_362, %c0_363, %c129] : memref<2x4x130xf32, #tpu.memory_space<vmem>>, vector<1x4x1xf32>
    %282 = vector.shape_cast %281 : vector<1x4x1xf32> to vector<4x1xf32>
    %283 = vector.shape_cast %280 : vector<4x1xf32> to vector<1x4x1xf32>
    tpu.vector_store %arg9[%c0_362, %c0_363, %c129], %283 {strides = array<i32>} : memref<2x4x130xf32, #tpu.memory_space<vmem>>, vector<1x4x1xf32>,
    %284 = vector.extract_strided_slice %0 {offsets = [0, 0], sizes = [4, 128], strides = [1, 1]} : vector<4x256xf32> to vector<4x128xf32>
    %c0_364 = arith.constant 0 : index
    %c0_365 = arith.constant 0 : index
    %c1_366 = arith.constant 1 : index
    %285 = vector.load %arg9[%c0_364, %c0_365, %c1_366] : memref<2x4x130xf32, #tpu.memory_space<vmem>>, vector<1x4x128xf32>
    %286 = vector.shape_cast %285 : vector<1x4x128xf32> to vector<4x128xf32>
    %287 = vector.shape_cast %284 : vector<4x128xf32> to vector<1x4x128xf32>
    tpu.vector_store %arg9[%c0_364, %c0_365, %c1_366], %287 {strides = array<i32>} : memref<2x4x130xf32, #tpu.memory_space<vmem>>, vector<1x4x128xf32>,
    %cst_367 = arith.constant 0xFF800000 : f32
    %288 = vector.broadcast %cst_367 : f32 to vector<4x1xf32>
    %c1_368 = arith.constant 1 : index
    %c0_369 = arith.constant 0 : index
    %c0_370 = arith.constant 0 : index
    %289 = vector.load %arg9[%c1_368, %c0_369, %c0_370] : memref<2x4x130xf32, #tpu.memory_space<vmem>>, vector<1x4x1xf32>
    %290 = vector.shape_cast %289 : vector<1x4x1xf32> to vector<4x1xf32>
    %291 = vector.shape_cast %288 : vector<4x1xf32> to vector<1x4x1xf32>
    tpu.vector_store %arg9[%c1_368, %c0_369, %c0_370], %291 {strides = array<i32>} : memref<2x4x130xf32, #tpu.memory_space<vmem>>, vector<1x4x1xf32>,
    %cst_371 = arith.constant 0xFF800000 : f32
    %292 = vector.broadcast %cst_371 : f32 to vector<4x1xf32>
    %c1_372 = arith.constant 1 : index
    %c0_373 = arith.constant 0 : index
    %c129_374 = arith.constant 129 : index
    %293 = vector.load %arg9[%c1_372, %c0_373, %c129_374] : memref<2x4x130xf32, #tpu.memory_space<vmem>>, vector<1x4x1xf32>
    %294 = vector.shape_cast %293 : vector<1x4x1xf32> to vector<4x1xf32>
    %295 = vector.shape_cast %292 : vector<4x1xf32> to vector<1x4x1xf32>
    tpu.vector_store %arg9[%c1_372, %c0_373, %c129_374], %295 {strides = array<i32>} : memref<2x4x130xf32, #tpu.memory_space<vmem>>, vector<1x4x1xf32>,
    %296 = vector.extract_strided_slice %0 {offsets = [0, 128], sizes = [4, 128], strides = [1, 1]} : vector<4x256xf32> to vector<4x128xf32>
    %c1_375 = arith.constant 1 : index
    %c0_376 = arith.constant 0 : index
    %c1_377 = arith.constant 1 : index
    %297 = vector.load %arg9[%c1_375, %c0_376, %c1_377] : memref<2x4x130xf32, #tpu.memory_space<vmem>>, vector<1x4x128xf32>
    %298 = vector.shape_cast %297 : vector<1x4x128xf32> to vector<4x128xf32>
    %299 = vector.shape_cast %296 : vector<4x128xf32> to vector<1x4x128xf32>
    tpu.vector_store %arg9[%c1_375, %c0_376, %c1_377], %299 {strides = array<i32>} : memref<2x4x130xf32, #tpu.memory_space<vmem>>, vector<1x4x128xf32>,
    %c0_378 = arith.constant 0 : index
    %c0_379 = arith.constant 0 : index
    %c0_380 = arith.constant 0 : index
    %300 = vector.load %arg9[%c0_378, %c0_379, %c0_380] : memref<2x4x130xf32, #tpu.memory_space<vmem>>, vector<1x4x130xf32>
    %301 = vector.shape_cast %300 : vector<1x4x130xf32> to vector<4x130xf32>
    %302 = vector.extract_strided_slice %301 {offsets = [0, 0], sizes = [4, 128], strides = [1, 1]} : vector<4x130xf32> to vector<4x128xf32>
    %303 = vector.extract_strided_slice %301 {offsets = [0, 1], sizes = [4, 128], strides = [1, 1]} : vector<4x130xf32> to vector<4x128xf32>
    %304 = arith.maximumf %302, %303 : vector<4x128xf32>
    %305 = vector.extract_strided_slice %301 {offsets = [0, 2], sizes = [4, 128], strides = [1, 1]} : vector<4x130xf32> to vector<4x128xf32>
    %306 = arith.maximumf %304, %305 : vector<4x128xf32>
    %c0_381 = arith.constant 0 : index
    %c0_382 = arith.constant 0 : index
    %307 = vector.load %arg4[%c0_381, %c0_382] : memref<8x4xf32, #tpu.memory_space<vmem>>, vector<8x4xf32>
    %cst_383 = arith.constant dense<0.000000e+00> : vector<8x128xf32>
    %308 = tpu.matmul %307, %306, %cst_383 {dimension_numbers = #tpu.dot_dimension_numbers<[1], [0], [0], [1], [0, 0, 1, 1], [], []>} : vector<8x4xf32>, vector<4x128xf32>, vector<8x128xf32> -> vector<8x128xf32>
    %c0_384 = arith.constant 0 : index
    %c0_385 = arith.constant 0 : index
    %309 = vector.load %arg6[%c0_384, %c0_385] : memref<8x1xf32, #tpu.memory_space<vmem>>, vector<8x1xf32>
    %310 = vector.broadcast %309 : vector<8x1xf32> to vector<8x128xf32>
    %311 = arith.addf %308, %310 : vector<8x128xf32>
    %cst_386 = arith.constant 0.000000e+00 : f32
    %312 = vector.broadcast %cst_386 : f32 to vector<8x128xf32>
    %313 = arith.maximumf %311, %312 : vector<8x128xf32>
    %c24_387 = arith.constant 24 : index
    %c0_388 = arith.constant 0 : index
    %314 = vector.load %arg7[%c24_387, %c0_388] : memref<32x256xf32, #tpu.memory_space<vmem>>, vector<8x128xf32>
    tpu.vector_store %arg7[%c24_387, %c0_388], %313 {strides = array<i32>} : memref<32x256xf32, #tpu.memory_space<vmem>>, vector<8x128xf32>,
    %c1_389 = arith.constant 1 : index
    %c0_390 = arith.constant 0 : index
    %c0_391 = arith.constant 0 : index
    %315 = vector.load %arg9[%c1_389, %c0_390, %c0_391] : memref<2x4x130xf32, #tpu.memory_space<vmem>>, vector<1x4x130xf32>
    %316 = vector.shape_cast %315 : vector<1x4x130xf32> to vector<4x130xf32>
    %317 = vector.extract_strided_slice %316 {offsets = [0, 0], sizes = [4, 128], strides = [1, 1]} : vector<4x130xf32> to vector<4x128xf32>
    %318 = vector.extract_strided_slice %316 {offsets = [0, 1], sizes = [4, 128], strides = [1, 1]} : vector<4x130xf32> to vector<4x128xf32>
    %319 = arith.maximumf %317, %318 : vector<4x128xf32>
    %320 = vector.extract_strided_slice %316 {offsets = [0, 2], sizes = [4, 128], strides = [1, 1]} : vector<4x130xf32> to vector<4x128xf32>
    %321 = arith.maximumf %319, %320 : vector<4x128xf32>
    %c0_392 = arith.constant 0 : index
    %c0_393 = arith.constant 0 : index
    %322 = vector.load %arg4[%c0_392, %c0_393] : memref<8x4xf32, #tpu.memory_space<vmem>>, vector<8x4xf32>
    %cst_394 = arith.constant dense<0.000000e+00> : vector<8x128xf32>
    %323 = tpu.matmul %322, %321, %cst_394 {dimension_numbers = #tpu.dot_dimension_numbers<[1], [0], [0], [1], [0, 0, 1, 1], [], []>} : vector<8x4xf32>, vector<4x128xf32>, vector<8x128xf32> -> vector<8x128xf32>
    %c0_395 = arith.constant 0 : index
    %c0_396 = arith.constant 0 : index
    %324 = vector.load %arg6[%c0_395, %c0_396] : memref<8x1xf32, #tpu.memory_space<vmem>>, vector<8x1xf32>
    %325 = vector.broadcast %324 : vector<8x1xf32> to vector<8x128xf32>
    %326 = arith.addf %323, %325 : vector<8x128xf32>
    %cst_397 = arith.constant 0.000000e+00 : f32
    %327 = vector.broadcast %cst_397 : f32 to vector<8x128xf32>
    %328 = arith.maximumf %326, %327 : vector<8x128xf32>
    %c24_398 = arith.constant 24 : index
    %c128_399 = arith.constant 128 : index
    %329 = vector.load %arg7[%c24_398, %c128_399] : memref<32x256xf32, #tpu.memory_space<vmem>>, vector<8x128xf32>
    tpu.vector_store %arg7[%c24_398, %c128_399], %328 {strides = array<i32>} : memref<32x256xf32, #tpu.memory_space<vmem>>, vector<8x128xf32>,
    return
  }
  func.func @transform_0(%arg0: i32) -> (i32, i32) {
    %c0_i32 = arith.constant 0 : i32
    %c0_i32_0 = arith.constant 0 : i32
    return %c0_i32, %arg0 : i32, i32
  }
  func.func @transform_1(%arg0: i32) -> (i32, i32) {
    %c0_i32 = arith.constant 0 : i32
    %c0_i32_0 = arith.constant 0 : i32
    %c0_i32_1 = arith.constant 0 : i32
    return %c0_i32, %c0_i32_0 : i32, i32
  }
  func.func @transform_2(%arg0: i32) -> (i32, i32) {
    %c0_i32 = arith.constant 0 : i32
    %c0_i32_0 = arith.constant 0 : i32
    %c0_i32_1 = arith.constant 0 : i32
    return %c0_i32, %c0_i32_0 : i32, i32
  }
  func.func @transform_3(%arg0: i32) -> (i32, i32) {
    %c0_i32 = arith.constant 0 : i32
    %c0_i32_0 = arith.constant 0 : i32
    %c0_i32_1 = arith.constant 0 : i32
    return %c0_i32, %c0_i32_0 : i32, i32
  }
  func.func @transform_4(%arg0: i32) -> (i32, i32) {
    %c0_i32 = arith.constant 0 : i32
    %c0_i32_0 = arith.constant 0 : i32
    %c0_i32_1 = arith.constant 0 : i32
    return %c0_i32, %c0_i32_0 : i32, i32
  }
  func.func @transform_5(%arg0: i32) -> (i32, i32) {
    %c0_i32 = arith.constant 0 : i32
    %c0_i32_0 = arith.constant 0 : i32
    %c0_i32_1 = arith.constant 0 : i32
    return %c0_i32, %c0_i32_0 : i32, i32
  }
  func.func @transform_6(%arg0: i32) -> (i32, i32) {
    %c0_i32 = arith.constant 0 : i32
    %c0_i32_0 = arith.constant 0 : i32
    return %c0_i32, %arg0 : i32, i32
  }
}

</mosaic_0001>

<bundles_post_ra>
// kernel: tpu_custom_call.1
= control target key start
LH: loop header
LB: loop body
LE: loop exit
PB: predicated region body
PF: predicated region fallthrough
CT: control target
= control target key end

     0   :  { %s8466_s0 = inlined_call_operand.vmem [shape: f32[4,512], index: 0, kind: input, shape index: {}]   ;;  %s8467_s1 = inlined_call_operand.vmem [shape: f32[32,4], index: 1, kind: input, shape index: {}]   ;;  %s8468_s2 = inlined_call_operand.hbm [shape: f32[24,1280], index: 2, kind: input, shape index: {}]   ;;  %s8469_s3 = inlined_call_operand.vmem [shape: f32[8,4], index: 3, kind: input, shape index: {}]   ;;  %s8470_s4 = inlined_call_operand.vmem [shape: f32[24,1], index: 4, kind: input, shape index: {}]   ;;  %s8471_s5 = inlined_call_operand.vmem [shape: f32[8,1], index: 5, kind: input, shape index: {}]   ;;  %s8472_s6 = inlined_call_operand.hbm [shape: f32[32,512], index: 6, kind: output, shape index: {}]  }
   0x1   :  { %8555 = sst [smem:[#allocation302_spill]] %s8466_s0 }
   0x2   :  { %8556 = sst [smem:[#allocation303_spill]] %s8467_s1 }
   0x3   :  { %8557 = sst [smem:[#allocation304_spill]] %s8468_s2 }
   0x4   :  { %11 = vsyncpa [#allocation6], 0 }
   0x5   :  { %12 = vsyncpa [#allocation7], 0 }
   0x6   :  { %14 = vsyncpa [#allocation7 + $0x1], 0  ;;  %s5364_s21 = smov 0   ;;  %s5366_s22 = smov 0  }
   0x7   :  { %s5368_s23 = smov 0   ;;  %s5370_s24 = smov 0  }
   0x8 LB: > { %8558 = sst [smem:[#allocation11_spill]] %s5263_s21  ;;  %s5385_s25 = sadd.s32 4294967295, %s5275_s24   ;;  %s5275_s24 = sphi %s5370_s24, %s9184_s24   ;;  %s5271_s23 = sphi %s5368_s23, %s9186_s23   ;;  %s5267_s22 = sphi %s5366_s22, %s9188_s22   ;;  %s5263_s21 = sphi %s5364_s21, %s9187_s21  }
   0x9   : > { %8559 = sst [smem:[#allocation12_spill]] %s5271_s23  ;;  %s5042_s26 = sadd.s32 4294967294, %s5275_s24  }
   0xa   : > { %8560 = sst [smem:[#allocation13_spill]] %s5275_s24  ;;  %s5389_s27 = sadd.s32 1, %s5275_s24  }
   0xb   : > { %8561 = sst [smem:[#allocation14_spill]] %s5389_s27  ;;  %s158_s28 = sadd.s32 1, %s5271_s23 }
   0xc   : > { %s155_s29 = ssub.s32 %s5275_s24, %s5389_s27  ;;  %p168_p0 = scmp.ne.s32.totalorder %s5271_s23, %s5267_s22 }
   0xd   : > { %p156_p1 = scmp.eq.s32.totalorder %s155_s29, 0  ;;  %p169_p2 = scmp.eq.s32.totalorder %s5385_s25, 1 }
   0xe   : > { %p174_p3 = scmp.ne.s32.totalorder %s5267_s22, %s5263_s21  ;;  %p175_p4 = scmp.eq.s32.totalorder %s5042_s26, 1 }
   0xf   : > { %s5400_s30 = scalar_select %p156_p1, %s5271_s23, %s158_s28  }
  0x10   : > { %p5402_p5 = por %p169_p2, %p168_p0  ;;  %p5406_p6 = por %p175_p4, %p174_p3 }
  0x11   : > { %8562 = sst [smem:[#allocation15_spill]] %s5400_s30  ;;  %p5043_p7 = scmp.ge.s32.totalorder %s5275_s24, 1 }
  0x12   : > { %s8564_s8 = scalar_select %p5406_p6, 1, 0 }
  0x13   : > { %p182_p8 = scmp.lt.s32.totalorder %s5275_s24, 3  ;;  %p5095_p9 = scmp.eq.s32.totalorder %s5385_s25, 0 }
  0x14   : > { %8565 = sst [smem:[#allocation16_spill]] %s8564_s8  ;;  %s5277_s10 = smov [#allocation5]  }
  0x15   : > { %p5413_p10 = pnand %p5043_p7, %p182_p8  ;;  %s197_s11 = sshll.u32 %s5277_s10, 4  ;;  %s198_s11 = int_to_ptr.vmem [resolvable:$true] %s197_s11 }
  0x16   : > { %s5196_s12 = scalar_lea.vmem %s198_s11, 3840  ;;  %p5204_p3 = scmp.lt.s32.totalorder %s198_s11, %s198_s11 }
  0x17   : > { %p5087_p11 = pneg %p5413_p10  ;;  %p5197_p0 = scmp.ne.s32.totalorder %s198_s11, %s5196_s12 }
  0x18   : > { %p5205_p4 = scmp.lt.s32.totalorder %s5196_s12, %s5196_s12 }
  0x19   : > { %p5088_p12 = pnand %p5095_p9, %p5087_p11 }
  0x1a   : > { %p5206_p6 = por %p5205_p4, %p5204_p3 }
  0x1b   : > { %p5187_p13 = pneg %p5088_p12 }
  0x1d   : > { %p5199_p1 = pnand %p5197_p0, %p5187_p13 }
  0x1f   : > { %p5200_p2 = pneg %p5199_p1 }
  0x21   : > { %p5207_p7 = pnand %p5206_p6, %p5200_p2 }
  0x23   : > { %5210 = shalt.err (!%p5207_p7)
}
  0x24   : > { %s5278_s13 = smov 1280   ;;  %s5279_s14 = smov 80  }
  0x25   : > { %s8567_s2 = sld [smem:[#allocation304_spill]] }
  0x27   : > { %231 = sbr.rel (%p5413_p10) target bundleno = 1964 (0x7ac), region = 44 }
  0x2b   : > { %5090 = dma.hbm_to_vmem [thread:$0]  (!%p5088_p12), %s8567_s2, 3840, %s198_s11, [#allocation6], %s5278_s13, %s5278_s13, %s5279_s14  }
  0x2c   : > { %5254 = dma.done.wait (%p5095_p9), [#allocation6], 3840  }
  0x2d   : > { %5256 = vsyncadd (%p5095_p9), [#allocation6], 4294963456  ;;  %s5049_s17 = sshll.u32 %s5385_s25, 1  ;;  %v8515_v0 = vmov 0.0   ;;  %s8568_s0 = sld [smem:[#allocation302_spill]]  ;;  %vm288_vm0 = vcmask 1043456  }
  0x2e   : > { %p262_p8 = scmp.lt.s32.totalorder %s5049_s17, 3  ;;  %357 = vmatprep.mubr.f32.mxu0 %v8515_v0  ;;  %s8569_s1 = sld [smem:[#allocation303_spill]]  ;;  %vm275_vm1 = vcmask 31744   ;;  %vm382_vm2 = vcmask 154624   ;;  %vm387_vm3 = vcmask 318616   ;;  %vm408_vm4 = vcmask 1047704  }
  0x2f   : > { %383 = vst.msk [vmem:[#allocation2] sm:$0xff] %vm382_vm2, %v8515_v0  ;;  %384 = vst.msk [vmem:[#allocation2 + $0x10] sm:$0xff] %vm382_vm2, %v8515_v0  ;;  %s5281_s15 = smov 19   ;;  %s8507_s16 = smov 127   ;;  %vm580_vm5 = vcmask 1022976   ;;  %vm535_vm6 = vcmask 1031168  }
  0x30   : > { %s9190_s17 = smov (!%p262_p8, %s5049_s17), 3  ;;  %388 = vst.msk [vmem:[#allocation2 + $0x8] sm:$0xff] %vm387_vm3, %v8515_v0  ;;  %389 = vst.msk [vmem:[#allocation2 + $0x18] sm:$0xff] %vm387_vm3, %v8515_v0  ;;  %s8499_s19 = smov 124   ;;  %vm490_vm7 = vcmask 1039360   ;;  %vm760_vm8 = vcmask 990208  }
  0x31   : > { %s5050_s18 = sshll.u32 %s9190_s17, 2  ;;  %385 = vst.msk [vmem:[#allocation2 + $0x20] sm:$0xff] %vm382_vm2, %v8515_v0  ;;  %386 = vst.msk [vmem:[#allocation2 + $0x30] sm:$0xff] %vm382_vm2, %v8515_v0  ;;  %s8503_s17 = smov 126   ;;  %vm715_vm9 = vcmask 998400   ;;  %vm670_vm10 = vcmask 1006592  }
  0x32   : > { %390 = vst.msk [vmem:[#allocation2 + $0x28] sm:$0xff] %vm387_vm3, %v8515_v0  ;;  %391 = vst.msk [vmem:[#allocation2 + $0x38] sm:$0xff] %vm387_vm3, %v8515_v0  ;;  %s8497_s20 = smov 123   ;;  %s8495_s28 = smov 122   ;;  %vm625_vm11 = vcmask 1014784   ;;  %vm940_vm12 = vcmask 957440  }
  0x33   : > { %s5435_s26 = scalar_lea.vmem %s8568_s0, %s5050_s18  ;;  %418 = vst.msk [vmem:[#allocation2 + $0x40] sm:$0xff] %vm382_vm2, %v8515_v0  ;;  %419 = vst.msk [vmem:[#allocation2 + $0x50] sm:$0xff] %vm382_vm2, %v8515_v0  ;;  %s8505_s18 = smov 125   ;;  %vm895_vm13 = vcmask 965632   ;;  %vm850_vm14 = vcmask 973824   ;;  %vm805_vm15 = vcmask 982016  }
  0x34   : > { %v268_v1 = vld [vmem:[%s5435_s26] sm:$0xff]  ;;  %v270_v4 = vld [vmem:[%s8569_s1 + $0x8] sm:$0xff]  ;;  %v271_v5 = vld [vmem:[%s8569_s1 + $0x10] sm:$0xff]  ;;  %420 = vst.msk [vmem:[#allocation2 + $0x60] sm:$0xff] %vm382_vm2, %v8515_v0  ;;  %s8493_s29 = smov 121   ;;  %s8487_s9 = smov 120  }
  0x35   : > { %v274_v2 = vcombine.high %v268_v1, %v268_v1  ;;  %v269_v3 = vld [vmem:[%s8569_s1] sm:$0xff]  ;;  %v272_v6 = vld [vmem:[%s8569_s1 + $0x18] sm:$0xff]  ;;  %421 = vst.msk [vmem:[#allocation2 + $0x70] sm:$0xff] %vm382_vm2, %v8515_v0  ;;  %s8489_s10 = smov 119   ;;  %s8491_s11 = smov 118  }
  0x36   : > { %422 = vst.msk [vmem:[#allocation2 + $0x48] sm:$0xff] %vm387_vm3, %v8515_v0  ;;  %423 = vst.msk [vmem:[#allocation2 + $0x58] sm:$0xff] %vm387_vm3, %v8515_v0  ;;  %s8473_s12 = smov 117   ;;  %s8475_s13 = smov 116  }
  0x37   : > { %5051 = vmatprep.subr.msk.mxu0 %vm288_vm0, %v274_v2  ;;  %424 = vst.msk [vmem:[#allocation2 + $0x68] sm:$0xff] %vm387_vm3, %v8515_v0  ;;  %425 = vst.msk [vmem:[#allocation2 + $0x78] sm:$0xff] %vm387_vm3, %v8515_v0  ;;  %s8477_s14 = smov 115   ;;  %s8634_s0 = smov 110   ;;  %vm4734_vm3 = vcmask 11272  }
  0x38   : > { %5052 = vmatpush1.msk.msra.mxu0 %vm288_vm0, %v268_v1  ;;  %s8637_s1 = smov 109   ;;  %s8640_s2 = smov 108  }
  0x39   : > { %5053 = vmatmul.mubr.msk.f32.vlgmr.msra.gmra.mxu0 %vm275_vm1, %v269_v3  ;;  %s8643_s30 = smov 127   ;;  %s8646_s23 = smov 126  }
  0x3a   : > { %363 = vmatprep.mubr.f32.mxu0 %v8515_v0  ;;  %s8649_s27 = smov 125   ;;  %s8679_s8 = smov 107  }
  0x3b   : > { %s8523_s21 = smov 106   ;;  %s8525_s24 = smov 105  }
  0x3d   : > { %5054 = vmatmul.mubr.msk.f32.gmra.mxu0 %vm275_vm1, %v270_v4 }
  0x3e   : > { %369 = vmatprep.mubr.f32.mxu0 %v8515_v0 }
  0x41   : > { %5055 = vmatmul.mubr.msk.f32.gmra.mxu0 %vm275_vm1, %v271_v5 }
  0x42   : > { %375 = vmatprep.mubr.f32.mxu0 %v8515_v0 }
  0x45   : > { %5056 = vmatmul.mubr.msk.f32.gmra.mxu0 %vm275_vm1, %v272_v6 }
  0xf9   : > { %v359_v7 = vpop.f32.mrf.mxu0 }
  0xfa   : > { %396 = vrot.lane.b32.xlu0 %v359_v7, %s5281_s15 }
  0xfb   : > { %v361_v8 = vpop.f32.mrf.mxu0 }
  0xfd   : > { %v365_v9 = vpop.f32.mrf.mxu0 }
  0xfe   : > { %430 = vrot.lane.b32.xlu0 %v361_v8, %s5281_s15 }
  0xff   : > { %v367_v10 = vpop.f32.mrf.mxu0 }
 0x100   : > { %432 = vrot.lane.b32.xlu1 %v367_v10, %s5281_s15 }
 0x101   : > { %v371_v11 = vpop.f32.mrf.mxu0 }
 0x102   : > { %398 = vrot.lane.b32.xlu0 %v365_v9, %s5281_s15 }
 0x103   : > { %v373_v12 = vpop.f32.mrf.mxu0 }
 0x104   : > { %400 = vrot.lane.b32.xlu1 %v371_v11, %s5281_s15 }
 0x105   : > { %v377_v13 = vpop.f32.mrf.mxu0 }
 0x106   : > { %434 = vrot.lane.b32.xlu0 %v373_v12, %s5281_s15 }
 0x107   : > { %v379_v14 = vpop.f32.mrf.mxu0 }
 0x108   : > { %402 = vrot.lane.b32.xlu1 %v377_v13, %s5281_s15 }
 0x10c   : > { %436 = vrot.lane.b32.xlu1 %v379_v14, %s5281_s15  ;;  %s8479_s15 = smov 114  }
 0x16c   : > { %v397_v15 = vpop.permute.xlu0 %396 }
 0x16d   : > { %409 = vst.msk [vmem:[#allocation2] sm:$0xff] %vm408_vm4, %v397_v15 }
 0x16e   : > { %410 = vst.msk [vmem:[#allocation2 + $0x8] sm:$0xff] %vm382_vm2, %v397_v15 }
 0x170   : > { %v431_v16 = vpop.permute.xlu0 %430 }
 0x171   : > { %442 = vst.msk [vmem:[#allocation2 + $0x40] sm:$0xff] %vm408_vm4, %v431_v16 }
 0x172   : > { %443 = vst.msk [vmem:[#allocation2 + $0x48] sm:$0xff] %vm382_vm2, %v431_v16  ;;  %v433_v17 = vpop.permute.xlu1 %432 }
 0x173   : > { %444 = vst.msk [vmem:[#allocation2 + $0x50] sm:$0xff] %vm408_vm4, %v433_v17 }
 0x174   : > { %445 = vst.msk [vmem:[#allocation2 + $0x58] sm:$0xff] %vm382_vm2, %v433_v17  ;;  %v5497_v18 = vld [vmem:[#allocation2] sm:$0xff]  ;;  %v399_v20 = vpop.permute.xlu0 %398 }
 0x175   : > { %v5499_v19 = vld [vmem:[#allocation2 + $0x8] sm:$0xff]  ;;  %474 = vrot.lane.b32.xlu0 %v5497_v18, %s8507_s16  ;;  %411 = vst.msk [vmem:[#allocation2 + $0x10] sm:$0xff] %vm408_vm4, %v399_v20 }
 0x176   : > { %476 = vrot.lane.b32.xlu1 %v5499_v19, %s8507_s16  ;;  %412 = vst.msk [vmem:[#allocation2 + $0x18] sm:$0xff] %vm382_vm2, %v399_v20  ;;  %v401_v21 = vpop.permute.xlu1 %400 }
 0x177   : > { %413 = vst.msk [vmem:[#allocation2 + $0x20] sm:$0xff] %vm408_vm4, %v401_v21 }
 0x178   : > { %414 = vst.msk [vmem:[#allocation2 + $0x28] sm:$0xff] %vm382_vm2, %v401_v21  ;;  %v435_v22 = vpop.permute.xlu0 %434 }
 0x179   : > { %519 = vrot.lane.b32.xlu0 %v5497_v18, %s8503_s17  ;;  %446 = vst.msk [vmem:[#allocation2 + $0x60] sm:$0xff] %vm408_vm4, %v435_v22 }
 0x17a   : > { %521 = vrot.lane.b32.xlu1 %v5499_v19, %s8503_s17  ;;  %447 = vst.msk [vmem:[#allocation2 + $0x68] sm:$0xff] %vm382_vm2, %v435_v22  ;;  %v403_v23 = vpop.permute.xlu1 %402 }
 0x17b   : > { %415 = vst.msk [vmem:[#allocation2 + $0x30] sm:$0xff] %vm408_vm4, %v403_v23 }
 0x17c   : > { %416 = vst.msk [vmem:[#allocation2 + $0x38] sm:$0xff] %vm382_vm2, %v403_v23  ;;  %v5595_v25 = vld [vmem:[#allocation2 + $0x10] sm:$0xff] }
 0x17d   : > { %564 = vrot.lane.b32.xlu0 %v5497_v18, %s8505_s18  ;;  %v5597_v26 = vld [vmem:[#allocation2 + $0x18] sm:$0xff] }
 0x17e   : > { %566 = vrot.lane.b32.xlu1 %v5499_v19, %s8505_s18  ;;  %v437_v24 = vpop.permute.xlu1 %436  ;;  %v5739_v55 = vld [vmem:[#allocation2 + $0x20] sm:$0xff] }
 0x17f   : > { %448 = vst.msk [vmem:[#allocation2 + $0x70] sm:$0xff] %vm408_vm4, %v437_v24  ;;  %v5741_v56 = vld [vmem:[#allocation2 + $0x28] sm:$0xff]  ;;  %vm1120_vm4 = vcmask 924672  }
 0x180   : > { %449 = vst.msk [vmem:[#allocation2 + $0x78] sm:$0xff] %vm382_vm2, %v437_v24  ;;  %vm4732_vm2 = vcmask 3072  }
 0x181   : > { %609 = vrot.lane.b32.xlu0 %v5497_v18, %s8499_s19 }
 0x182   : > { %611 = vrot.lane.b32.xlu1 %v5499_v19, %s8499_s19 }
 0x185   : > { %654 = vrot.lane.b32.xlu0 %v5497_v18, %s8497_s20 }
 0x186   : > { %656 = vrot.lane.b32.xlu1 %v5499_v19, %s8497_s20 }
 0x189   : > { %699 = vrot.lane.b32.xlu0 %v5497_v18, %s8495_s28 }
 0x18a   : > { %701 = vrot.lane.b32.xlu1 %v5499_v19, %s8495_s28 }
 0x18d   : > { %744 = vrot.lane.b32.xlu0 %v5497_v18, %s8493_s29 }
 0x18e   : > { %746 = vrot.lane.b32.xlu1 %v5499_v19, %s8493_s29 }
 0x191   : > { %789 = vrot.lane.b32.xlu0 %v5497_v18, %s8487_s9 }
 0x192   : > { %791 = vrot.lane.b32.xlu1 %v5499_v19, %s8487_s9 }
 0x195   : > { %834 = vrot.lane.b32.xlu0 %v5497_v18, %s8489_s10 }
 0x196   : > { %836 = vrot.lane.b32.xlu1 %v5499_v19, %s8489_s10 }
 0x199   : > { %879 = vrot.lane.b32.xlu0 %v5497_v18, %s8491_s11 }
 0x19a   : > { %881 = vrot.lane.b32.xlu1 %v5499_v19, %s8491_s11 }
 0x19d   : > { %924 = vrot.lane.b32.xlu0 %v5497_v18, %s8473_s12 }
 0x19e   : > { %926 = vrot.lane.b32.xlu1 %v5499_v19, %s8473_s12  ;;  %s8481_s12 = smov 113  }
 0x1a1   : > { %969 = vrot.lane.b32.xlu0 %v5497_v18, %s8475_s13 }
 0x1a2   : > { %971 = vrot.lane.b32.xlu1 %v5499_v19, %s8475_s13  ;;  %s8483_s13 = smov 112  }
 0x1a5   : > { %1014 = vrot.lane.b32.xlu0 %v5497_v18, %s8477_s14 }
 0x1a6   : > { %1016 = vrot.lane.b32.xlu1 %v5499_v19, %s8477_s14  ;;  %s8485_s14 = smov 111  }
 0x1a9   : > { %1059 = vrot.lane.b32.xlu0 %v5497_v18, %s8479_s15 }
 0x1aa   : > { %1061 = vrot.lane.b32.xlu1 %v5499_v19, %s8479_s15  ;;  %s8513_s15 = smov 110  }
 0x1ad   : > { %1104 = vrot.lane.b32.xlu0 %v5497_v18, %s8481_s12 }
 0x1ae   : > { %1106 = vrot.lane.b32.xlu1 %v5499_v19, %s8481_s12  ;;  %s8511_s12 = smov 109  }
 0x1b1   : > { %1149 = vrot.lane.b32.xlu0 %v5497_v18, %s8483_s13 }
 0x1b2   : > { %1151 = vrot.lane.b32.xlu1 %v5499_v19, %s8483_s13  ;;  %s8509_s13 = smov 108  }
 0x1b5   : > { %1194 = vrot.lane.b32.xlu0 %v5497_v18, %s8485_s14 }
 0x1b6   : > { %1196 = vrot.lane.b32.xlu1 %v5499_v19, %s8485_s14  ;;  %s8501_s14 = smov 107  }
 0x1b9   : > { %1239 = vrot.lane.b32.xlu0 %v5497_v18, %s8513_s15 }
 0x1ba   : > { %1241 = vrot.lane.b32.xlu1 %v5499_v19, %s8513_s15 }
 0x1bd   : > { %1284 = vrot.lane.b32.xlu0 %v5497_v18, %s8511_s12 }
 0x1be   : > { %1286 = vrot.lane.b32.xlu1 %v5499_v19, %s8511_s12 }
 0x1c1   : > { %1329 = vrot.lane.b32.xlu0 %v5497_v18, %s8509_s13 }
 0x1c2   : > { %1331 = vrot.lane.b32.xlu1 %v5499_v19, %s8509_s13 }
 0x1c5   : > { %1374 = vrot.lane.b32.xlu0 %v5497_v18, %s8501_s14 }
 0x1c6   : > { %1376 = vrot.lane.b32.xlu1 %v5499_v19, %s8501_s14 }
 0x1c9   : > { %478 = vrot.lane.b32.xlu0 %v5595_v25, %s8507_s16 }
 0x1ca   : > { %480 = vrot.lane.b32.xlu1 %v5597_v26, %s8507_s16 }
 0x1cd   : > { %523 = vrot.lane.b32.xlu0 %v5595_v25, %s8503_s17 }
 0x1ce   : > { %525 = vrot.lane.b32.xlu1 %v5597_v26, %s8503_s17 }
 0x1d1   : > { %568 = vrot.lane.b32.xlu0 %v5595_v25, %s8505_s18 }
 0x1d2   : > { %570 = vrot.lane.b32.xlu1 %v5597_v26, %s8505_s18 }
 0x1d5   : > { %613 = vrot.lane.b32.xlu0 %v5595_v25, %s8499_s19 }
 0x1d6   : > { %615 = vrot.lane.b32.xlu1 %v5597_v26, %s8499_s19  ;;  %s8588_s19 = smov 111  }
 0x1d9   : > { %658 = vrot.lane.b32.xlu0 %v5595_v25, %s8497_s20 }
 0x1da   : > { %660 = vrot.lane.b32.xlu1 %v5597_v26, %s8497_s20  ;;  %s8585_s20 = smov 112  }
 0x1dd   : > { %703 = vrot.lane.b32.xlu0 %v5595_v25, %s8495_s28 }
 0x1de   : > { %705 = vrot.lane.b32.xlu1 %v5597_v26, %s8495_s28  ;;  %s8582_s28 = smov 113  }
 0x1e1   : > { %748 = vrot.lane.b32.xlu0 %v5595_v25, %s8493_s29 }
 0x1e2   : > { %750 = vrot.lane.b32.xlu1 %v5597_v26, %s8493_s29  ;;  %s8579_s29 = smov 114  }
 0x1e5   : > { %793 = vrot.lane.b32.xlu0 %v5595_v25, %s8487_s9 }
 0x1e6   : > { %795 = vrot.lane.b32.xlu1 %v5597_v26, %s8487_s9  ;;  %s8570_s9 = smov 117  }
 0x1e7   : > { %v5631_v27 = vpop.permute.xlu0 %474 }
 0x1e8   : > { %v5633_v28 = vpop.permute.xlu1 %476 }
 0x1e9   : > { %838 = vrot.lane.b32.xlu0 %v5595_v25, %s8489_s10 }
 0x1ea   : > { %840 = vrot.lane.b32.xlu1 %v5597_v26, %s8489_s10  ;;  %s8573_s10 = smov 116  }
 0x1eb   : > { %v5639_v29 = vpop.permute.xlu0 %519 }
 0x1ec   : > { %v5641_v30 = vpop.permute.xlu1 %521 }
 0x1ed   : > { %883 = vrot.lane.b32.xlu0 %v5595_v25, %s8491_s11 }
 0x1ee   : > { %885 = vrot.lane.b32.xlu1 %v5597_v26, %s8491_s11  ;;  %s8576_s11 = smov 115  }
 0x1ef   : > { %v5647_v31 = vpop.permute.xlu0 %564 }
 0x1f0   : > { %v5649_v32 = vpop.permute.xlu1 %566 }
 0x1f1   : > { %928 = vrot.lane.b32.xlu0 %v5595_v25, %s8570_s9 }
 0x1f2   : > { %930 = vrot.lane.b32.xlu1 %v5597_v26, %s8570_s9 }
 0x1f3   : > { %v5655_v33 = vpop.permute.xlu0 %609 }
 0x1f4   : > { %8571 = vst [vmem:[#allocation17_spill] sm:$0xff] %v5655_v33  ;;  %v5657_v34 = vpop.permute.xlu1 %611 }
 0x1f5   : > { %8572 = vst [vmem:[#allocation18_spill] sm:$0xff] %v5657_v34  ;;  %973 = vrot.lane.b32.xlu0 %v5595_v25, %s8573_s10 }
 0x1f6   : > { %975 = vrot.lane.b32.xlu1 %v5597_v26, %s8573_s10 }
 0x1f7   : > { %v5663_v35 = vpop.permute.xlu0 %654 }
 0x1f8   : > { %8574 = vst [vmem:[#allocation19_spill] sm:$0xff] %v5663_v35  ;;  %v5665_v36 = vpop.permute.xlu1 %656 }
 0x1f9   : > { %8575 = vst [vmem:[#allocation20_spill] sm:$0xff] %v5665_v36  ;;  %1018 = vrot.lane.b32.xlu0 %v5595_v25, %s8576_s11 }
 0x1fa   : > { %1020 = vrot.lane.b32.xlu1 %v5597_v26, %s8576_s11 }
 0x1fb   : > { %v5671_v37 = vpop.permute.xlu0 %699 }
 0x1fc   : > { %8577 = vst [vmem:[#allocation21_spill] sm:$0xff] %v5671_v37  ;;  %v5673_v38 = vpop.permute.xlu1 %701 }
 0x1fd   : > { %8578 = vst [vmem:[#allocation22_spill] sm:$0xff] %v5673_v38  ;;  %1063 = vrot.lane.b32.xlu0 %v5595_v25, %s8579_s29 }
 0x1fe   : > { %1065 = vrot.lane.b32.xlu1 %v5597_v26, %s8579_s29 }
 0x1ff   : > { %v5679_v39 = vpop.permute.xlu0 %744 }
 0x200   : > { %8580 = vst [vmem:[#allocation23_spill] sm:$0xff] %v5679_v39  ;;  %v5681_v40 = vpop.permute.xlu1 %746 }
 0x201   : > { %8581 = vst [vmem:[#allocation24_spill] sm:$0xff] %v5681_v40  ;;  %1108 = vrot.lane.b32.xlu0 %v5595_v25, %s8582_s28 }
 0x202   : > { %1110 = vrot.lane.b32.xlu1 %v5597_v26, %s8582_s28 }
 0x203   : > { %v5687_v41 = vpop.permute.xlu0 %789 }
 0x204   : > { %8583 = vst [vmem:[#allocation25_spill] sm:$0xff] %v5687_v41  ;;  %v5689_v42 = vpop.permute.xlu1 %791 }
 0x205   : > { %8584 = vst [vmem:[#allocation26_spill] sm:$0xff] %v5689_v42  ;;  %1153 = vrot.lane.b32.xlu0 %v5595_v25, %s8585_s20 }
 0x206   : > { %1155 = vrot.lane.b32.xlu1 %v5597_v26, %s8585_s20 }
 0x207   : > { %v5695_v43 = vpop.permute.xlu0 %834 }
 0x208   : > { %8586 = vst [vmem:[#allocation27_spill] sm:$0xff] %v5695_v43  ;;  %v5697_v44 = vpop.permute.xlu1 %836 }
 0x209   : > { %8587 = vst [vmem:[#allocation28_spill] sm:$0xff] %v5697_v44  ;;  %1198 = vrot.lane.b32.xlu0 %v5595_v25, %s8588_s19 }
 0x20a   : > { %1200 = vrot.lane.b32.xlu1 %v5597_v26, %s8588_s19 }
 0x20b   : > { %v5703_v45 = vpop.permute.xlu0 %879 }
 0x20c   : > { %8589 = vst [vmem:[#allocation29_spill] sm:$0xff] %v5703_v45  ;;  %v5705_v46 = vpop.permute.xlu1 %881 }
 0x20d   : > { %8590 = vst [vmem:[#allocation30_spill] sm:$0xff] %v5705_v46  ;;  %1243 = vrot.lane.b32.xlu0 %v5595_v25, %s8513_s15  ;;  %v6085_v46 = vld [vmem:[#allocation2 + $0x8] sm:$0xff] }
 0x20e   : > { %1245 = vrot.lane.b32.xlu1 %v5597_v26, %s8513_s15  ;;  %s8619_s15 = smov 118  }
 0x20f   : > { %v5711_v47 = vpop.permute.xlu0 %924 }
 0x210   : > { %8591 = vst [vmem:[#allocation31_spill] sm:$0xff] %v5711_v47  ;;  %v5713_v48 = vpop.permute.xlu1 %926 }
 0x211   : > { %8592 = vst [vmem:[#allocation32_spill] sm:$0xff] %v5713_v48  ;;  %1288 = vrot.lane.b32.xlu0 %v5595_v25, %s8511_s12 }
 0x212   : > { %1290 = vrot.lane.b32.xlu1 %v5597_v26, %s8511_s12  ;;  %s8618_s12 = smov 119  }
 0x213   : > { %v5719_v49 = vpop.permute.xlu0 %969 }
 0x214   : > { %8593 = vst [vmem:[#allocation33_spill] sm:$0xff] %v5719_v49  ;;  %v5721_v50 = vpop.permute.xlu1 %971 }
 0x215   : > { %8594 = vst [vmem:[#allocation34_spill] sm:$0xff] %v5721_v50  ;;  %1333 = vrot.lane.b32.xlu0 %v5595_v25, %s8509_s13 }
 0x216   : > { %1335 = vrot.lane.b32.xlu1 %v5597_v26, %s8509_s13  ;;  %s8617_s13 = smov 120  }
 0x217   : > { %v5727_v51 = vpop.permute.xlu0 %1014 }
 0x218   : > { %8595 = vst [vmem:[#allocation35_spill] sm:$0xff] %v5727_v51  ;;  %v5729_v52 = vpop.permute.xlu1 %1016 }
 0x219   : > { %8596 = vst [vmem:[#allocation36_spill] sm:$0xff] %v5729_v52  ;;  %1378 = vrot.lane.b32.xlu0 %v5595_v25, %s8501_s14 }
 0x21a   : > { %1380 = vrot.lane.b32.xlu1 %v5597_v26, %s8501_s14  ;;  %s8605_s14 = smov 124  }
 0x21b   : > { %v5735_v53 = vpop.permute.xlu0 %1059 }
 0x21c   : > { %8597 = vst [vmem:[#allocation37_spill] sm:$0xff] %v5735_v53  ;;  %v5737_v54 = vpop.permute.xlu1 %1061 }
 0x21d   : > { %8598 = vst [vmem:[#allocation38_spill] sm:$0xff] %v5737_v54  ;;  %482 = vrot.lane.b32.xlu0 %v5739_v55, %s8507_s16 }
 0x21e   : > { %484 = vrot.lane.b32.xlu1 %v5741_v56, %s8507_s16  ;;  %s8614_s16 = smov 121  }
 0x21f   : > { %v5747_v57 = vpop.permute.xlu0 %1104 }
 0x220   : > { %8599 = vst [vmem:[#allocation39_spill] sm:$0xff] %v5747_v57  ;;  %v5749_v58 = vpop.permute.xlu1 %1106 }
 0x221   : > { %8600 = vst [vmem:[#allocation40_spill] sm:$0xff] %v5749_v58  ;;  %527 = vrot.lane.b32.xlu0 %v5739_v55, %s8503_s17 }
 0x222   : > { %529 = vrot.lane.b32.xlu1 %v5741_v56, %s8503_s17  ;;  %s8608_s17 = smov 123  }
 0x223   : > { %v5755_v59 = vpop.permute.xlu0 %1149 }
 0x224   : > { %8601 = vst [vmem:[#allocation41_spill] sm:$0xff] %v5755_v59  ;;  %v5757_v60 = vpop.permute.xlu1 %1151 }
 0x225   : > { %8602 = vst [vmem:[#allocation42_spill] sm:$0xff] %v5757_v60  ;;  %572 = vrot.lane.b32.xlu0 %v5739_v55, %s8505_s18 }
 0x226   : > { %574 = vrot.lane.b32.xlu1 %v5741_v56, %s8505_s18  ;;  %s8611_s18 = smov 122  }
 0x227   : > { %v5763_v61 = vpop.permute.xlu0 %1194 }
 0x228   : > { %8603 = vst [vmem:[#allocation43_spill] sm:$0xff] %v5763_v61  ;;  %v5765_v62 = vpop.permute.xlu1 %1196 }
 0x229   : > { %8604 = vst [vmem:[#allocation44_spill] sm:$0xff] %v5765_v62  ;;  %617 = vrot.lane.b32.xlu0 %v5739_v55, %s8605_s14 }
 0x22a   : > { %619 = vrot.lane.b32.xlu1 %v5741_v56, %s8605_s14 }
 0x22b   : > { %v5771_v63 = vpop.permute.xlu0 %1239 }
 0x22c   : > { %8606 = vst [vmem:[#allocation45_spill] sm:$0xff] %v5771_v63  ;;  %v5773_v1 = vpop.permute.xlu1 %1241  ;;  %v5903_v63 = vld [vmem:[#allocation2 + $0x30] sm:$0xff] }
 0x22d   : > { %8607 = vst [vmem:[#allocation46_spill] sm:$0xff] %v5773_v1  ;;  %662 = vrot.lane.b32.xlu0 %v5739_v55, %s8608_s17  ;;  %v5905_v1 = vld [vmem:[#allocation2 + $0x38] sm:$0xff] }
 0x22e   : > { %664 = vrot.lane.b32.xlu1 %v5741_v56, %s8608_s17 }
 0x22f   : > { %v5779_v2 = vpop.permute.xlu0 %1284 }
 0x230   : > { %8609 = vst [vmem:[#allocation47_spill] sm:$0xff] %v5779_v2  ;;  %v5781_v3 = vpop.permute.xlu1 %1286 }
 0x231   : > { %8610 = vst [vmem:[#allocation48_spill] sm:$0xff] %v5781_v3  ;;  %707 = vrot.lane.b32.xlu0 %v5739_v55, %s8611_s18 }
 0x232   : > { %709 = vrot.lane.b32.xlu1 %v5741_v56, %s8611_s18 }
 0x233   : > { %v5787_v4 = vpop.permute.xlu0 %1329 }
 0x234   : > { %8612 = vst [vmem:[#allocation49_spill] sm:$0xff] %v5787_v4  ;;  %v5789_v5 = vpop.permute.xlu1 %1331 }
 0x235   : > { %8613 = vst [vmem:[#allocation50_spill] sm:$0xff] %v5789_v5  ;;  %752 = vrot.lane.b32.xlu0 %v5739_v55, %s8614_s16 }
 0x236   : > { %754 = vrot.lane.b32.xlu1 %v5741_v56, %s8614_s16 }
 0x237   : > { %v5795_v6 = vpop.permute.xlu0 %1374 }
 0x238   : > { %8615 = vst [vmem:[#allocation51_spill] sm:$0xff] %v5795_v6  ;;  %v5797_v7 = vpop.permute.xlu1 %1376 }
 0x239   : > { %8616 = vst [vmem:[#allocation52_spill] sm:$0xff] %v5797_v7  ;;  %797 = vrot.lane.b32.xlu0 %v5739_v55, %s8617_s13 }
 0x23a   : > { %799 = vrot.lane.b32.xlu1 %v5741_v56, %s8617_s13 }
 0x23b   : > { %v5803_v8 = vpop.permute.xlu0 %478 }
 0x23c   : > { %v5805_v9 = vpop.permute.xlu1 %480 }
 0x23d   : > { %842 = vrot.lane.b32.xlu0 %v5739_v55, %s8618_s12 }
 0x23e   : > { %844 = vrot.lane.b32.xlu1 %v5741_v56, %s8618_s12 }
 0x23f   : > { %v5811_v10 = vpop.permute.xlu0 %523 }
 0x240   : > { %v5813_v11 = vpop.permute.xlu1 %525 }
 0x241   : > { %887 = vrot.lane.b32.xlu0 %v5739_v55, %s8619_s15 }
 0x242   : > { %889 = vrot.lane.b32.xlu1 %v5741_v56, %s8619_s15 }
 0x243   : > { %v5819_v12 = vpop.permute.xlu0 %568 }
 0x244   : > { %v5821_v13 = vpop.permute.xlu1 %570 }
 0x245   : > { %932 = vrot.lane.b32.xlu0 %v5739_v55, %s8570_s9 }
 0x246   : > { %934 = vrot.lane.b32.xlu1 %v5741_v56, %s8570_s9 }
 0x247   : > { %v5827_v14 = vpop.permute.xlu0 %613 }
 0x248   : > { %8620 = vst [vmem:[#allocation53_spill] sm:$0xff] %v5827_v14  ;;  %v5829_v15 = vpop.permute.xlu1 %615 }
 0x249   : > { %8621 = vst [vmem:[#allocation54_spill] sm:$0xff] %v5829_v15  ;;  %977 = vrot.lane.b32.xlu0 %v5739_v55, %s8573_s10 }
 0x24a   : > { %979 = vrot.lane.b32.xlu1 %v5741_v56, %s8573_s10 }
 0x24b   : > { %v5835_v16 = vpop.permute.xlu0 %658 }
 0x24c   : > { %8622 = vst [vmem:[#allocation55_spill] sm:$0xff] %v5835_v16  ;;  %v5837_v17 = vpop.permute.xlu1 %660 }
 0x24d   : > { %8623 = vst [vmem:[#allocation56_spill] sm:$0xff] %v5837_v17  ;;  %1022 = vrot.lane.b32.xlu0 %v5739_v55, %s8576_s11 }
 0x24e   : > { %1024 = vrot.lane.b32.xlu1 %v5741_v56, %s8576_s11 }
 0x24f   : > { %v5843_v18 = vpop.permute.xlu0 %703 }
 0x250   : > { %8624 = vst [vmem:[#allocation57_spill] sm:$0xff] %v5843_v18  ;;  %v5845_v19 = vpop.permute.xlu1 %705 }
 0x251   : > { %8625 = vst [vmem:[#allocation58_spill] sm:$0xff] %v5845_v19  ;;  %1067 = vrot.lane.b32.xlu0 %v5739_v55, %s8579_s29 }
 0x252   : > { %1069 = vrot.lane.b32.xlu1 %v5741_v56, %s8579_s29 }
 0x253   : > { %v5851_v20 = vpop.permute.xlu0 %748 }
 0x254   : > { %8626 = vst [vmem:[#allocation59_spill] sm:$0xff] %v5851_v20  ;;  %v5853_v21 = vpop.permute.xlu1 %750 }
 0x255   : > { %8627 = vst [vmem:[#allocation60_spill] sm:$0xff] %v5853_v21  ;;  %1112 = vrot.lane.b32.xlu0 %v5739_v55, %s8582_s28 }
 0x256   : > { %1114 = vrot.lane.b32.xlu1 %v5741_v56, %s8582_s28 }
 0x257   : > { %v5859_v22 = vpop.permute.xlu0 %793 }
 0x258   : > { %8628 = vst [vmem:[#allocation61_spill] sm:$0xff] %v5859_v22  ;;  %v5861_v23 = vpop.permute.xlu1 %795 }
 0x259   : > { %8629 = vst [vmem:[#allocation62_spill] sm:$0xff] %v5861_v23  ;;  %1157 = vrot.lane.b32.xlu0 %v5739_v55, %s8585_s20 }
 0x25a   : > { %1159 = vrot.lane.b32.xlu1 %v5741_v56, %s8585_s20 }
 0x25b   : > { %v5867_v24 = vpop.permute.xlu0 %838 }
 0x25c   : > { %8630 = vst [vmem:[#allocation63_spill] sm:$0xff] %v5867_v24  ;;  %v5869_v0 = vpop.permute.xlu1 %840 }
 0x25d   : > { %8631 = vst [vmem:[#allocation64_spill] sm:$0xff] %v5869_v0  ;;  %1202 = vrot.lane.b32.xlu0 %v5739_v55, %s8588_s19 }
 0x25e   : > { %1204 = vrot.lane.b32.xlu1 %v5741_v56, %s8588_s19 }
 0x25f   : > { %v5875_v4 = vpop.permute.xlu0 %883 }
 0x260   : > { %8632 = vst [vmem:[#allocation65_spill] sm:$0xff] %v5875_v4  ;;  %v5877_v5 = vpop.permute.xlu1 %885 }
 0x261   : > { %8633 = vst [vmem:[#allocation66_spill] sm:$0xff] %v5877_v5  ;;  %1247 = vrot.lane.b32.xlu0 %v5739_v55, %s8634_s0 }
 0x262   : > { %1249 = vrot.lane.b32.xlu1 %v5741_v56, %s8634_s0 }
 0x263   : > { %v5883_v6 = vpop.permute.xlu0 %928 }
 0x264   : > { %8635 = vst [vmem:[#allocation67_spill] sm:$0xff] %v5883_v6  ;;  %v5885_v7 = vpop.permute.xlu1 %930 }
 0x265   : > { %8636 = vst [vmem:[#allocation68_spill] sm:$0xff] %v5885_v7  ;;  %1292 = vrot.lane.b32.xlu0 %v5739_v55, %s8637_s1 }
 0x266   : > { %1294 = vrot.lane.b32.xlu1 %v5741_v56, %s8637_s1 }
 0x267   : > { %v5891_v59 = vpop.permute.xlu0 %973 }
 0x268   : > { %8638 = vst [vmem:[#allocation69_spill] sm:$0xff] %v5891_v59  ;;  %v5893_v60 = vpop.permute.xlu1 %975 }
 0x269   : > { %8639 = vst [vmem:[#allocation70_spill] sm:$0xff] %v5893_v60  ;;  %1337 = vrot.lane.b32.xlu0 %v5739_v55, %s8640_s2 }
 0x26a   : > { %1339 = vrot.lane.b32.xlu1 %v5741_v56, %s8640_s2 }
 0x26b   : > { %v5899_v61 = vpop.permute.xlu0 %1018 }
 0x26c   : > { %8641 = vst [vmem:[#allocation71_spill] sm:$0xff] %v5899_v61  ;;  %v5901_v62 = vpop.permute.xlu1 %1020 }
 0x26d   : > { %8642 = vst [vmem:[#allocation72_spill] sm:$0xff] %v5901_v62  ;;  %486 = vrot.lane.b32.xlu0 %v5903_v63, %s8643_s30 }
 0x26e   : > { %488 = vrot.lane.b32.xlu1 %v5905_v1, %s8643_s30 }
 0x26f   : > { %v5911_v2 = vpop.permute.xlu0 %1063 }
 0x270   : > { %8644 = vst [vmem:[#allocation73_spill] sm:$0xff] %v5911_v2  ;;  %v5913_v3 = vpop.permute.xlu1 %1065 }
 0x271   : > { %8645 = vst [vmem:[#allocation74_spill] sm:$0xff] %v5913_v3  ;;  %531 = vrot.lane.b32.xlu0 %v5903_v63, %s8646_s23 }
 0x272   : > { %533 = vrot.lane.b32.xlu1 %v5905_v1, %s8646_s23 }
 0x273   : > { %v5919_v49 = vpop.permute.xlu0 %1108 }
 0x274   : > { %8647 = vst [vmem:[#allocation75_spill] sm:$0xff] %v5919_v49  ;;  %v5921_v50 = vpop.permute.xlu1 %1110 }
 0x275   : > { %8648 = vst [vmem:[#allocation76_spill] sm:$0xff] %v5921_v50  ;;  %576 = vrot.lane.b32.xlu0 %v5903_v63, %s8649_s27 }
 0x276   : > { %578 = vrot.lane.b32.xlu1 %v5905_v1, %s8649_s27 }
 0x277   : > { %v5927_v59 = vpop.permute.xlu0 %1153 }
 0x278   : > { %8650 = vst [vmem:[#allocation77_spill] sm:$0xff] %v5927_v59  ;;  %v5929_v60 = vpop.permute.xlu1 %1155 }
 0x279   : > { %8651 = vst [vmem:[#allocation78_spill] sm:$0xff] %v5929_v60  ;;  %621 = vrot.lane.b32.xlu0 %v5903_v63, %s8605_s14 }
 0x27a   : > { %623 = vrot.lane.b32.xlu1 %v5905_v1, %s8605_s14 }
 0x27b   : > { %v5935_v51 = vpop.permute.xlu0 %1198 }
 0x27c   : > { %8652 = vst [vmem:[#allocation79_spill] sm:$0xff] %v5935_v51  ;;  %v5937_v52 = vpop.permute.xlu1 %1200 }
 0x27d   : > { %8653 = vst [vmem:[#allocation80_spill] sm:$0xff] %v5937_v52  ;;  %666 = vrot.lane.b32.xlu0 %v5903_v63, %s8608_s17 }
 0x27e   : > { %668 = vrot.lane.b32.xlu1 %v5905_v1, %s8608_s17 }
 0x27f   : > { %v5943_v61 = vpop.permute.xlu0 %1243 }
 0x280   : > { %8654 = vst [vmem:[#allocation81_spill] sm:$0xff] %v5943_v61  ;;  %v5945_v59 = vpop.permute.xlu1 %1245 }
 0x281   : > { %8655 = vst [vmem:[#allocation82_spill] sm:$0xff] %v5945_v59  ;;  %711 = vrot.lane.b32.xlu0 %v5903_v63, %s8611_s18 }
 0x282   : > { %713 = vrot.lane.b32.xlu1 %v5905_v1, %s8611_s18 }
 0x283   : > { %v5951_v60 = vpop.permute.xlu0 %1288 }
 0x284   : > { %8656 = vst [vmem:[#allocation83_spill] sm:$0xff] %v5951_v60  ;;  %v5953_v51 = vpop.permute.xlu1 %1290 }
 0x285   : > { %8657 = vst [vmem:[#allocation84_spill] sm:$0xff] %v5953_v51  ;;  %756 = vrot.lane.b32.xlu0 %v5903_v63, %s8614_s16 }
 0x286   : > { %758 = vrot.lane.b32.xlu1 %v5905_v1, %s8614_s16 }
 0x287   : > { %v5959_v52 = vpop.permute.xlu0 %1333 }
 0x288   : > { %8658 = vst [vmem:[#allocation85_spill] sm:$0xff] %v5959_v52  ;;  %v5961_v61 = vpop.permute.xlu1 %1335 }
 0x289   : > { %8659 = vst [vmem:[#allocation86_spill] sm:$0xff] %v5961_v61  ;;  %801 = vrot.lane.b32.xlu0 %v5903_v63, %s8617_s13 }
 0x28a   : > { %803 = vrot.lane.b32.xlu1 %v5905_v1, %s8617_s13 }
 0x28b   : > { %v5967_v59 = vpop.permute.xlu0 %1378 }
 0x28c   : > { %8660 = vst [vmem:[#allocation87_spill] sm:$0xff] %v5967_v59  ;;  %v5969_v60 = vpop.permute.xlu1 %1380 }
 0x28d   : > { %8661 = vst [vmem:[#allocation88_spill] sm:$0xff] %v5969_v60  ;;  %846 = vrot.lane.b32.xlu0 %v5903_v63, %s8618_s12 }
 0x28e   : > { %848 = vrot.lane.b32.xlu1 %v5905_v1, %s8618_s12 }
 0x28f   : > { %v5975_v51 = vpop.permute.xlu0 %482 }
 0x290   : > { %v5977_v52 = vpop.permute.xlu1 %484 }
 0x291   : > { %891 = vrot.lane.b32.xlu0 %v5903_v63, %s8619_s15 }
 0x292   : > { %893 = vrot.lane.b32.xlu1 %v5905_v1, %s8619_s15 }
 0x293   : > { %v5983_v61 = vpop.permute.xlu0 %527 }
 0x294   : > { %v5985_v59 = vpop.permute.xlu1 %529 }
 0x295   : > { %936 = vrot.lane.b32.xlu0 %v5903_v63, %s8570_s9 }
 0x296   : > { %938 = vrot.lane.b32.xlu1 %v5905_v1, %s8570_s9 }
 0x297   : > { %v5991_v60 = vpop.permute.xlu0 %572 }
 0x298   : > { %v5993_v62 = vpop.permute.xlu1 %574 }
 0x299   : > { %981 = vrot.lane.b32.xlu0 %v5903_v63, %s8573_s10 }
 0x29a   : > { %983 = vrot.lane.b32.xlu1 %v5905_v1, %s8573_s10 }
 0x29b   : > { %v5999_v53 = vpop.permute.xlu0 %617 }
 0x29c   : > { %8662 = vst [vmem:[#allocation89_spill] sm:$0xff] %v5999_v53  ;;  %v6001_v54 = vpop.permute.xlu1 %619 }
 0x29d   : > { %8663 = vst [vmem:[#allocation90_spill] sm:$0xff] %v6001_v54  ;;  %1026 = vrot.lane.b32.xlu0 %v5903_v63, %s8576_s11 }
 0x29e   : > { %1028 = vrot.lane.b32.xlu1 %v5905_v1, %s8576_s11 }
 0x29f   : > { %v6007_v2 = vpop.permute.xlu0 %662 }
 0x2a0   : > { %8664 = vst [vmem:[#allocation91_spill] sm:$0xff] %v6007_v2  ;;  %v6009_v3 = vpop.permute.xlu1 %664 }
 0x2a1   : > { %8665 = vst [vmem:[#allocation92_spill] sm:$0xff] %v6009_v3  ;;  %1071 = vrot.lane.b32.xlu0 %v5903_v63, %s8579_s29 }
 0x2a2   : > { %1073 = vrot.lane.b32.xlu1 %v5905_v1, %s8579_s29 }
 0x2a3   : > { %v6015_v57 = vpop.permute.xlu0 %707 }
 0x2a4   : > { %8666 = vst [vmem:[#allocation93_spill] sm:$0xff] %v6015_v57  ;;  %v6017_v58 = vpop.permute.xlu1 %709 }
 0x2a5   : > { %8667 = vst [vmem:[#allocation94_spill] sm:$0xff] %v6017_v58  ;;  %1116 = vrot.lane.b32.xlu0 %v5903_v63, %s8582_s28 }
 0x2a6   : > { %1118 = vrot.lane.b32.xlu1 %v5905_v1, %s8582_s28 }
 0x2a7   : > { %v6023_v49 = vpop.permute.xlu0 %752 }
 0x2a8   : > { %8668 = vst [vmem:[#allocation95_spill] sm:$0xff] %v6023_v49  ;;  %v6025_v50 = vpop.permute.xlu1 %754 }
 0x2a9   : > { %1161 = vrot.lane.b32.xlu0 %v5903_v63, %s8585_s20 }
 0x2aa   : > { %1163 = vrot.lane.b32.xlu1 %v5905_v1, %s8585_s20 }
 0x2ab   : > { %v6031_v41 = vpop.permute.xlu0 %797 }
 0x2ac   : > { %8669 = vst [vmem:[#allocation96_spill] sm:$0xff] %v6031_v41  ;;  %v6033_v42 = vpop.permute.xlu1 %799 }
 0x2ad   : > { %8670 = vst [vmem:[#allocation97_spill] sm:$0xff] %v6033_v42  ;;  %1206 = vrot.lane.b32.xlu0 %v5903_v63, %s8588_s19 }
 0x2ae   : > { %1208 = vrot.lane.b32.xlu1 %v5905_v1, %s8588_s19 }
 0x2af   : > { %v6039_v22 = vpop.permute.xlu0 %842 }
 0x2b0   : > { %8671 = vst [vmem:[#allocation98_spill] sm:$0xff] %v6039_v22  ;;  %v6041_v23 = vpop.permute.xlu1 %844 }
 0x2b1   : > { %8672 = vst [vmem:[#allocation99_spill] sm:$0xff] %v6041_v23  ;;  %1251 = vrot.lane.b32.xlu0 %v5903_v63, %s8634_s0 }
 0x2b2   : > { %1253 = vrot.lane.b32.xlu1 %v5905_v1, %s8634_s0 }
 0x2b3   : > { %v6047_v43 = vpop.permute.xlu0 %887 }
 0x2b4   : > { %8673 = vst [vmem:[#allocation100_spill] sm:$0xff] %v6047_v43  ;;  %v6049_v41 = vpop.permute.xlu1 %889 }
 0x2b5   : > { %8674 = vst [vmem:[#allocation101_spill] sm:$0xff] %v6049_v41  ;;  %1296 = vrot.lane.b32.xlu0 %v5903_v63, %s8637_s1 }
 0x2b6   : > { %1298 = vrot.lane.b32.xlu1 %v5905_v1, %s8637_s1 }
 0x2b7   : > { %v6055_v42 = vpop.permute.xlu0 %932 }
 0x2b8   : > { %8675 = vst [vmem:[#allocation102_spill] sm:$0xff] %v6055_v42  ;;  %v6057_v44 = vpop.permute.xlu1 %934  ;;  %v6191_v42 = vld [vmem:[#allocation2 + $0x10] sm:$0xff] }
 0x2b9   : > { %8676 = vst [vmem:[#allocation103_spill] sm:$0xff] %v6057_v44  ;;  %1341 = vrot.lane.b32.xlu0 %v5903_v63, %s8640_s2  ;;  %v6193_v44 = vld [vmem:[#allocation2 + $0x18] sm:$0xff] }
 0x2ba   : > { %1343 = vrot.lane.b32.xlu1 %v5905_v1, %s8640_s2 }
 0x2bb   : > { %v6063_v24 = vpop.permute.xlu0 %977 }
 0x2bc   : > { %8677 = vst [vmem:[#allocation104_spill] sm:$0xff] %v6063_v24  ;;  %v6065_v0 = vpop.permute.xlu1 %979 }
 0x2bd   : > { %8678 = vst [vmem:[#allocation105_spill] sm:$0xff] %v6065_v0  ;;  %1382 = vrot.lane.b32.xlu0 %v5739_v55, %s8679_s8  ;;  %v6083_v0 = vld [vmem:[#allocation2] sm:$0xff] }
 0x2be   : > { %1384 = vrot.lane.b32.xlu1 %v5741_v56, %s8679_s8 }
 0x2bf   : > { %v6071_v22 = vpop.permute.xlu0 %1022 }
 0x2c0   : > { %8680 = vst [vmem:[#allocation106_spill] sm:$0xff] %v6071_v22  ;;  %v6073_v23 = vpop.permute.xlu1 %1024 }
 0x2c1   : > { %8681 = vst [vmem:[#allocation107_spill] sm:$0xff] %v6073_v23  ;;  %1386 = vrot.lane.b32.xlu0 %v5903_v63, %s8679_s8 }
 0x2c2   : > { %1388 = vrot.lane.b32.xlu1 %v5905_v1, %s8679_s8 }
 0x2c3   : > { %v6079_v45 = vpop.permute.xlu0 %1067 }
 0x2c4   : > { %8682 = vst [vmem:[#allocation108_spill] sm:$0xff] %v6079_v45  ;;  %v6081_v24 = vpop.permute.xlu1 %1069 }
 0x2c5   : > { %8683 = vst [vmem:[#allocation109_spill] sm:$0xff] %v6081_v24  ;;  %1419 = vrot.lane.b32.xlu0 %v6083_v0, %s8523_s21 }
 0x2c6   : > { %1421 = vrot.lane.b32.xlu1 %v6085_v46, %s8523_s21 }
 0x2c7   : > { %v6091_v22 = vpop.permute.xlu0 %1112 }
 0x2c8   : > { %8684 = vst [vmem:[#allocation110_spill] sm:$0xff] %v6091_v22  ;;  %v6093_v23 = vpop.permute.xlu1 %1114 }
 0x2c9   : > { %8685 = vst [vmem:[#allocation111_spill] sm:$0xff] %v6093_v23  ;;  %1423 = vrot.lane.b32.xlu0 %v5595_v25, %s8523_s21 }
 0x2ca   : > { %1425 = vrot.lane.b32.xlu1 %v5597_v26, %s8523_s21 }
 0x2cb   : > { %v6099_v45 = vpop.permute.xlu0 %1157 }
 0x2cc   : > { %8686 = vst [vmem:[#allocation112_spill] sm:$0xff] %v6099_v45  ;;  %v6101_v24 = vpop.permute.xlu1 %1159 }
 0x2cd   : > { %8687 = vst [vmem:[#allocation113_spill] sm:$0xff] %v6101_v24  ;;  %1427 = vrot.lane.b32.xlu0 %v5739_v55, %s8523_s21 }
 0x2ce   : > { %1429 = vrot.lane.b32.xlu1 %v5741_v56, %s8523_s21 }
 0x2cf   : > { %v6107_v4 = vpop.permute.xlu0 %1202 }
 0x2d0   : > { %8688 = vst [vmem:[#allocation114_spill] sm:$0xff] %v6107_v4  ;;  %v6109_v22 = vpop.permute.xlu1 %1204 }
 0x2d1   : > { %8689 = vst [vmem:[#allocation115_spill] sm:$0xff] %v6109_v22  ;;  %1431 = vrot.lane.b32.xlu0 %v5903_v63, %s8523_s21 }
 0x2d2   : > { %1433 = vrot.lane.b32.xlu1 %v5905_v1, %s8523_s21  ;;  %s8527_s21 = smov 104  }
 0x2d3   : > { %v6115_v23 = vpop.permute.xlu0 %1247 }
 0x2d4   : > { %8690 = vst [vmem:[#allocation116_spill] sm:$0xff] %v6115_v23  ;;  %v6117_v45 = vpop.permute.xlu1 %1249 }
 0x2d5   : > { %8691 = vst [vmem:[#allocation117_spill] sm:$0xff] %v6117_v45  ;;  %1464 = vrot.lane.b32.xlu0 %v6083_v0, %s8525_s24 }
 0x2d6   : > { %1466 = vrot.lane.b32.xlu1 %v6085_v46, %s8525_s24 }
 0x2d7   : > { %v6123_v24 = vpop.permute.xlu0 %1292 }
 0x2d8   : > { %8692 = vst [vmem:[#allocation118_spill] sm:$0xff] %v6123_v24  ;;  %v6125_v4 = vpop.permute.xlu1 %1294 }
 0x2d9   : > { %8693 = vst [vmem:[#allocation119_spill] sm:$0xff] %v6125_v4  ;;  %1468 = vrot.lane.b32.xlu0 %v5595_v25, %s8525_s24 }
 0x2da   : > { %1470 = vrot.lane.b32.xlu1 %v5597_v26, %s8525_s24 }
 0x2db   : > { %v6131_v22 = vpop.permute.xlu0 %1337 }
 0x2dc   : > { %8694 = vst [vmem:[#allocation120_spill] sm:$0xff] %v6131_v22  ;;  %v6133_v23 = vpop.permute.xlu1 %1339 }
 0x2dd   : > { %8695 = vst [vmem:[#allocation121_spill] sm:$0xff] %v6133_v23  ;;  %1472 = vrot.lane.b32.xlu0 %v5739_v55, %s8525_s24 }
 0x2de   : > { %1474 = vrot.lane.b32.xlu1 %v5741_v56, %s8525_s24 }
 0x2df   : > { %v6139_v45 = vpop.permute.xlu0 %486 }
 0x2e0   : > { %v6141_v24 = vpop.permute.xlu1 %488 }
 0x2e1   : > { %1476 = vrot.lane.b32.xlu0 %v5903_v63, %s8525_s24 }
 0x2e2   : > { %1478 = vrot.lane.b32.xlu1 %v5905_v1, %s8525_s24  ;;  %s8529_s24 = smov 103  }
 0x2e3   : > { %v6147_v4 = vpop.permute.xlu0 %531 }
 0x2e4   : > { %v6149_v22 = vpop.permute.xlu1 %533 }
 0x2e5   : > { %1509 = vrot.lane.b32.xlu0 %v6083_v0, %s8527_s21 }
 0x2e6   : > { %1511 = vrot.lane.b32.xlu1 %v6085_v46, %s8527_s21 }
 0x2e7   : > { %v6155_v23 = vpop.permute.xlu0 %576 }
 0x2e8   : > { %v6157_v5 = vpop.permute.xlu1 %578 }
 0x2e9   : > { %1513 = vrot.lane.b32.xlu0 %v5595_v25, %s8527_s21  ;;  %v584_v40 = vsel %vm580_vm5, %v6155_v23, %v6157_v5 }
 0x2ea   : > { %1515 = vrot.lane.b32.xlu1 %v5597_v26, %s8527_s21 }
 0x2eb   : > { %v6163_v43 = vpop.permute.xlu0 %621 }
 0x2ec   : > { %8696 = vst [vmem:[#allocation122_spill] sm:$0xff] %v6163_v43  ;;  %v6165_v41 = vpop.permute.xlu1 %623 }
 0x2ed   : > { %8697 = vst [vmem:[#allocation123_spill] sm:$0xff] %v6165_v41  ;;  %1517 = vrot.lane.b32.xlu0 %v5739_v55, %s8527_s21 }
 0x2ee   : > { %1519 = vrot.lane.b32.xlu1 %v5741_v56, %s8527_s21 }
 0x2ef   : > { %v6171_v47 = vpop.permute.xlu0 %666 }
 0x2f0   : > { %8698 = vst [vmem:[#allocation124_spill] sm:$0xff] %v6171_v47  ;;  %v6173_v48 = vpop.permute.xlu1 %668 }
 0x2f1   : > { %8699 = vst [vmem:[#allocation125_spill] sm:$0xff] %v6173_v48  ;;  %1521 = vrot.lane.b32.xlu0 %v5903_v63, %s8527_s21 }
 0x2f2   : > { %1523 = vrot.lane.b32.xlu1 %v5905_v1, %s8527_s21  ;;  %s8531_s21 = smov 102  }
 0x2f3   : > { %v6179_v25 = vpop.permute.xlu0 %711 }
 0x2f4   : > { %8700 = vst [vmem:[#allocation126_spill] sm:$0xff] %v6179_v25  ;;  %v6181_v26 = vpop.permute.xlu1 %713 }
 0x2f5   : > { %8701 = vst [vmem:[#allocation127_spill] sm:$0xff] %v6181_v26  ;;  %1554 = vrot.lane.b32.xlu0 %v6083_v0, %s8529_s24 }
 0x2f6   : > { %1556 = vrot.lane.b32.xlu1 %v6085_v46, %s8529_s24 }
 0x2f7   : > { %v6187_v6 = vpop.permute.xlu0 %756 }
 0x2f8   : > { %v6189_v7 = vpop.permute.xlu1 %758 }
 0x2f9   : > { %1558 = vrot.lane.b32.xlu0 %v6191_v42, %s8529_s24 }
 0x2fa   : > { %1560 = vrot.lane.b32.xlu1 %v6193_v44, %s8529_s24 }
 0x2fb   : > { %v6199_v33 = vpop.permute.xlu0 %801 }
 0x2fc   : > { %8702 = vst [vmem:[#allocation128_spill] sm:$0xff] %v6199_v33  ;;  %v6201_v34 = vpop.permute.xlu1 %803 }
 0x2fd   : > { %8703 = vst [vmem:[#allocation129_spill] sm:$0xff] %v6201_v34  ;;  %1562 = vrot.lane.b32.xlu0 %v5739_v55, %s8529_s24 }
 0x2fe   : > { %1564 = vrot.lane.b32.xlu1 %v5741_v56, %s8529_s24 }
 0x2ff   : > { %v6207_v14 = vpop.permute.xlu0 %846 }
 0x300   : > { %8704 = vst [vmem:[#allocation130_spill] sm:$0xff] %v6207_v14  ;;  %v6209_v15 = vpop.permute.xlu1 %848 }
 0x301   : > { %8705 = vst [vmem:[#allocation131_spill] sm:$0xff] %v6209_v15  ;;  %1566 = vrot.lane.b32.xlu0 %v5903_v63, %s8529_s24 }
 0x302   : > { %1568 = vrot.lane.b32.xlu1 %v5905_v1, %s8529_s24  ;;  %s8533_s24 = smov 101  }
 0x303   : > { %v6215_v53 = vpop.permute.xlu0 %891 }
 0x304   : > { %8706 = vst [vmem:[#allocation132_spill] sm:$0xff] %v6215_v53  ;;  %v6217_v33 = vpop.permute.xlu1 %893 }
 0x305   : > { %8707 = vst [vmem:[#allocation133_spill] sm:$0xff] %v6217_v33  ;;  %1599 = vrot.lane.b32.xlu0 %v6083_v0, %s8531_s21 }
 0x306   : > { %1601 = vrot.lane.b32.xlu1 %v6085_v46, %s8531_s21 }
 0x307   : > { %v6223_v34 = vpop.permute.xlu0 %936 }
 0x308   : > { %8708 = vst [vmem:[#allocation134_spill] sm:$0xff] %v6223_v34  ;;  %v6225_v14 = vpop.permute.xlu1 %938 }
 0x309   : > { %8709 = vst [vmem:[#allocation135_spill] sm:$0xff] %v6225_v14  ;;  %1603 = vrot.lane.b32.xlu0 %v6191_v42, %s8531_s21 }
 0x30a   : > { %1605 = vrot.lane.b32.xlu1 %v6193_v44, %s8531_s21 }
 0x30b   : > { %v6231_v15 = vpop.permute.xlu0 %981 }
 0x30c   : > { %8710 = vst [vmem:[#allocation136_spill] sm:$0xff] %v6231_v15  ;;  %v6233_v53 = vpop.permute.xlu1 %983 }
 0x30d   : > { %8711 = vst [vmem:[#allocation137_spill] sm:$0xff] %v6233_v53  ;;  %1607 = vrot.lane.b32.xlu0 %v5739_v55, %s8531_s21 }
 0x30e   : > { %1609 = vrot.lane.b32.xlu1 %v5741_v56, %s8531_s21 }
 0x30f   : > { %v6239_v33 = vpop.permute.xlu0 %1026 }
 0x310   : > { %8712 = vst [vmem:[#allocation138_spill] sm:$0xff] %v6239_v33  ;;  %v6241_v34 = vpop.permute.xlu1 %1028 }
 0x311   : > { %8713 = vst [vmem:[#allocation139_spill] sm:$0xff] %v6241_v34  ;;  %1611 = vrot.lane.b32.xlu0 %v5903_v63, %s8531_s21 }
 0x312   : > { %1613 = vrot.lane.b32.xlu1 %v5905_v1, %s8531_s21  ;;  %s8535_s21 = smov 100  }
 0x313   : > { %v6247_v14 = vpop.permute.xlu0 %1071 }
 0x314   : > { %8714 = vst [vmem:[#allocation140_spill] sm:$0xff] %v6247_v14  ;;  %v6249_v15 = vpop.permute.xlu1 %1073 }
 0x315   : > { %8715 = vst [vmem:[#allocation141_spill] sm:$0xff] %v6249_v15  ;;  %1644 = vrot.lane.b32.xlu0 %v6083_v0, %s8533_s24 }
 0x316   : > { %1646 = vrot.lane.b32.xlu1 %v6085_v46, %s8533_s24 }
 0x317   : > { %v6255_v53 = vpop.permute.xlu0 %1116 }
 0x318   : > { %8716 = vst [vmem:[#allocation142_spill] sm:$0xff] %v6255_v53  ;;  %v6257_v33 = vpop.permute.xlu1 %1118 }
 0x319   : > { %8717 = vst [vmem:[#allocation143_spill] sm:$0xff] %v6257_v33  ;;  %1648 = vrot.lane.b32.xlu0 %v6191_v42, %s8533_s24 }
 0x31a   : > { %1650 = vrot.lane.b32.xlu1 %v6193_v44, %s8533_s24 }
 0x31b   : > { %v6263_v34 = vpop.permute.xlu0 %1161 }
 0x31c   : > { %8718 = vst [vmem:[#allocation144_spill] sm:$0xff] %v6263_v34  ;;  %v6265_v14 = vpop.permute.xlu1 %1163 }
 0x31d   : > { %8719 = vst [vmem:[#allocation145_spill] sm:$0xff] %v6265_v14  ;;  %1652 = vrot.lane.b32.xlu0 %v5739_v55, %s8533_s24 }
 0x31e   : > { %1654 = vrot.lane.b32.xlu1 %v5741_v56, %s8533_s24 }
 0x31f   : > { %v6271_v15 = vpop.permute.xlu0 %1206 }
 0x320   : > { %8720 = vst [vmem:[#allocation146_spill] sm:$0xff] %v6271_v15  ;;  %v6273_v53 = vpop.permute.xlu1 %1208 }
 0x321   : > { %8721 = vst [vmem:[#allocation147_spill] sm:$0xff] %v6273_v53  ;;  %1656 = vrot.lane.b32.xlu0 %v5903_v63, %s8533_s24 }
 0x322   : > { %1658 = vrot.lane.b32.xlu1 %v5905_v1, %s8533_s24  ;;  %s8537_s24 = smov 99  }
 0x323   : > { %v6279_v33 = vpop.permute.xlu0 %1251 }
 0x324   : > { %8722 = vst [vmem:[#allocation148_spill] sm:$0xff] %v6279_v33  ;;  %v6281_v34 = vpop.permute.xlu1 %1253 }
 0x325   : > { %8723 = vst [vmem:[#allocation149_spill] sm:$0xff] %v6281_v34  ;;  %1689 = vrot.lane.b32.xlu0 %v6083_v0, %s8535_s21 }
 0x326   : > { %1691 = vrot.lane.b32.xlu1 %v6085_v46, %s8535_s21 }
 0x327   : > { %v6287_v14 = vpop.permute.xlu0 %1296 }
 0x328   : > { %8724 = vst [vmem:[#allocation150_spill] sm:$0xff] %v6287_v14  ;;  %v6289_v15 = vpop.permute.xlu1 %1298 }
 0x329   : > { %8725 = vst [vmem:[#allocation151_spill] sm:$0xff] %v6289_v15  ;;  %1693 = vrot.lane.b32.xlu0 %v6191_v42, %s8535_s21 }
 0x32a   : > { %1695 = vrot.lane.b32.xlu1 %v6193_v44, %s8535_s21 }
 0x32b   : > { %v6295_v53 = vpop.permute.xlu0 %1341 }
 0x32c   : > { %8726 = vst [vmem:[#allocation152_spill] sm:$0xff] %v6295_v53  ;;  %v6297_v33 = vpop.permute.xlu1 %1343 }
 0x32d   : > { %8727 = vst [vmem:[#allocation153_spill] sm:$0xff] %v6297_v33  ;;  %1697 = vrot.lane.b32.xlu0 %v5739_v55, %s8535_s21 }
 0x32e   : > { %1699 = vrot.lane.b32.xlu1 %v5741_v56, %s8535_s21 }
 0x32f   : > { %v6303_v34 = vpop.permute.xlu0 %1382 }
 0x330   : > { %8728 = vst [vmem:[#allocation154_spill] sm:$0xff] %v6303_v34  ;;  %v6305_v14 = vpop.permute.xlu1 %1384 }
 0x331   : > { %8729 = vst [vmem:[#allocation155_spill] sm:$0xff] %v6305_v14  ;;  %1701 = vrot.lane.b32.xlu0 %v5903_v63, %s8535_s21 }
 0x332   : > { %1703 = vrot.lane.b32.xlu1 %v5905_v1, %s8535_s21  ;;  %s8539_s21 = smov 98  }
 0x333   : > { %v6311_v15 = vpop.permute.xlu0 %1386 }
 0x334   : > { %8730 = vst [vmem:[#allocation156_spill] sm:$0xff] %v6311_v15  ;;  %v6313_v53 = vpop.permute.xlu1 %1388 }
 0x335   : > { %8731 = vst [vmem:[#allocation157_spill] sm:$0xff] %v6313_v53  ;;  %1734 = vrot.lane.b32.xlu0 %v6083_v0, %s8537_s24 }
 0x336   : > { %1736 = vrot.lane.b32.xlu1 %v6085_v46, %s8537_s24 }
 0x337   : > { %v6319_v33 = vpop.permute.xlu0 %1419 }
 0x338   : > { %8732 = vst [vmem:[#allocation158_spill] sm:$0xff] %v6319_v33  ;;  %v6321_v34 = vpop.permute.xlu1 %1421 }
 0x339   : > { %8733 = vst [vmem:[#allocation159_spill] sm:$0xff] %v6321_v34  ;;  %1738 = vrot.lane.b32.xlu0 %v6191_v42, %s8537_s24 }
 0x33a   : > { %1740 = vrot.lane.b32.xlu1 %v6193_v44, %s8537_s24 }
 0x33b   : > { %v6327_v14 = vpop.permute.xlu0 %1423 }
 0x33c   : > { %8734 = vst [vmem:[#allocation160_spill] sm:$0xff] %v6327_v14  ;;  %v6329_v15 = vpop.permute.xlu1 %1425 }
 0x33d   : > { %8735 = vst [vmem:[#allocation161_spill] sm:$0xff] %v6329_v15  ;;  %1742 = vrot.lane.b32.xlu0 %v5739_v55, %s8537_s24 }
 0x33e   : > { %1744 = vrot.lane.b32.xlu1 %v5741_v56, %s8537_s24 }
 0x33f   : > { %v6335_v53 = vpop.permute.xlu0 %1427 }
 0x340   : > { %8736 = vst [vmem:[#allocation162_spill] sm:$0xff] %v6335_v53  ;;  %v6337_v33 = vpop.permute.xlu1 %1429 }
 0x341   : > { %8737 = vst [vmem:[#allocation163_spill] sm:$0xff] %v6337_v33  ;;  %1746 = vrot.lane.b32.xlu0 %v5903_v63, %s8537_s24  ;;  %v6363_v33 = vld [vmem:[#allocation2 + $0x20] sm:$0xff] }
 0x342   : > { %1748 = vrot.lane.b32.xlu1 %v5905_v1, %s8537_s24  ;;  %s8541_s24 = smov 97  }
 0x343   : > { %v6343_v34 = vpop.permute.xlu0 %1431 }
 0x344   : > { %8738 = vst [vmem:[#allocation164_spill] sm:$0xff] %v6343_v34  ;;  %v6345_v14 = vpop.permute.xlu1 %1433  ;;  %v6365_v34 = vld [vmem:[#allocation2 + $0x28] sm:$0xff] }
 0x345   : > { %8739 = vst [vmem:[#allocation165_spill] sm:$0xff] %v6345_v14  ;;  %1779 = vrot.lane.b32.xlu0 %v6083_v0, %s8539_s21 }
 0x346   : > { %1781 = vrot.lane.b32.xlu1 %v6085_v46, %s8539_s21 }
 0x347   : > { %v6351_v55 = vpop.permute.xlu0 %1464 }
 0x348   : > { %8740 = vst [vmem:[#allocation166_spill] sm:$0xff] %v6351_v55  ;;  %v6353_v56 = vpop.permute.xlu1 %1466 }
 0x349   : > { %8741 = vst [vmem:[#allocation167_spill] sm:$0xff] %v6353_v56  ;;  %1783 = vrot.lane.b32.xlu0 %v6191_v42, %s8539_s21 }
 0x34a   : > { %1785 = vrot.lane.b32.xlu1 %v6193_v44, %s8539_s21 }
 0x34b   : > { %v6359_v15 = vpop.permute.xlu0 %1468 }
 0x34c   : > { %8742 = vst [vmem:[#allocation168_spill] sm:$0xff] %v6359_v15  ;;  %v6361_v53 = vpop.permute.xlu1 %1470 }
 0x34d   : > { %8743 = vst [vmem:[#allocation169_spill] sm:$0xff] %v6361_v53  ;;  %1787 = vrot.lane.b32.xlu0 %v6363_v33, %s8539_s21 }
 0x34e   : > { %1789 = vrot.lane.b32.xlu1 %v6365_v34, %s8539_s21 }
 0x34f   : > { %v6371_v14 = vpop.permute.xlu0 %1472 }
 0x350   : > { %8744 = vst [vmem:[#allocation170_spill] sm:$0xff] %v6371_v14  ;;  %v6373_v55 = vpop.permute.xlu1 %1474 }
 0x351   : > { %8745 = vst [vmem:[#allocation171_spill] sm:$0xff] %v6373_v55  ;;  %1791 = vrot.lane.b32.xlu0 %v5903_v63, %s8539_s21 }
 0x352   : > { %1793 = vrot.lane.b32.xlu1 %v5905_v1, %s8539_s21  ;;  %s8543_s21 = smov 96  }
 0x353   : > { %v6379_v56 = vpop.permute.xlu0 %1476 }
 0x354   : > { %8746 = vst [vmem:[#allocation172_spill] sm:$0xff] %v6379_v56  ;;  %v6381_v15 = vpop.permute.xlu1 %1478 }
 0x355   : > { %8747 = vst [vmem:[#allocation173_spill] sm:$0xff] %v6381_v15  ;;  %1824 = vrot.lane.b32.xlu0 %v6083_v0, %s8541_s24 }
 0x356   : > { %1826 = vrot.lane.b32.xlu1 %v6085_v46, %s8541_s24 }
 0x357   : > { %v6387_v53 = vpop.permute.xlu0 %1509 }
 0x358   : > { %8748 = vst [vmem:[#allocation174_spill] sm:$0xff] %v6387_v53  ;;  %v6389_v14 = vpop.permute.xlu1 %1511 }
 0x359   : > { %8749 = vst [vmem:[#allocation175_spill] sm:$0xff] %v6389_v14  ;;  %1828 = vrot.lane.b32.xlu0 %v6191_v42, %s8541_s24 }
 0x35a   : > { %1830 = vrot.lane.b32.xlu1 %v6193_v44, %s8541_s24 }
 0x35b   : > { %v6395_v55 = vpop.permute.xlu0 %1513 }
 0x35c   : > { %8750 = vst [vmem:[#allocation176_spill] sm:$0xff] %v6395_v55  ;;  %v6397_v56 = vpop.permute.xlu1 %1515 }
 0x35d   : > { %8751 = vst [vmem:[#allocation177_spill] sm:$0xff] %v6397_v56  ;;  %1832 = vrot.lane.b32.xlu0 %v6363_v33, %s8541_s24 }
 0x35e   : > { %1834 = vrot.lane.b32.xlu1 %v6365_v34, %s8541_s24 }
 0x35f   : > { %v6403_v15 = vpop.permute.xlu0 %1517 }
 0x360   : > { %8752 = vst [vmem:[#allocation178_spill] sm:$0xff] %v6403_v15  ;;  %v6405_v53 = vpop.permute.xlu1 %1519 }
 0x361   : > { %8753 = vst [vmem:[#allocation179_spill] sm:$0xff] %v6405_v53  ;;  %1836 = vrot.lane.b32.xlu0 %v5903_v63, %s8541_s24 }
 0x362   : > { %1838 = vrot.lane.b32.xlu1 %v5905_v1, %s8541_s24  ;;  %s8545_s24 = smov 95  }
 0x363   : > { %v6411_v14 = vpop.permute.xlu0 %1521 }
 0x364   : > { %8754 = vst [vmem:[#allocation180_spill] sm:$0xff] %v6411_v14  ;;  %v6413_v55 = vpop.permute.xlu1 %1523 }
 0x365   : > { %8755 = vst [vmem:[#allocation181_spill] sm:$0xff] %v6413_v55  ;;  %1869 = vrot.lane.b32.xlu0 %v6083_v0, %s8543_s21 }
 0x366   : > { %1871 = vrot.lane.b32.xlu1 %v6085_v46, %s8543_s21 }
 0x367   : > { %v6419_v56 = vpop.permute.xlu0 %1554 }
 0x368   : > { %8756 = vst [vmem:[#allocation182_spill] sm:$0xff] %v6419_v56  ;;  %v6421_v15 = vpop.permute.xlu1 %1556 }
 0x369   : > { %8757 = vst [vmem:[#allocation183_spill] sm:$0xff] %v6421_v15  ;;  %1873 = vrot.lane.b32.xlu0 %v6191_v42, %s8543_s21 }
 0x36a   : > { %1875 = vrot.lane.b32.xlu1 %v6193_v44, %s8543_s21 }
 0x36b   : > { %v6427_v53 = vpop.permute.xlu0 %1558 }
 0x36c   : > { %8758 = vst [vmem:[#allocation184_spill] sm:$0xff] %v6427_v53  ;;  %v6429_v14 = vpop.permute.xlu1 %1560 }
 0x36d   : > { %8759 = vst [vmem:[#allocation185_spill] sm:$0xff] %v6429_v14  ;;  %1877 = vrot.lane.b32.xlu0 %v6363_v33, %s8543_s21 }
 0x36e   : > { %1879 = vrot.lane.b32.xlu1 %v6365_v34, %s8543_s21 }
 0x36f   : > { %v6435_v55 = vpop.permute.xlu0 %1562 }
 0x370   : > { %8760 = vst [vmem:[#allocation186_spill] sm:$0xff] %v6435_v55  ;;  %v6437_v56 = vpop.permute.xlu1 %1564 }
 0x371   : > { %8761 = vst [vmem:[#allocation187_spill] sm:$0xff] %v6437_v56  ;;  %1881 = vrot.lane.b32.xlu0 %v5903_v63, %s8543_s21 }
 0x372   : > { %1883 = vrot.lane.b32.xlu1 %v5905_v1, %s8543_s21  ;;  %s8547_s21 = smov 94  }
 0x373   : > { %v6443_v15 = vpop.permute.xlu0 %1566 }
 0x374   : > { %8762 = vst [vmem:[#allocation188_spill] sm:$0xff] %v6443_v15  ;;  %v6445_v53 = vpop.permute.xlu1 %1568 }
 0x375   : > { %8763 = vst [vmem:[#allocation189_spill] sm:$0xff] %v6445_v53  ;;  %1914 = vrot.lane.b32.xlu0 %v6083_v0, %s8545_s24 }
 0x376   : > { %1916 = vrot.lane.b32.xlu1 %v6085_v46, %s8545_s24 }
 0x377   : > { %v6451_v14 = vpop.permute.xlu0 %1599 }
 0x378   : > { %8764 = vst [vmem:[#allocation190_spill] sm:$0xff] %v6451_v14  ;;  %v6453_v55 = vpop.permute.xlu1 %1601 }
 0x379   : > { %8765 = vst [vmem:[#allocation191_spill] sm:$0xff] %v6453_v55  ;;  %1918 = vrot.lane.b32.xlu0 %v6191_v42, %s8545_s24 }
 0x37a   : > { %1920 = vrot.lane.b32.xlu1 %v6193_v44, %s8545_s24 }
 0x37b   : > { %v6459_v56 = vpop.permute.xlu0 %1603 }
 0x37c   : > { %8766 = vst [vmem:[#allocation192_spill] sm:$0xff] %v6459_v56  ;;  %v6461_v15 = vpop.permute.xlu1 %1605 }
 0x37d   : > { %8767 = vst [vmem:[#allocation193_spill] sm:$0xff] %v6461_v15  ;;  %1922 = vrot.lane.b32.xlu0 %v6363_v33, %s8545_s24 }
 0x37e   : > { %1924 = vrot.lane.b32.xlu1 %v6365_v34, %s8545_s24 }
 0x37f   : > { %v6467_v53 = vpop.permute.xlu0 %1607 }
 0x380   : > { %8768 = vst [vmem:[#allocation194_spill] sm:$0xff] %v6467_v53  ;;  %v6469_v14 = vpop.permute.xlu1 %1609 }
 0x381   : > { %8769 = vst [vmem:[#allocation195_spill] sm:$0xff] %v6469_v14  ;;  %1926 = vrot.lane.b32.xlu0 %v5903_v63, %s8545_s24 }
 0x382   : > { %1928 = vrot.lane.b32.xlu1 %v5905_v1, %s8545_s24  ;;  %s8549_s24 = smov 93  }
 0x383   : > { %v6475_v55 = vpop.permute.xlu0 %1611 }
 0x384   : > { %8770 = vst [vmem:[#allocation196_spill] sm:$0xff] %v6475_v55  ;;  %v6477_v56 = vpop.permute.xlu1 %1613 }
 0x385   : > { %8771 = vst [vmem:[#allocation197_spill] sm:$0xff] %v6477_v56  ;;  %1959 = vrot.lane.b32.xlu0 %v6083_v0, %s8547_s21  ;;  %v6503_v56 = vld [vmem:[#allocation2 + $0x30] sm:$0xff] }
 0x386   : > { %1961 = vrot.lane.b32.xlu1 %v6085_v46, %s8547_s21 }
 0x387   : > { %v6483_v15 = vpop.permute.xlu0 %1644 }
 0x388   : > { %8772 = vst [vmem:[#allocation198_spill] sm:$0xff] %v6483_v15  ;;  %v6485_v53 = vpop.permute.xlu1 %1646  ;;  %v6505_v15 = vld [vmem:[#allocation2 + $0x38] sm:$0xff] }
 0x389   : > { %8773 = vst [vmem:[#allocation199_spill] sm:$0xff] %v6485_v53  ;;  %1963 = vrot.lane.b32.xlu0 %v6191_v42, %s8547_s21 }
 0x38a   : > { %1965 = vrot.lane.b32.xlu1 %v6193_v44, %s8547_s21 }
 0x38b   : > { %v6491_v63 = vpop.permute.xlu0 %1648 }
 0x38c   : > { %8774 = vst [vmem:[#allocation200_spill] sm:$0xff] %v6491_v63  ;;  %v6493_v1 = vpop.permute.xlu1 %1650 }
 0x38d   : > { %8775 = vst [vmem:[#allocation201_spill] sm:$0xff] %v6493_v1  ;;  %1967 = vrot.lane.b32.xlu0 %v6363_v33, %s8547_s21 }
 0x38e   : > { %1969 = vrot.lane.b32.xlu1 %v6365_v34, %s8547_s21 }
 0x38f   : > { %v6499_v14 = vpop.permute.xlu0 %1652 }
 0x390   : > { %8776 = vst [vmem:[#allocation202_spill] sm:$0xff] %v6499_v14  ;;  %v6501_v55 = vpop.permute.xlu1 %1654 }
 0x391   : > { %8777 = vst [vmem:[#allocation203_spill] sm:$0xff] %v6501_v55  ;;  %1971 = vrot.lane.b32.xlu0 %v6503_v56, %s8547_s21 }
 0x392   : > { %1973 = vrot.lane.b32.xlu1 %v6505_v15, %s8547_s21  ;;  %s8551_s21 = smov 92  }
 0x393   : > { %v6511_v53 = vpop.permute.xlu0 %1656 }
 0x394   : > { %8778 = vst [vmem:[#allocation204_spill] sm:$0xff] %v6511_v53  ;;  %v6513_v63 = vpop.permute.xlu1 %1658 }
 0x395   : > { %8779 = vst [vmem:[#allocation205_spill] sm:$0xff] %v6513_v63  ;;  %2004 = vrot.lane.b32.xlu0 %v6083_v0, %s8549_s24 }
 0x396   : > { %2006 = vrot.lane.b32.xlu1 %v6085_v46, %s8549_s24 }
 0x397   : > { %v6519_v1 = vpop.permute.xlu0 %1689 }
 0x398   : > { %8780 = vst [vmem:[#allocation206_spill] sm:$0xff] %v6519_v1  ;;  %v6521_v14 = vpop.permute.xlu1 %1691 }
 0x399   : > { %8781 = vst [vmem:[#allocation207_spill] sm:$0xff] %v6521_v14  ;;  %2008 = vrot.lane.b32.xlu0 %v6191_v42, %s8549_s24 }
 0x39a   : > { %2010 = vrot.lane.b32.xlu1 %v6193_v44, %s8549_s24 }
 0x39b   : > { %v6527_v55 = vpop.permute.xlu0 %1693 }
 0x39c   : > { %8782 = vst [vmem:[#allocation208_spill] sm:$0xff] %v6527_v55  ;;  %v6529_v53 = vpop.permute.xlu1 %1695 }
 0x39d   : > { %8783 = vst [vmem:[#allocation209_spill] sm:$0xff] %v6529_v53  ;;  %2012 = vrot.lane.b32.xlu0 %v6363_v33, %s8549_s24 }
 0x39e   : > { %2014 = vrot.lane.b32.xlu1 %v6365_v34, %s8549_s24 }
 0x39f   : > { %v6535_v63 = vpop.permute.xlu0 %1697 }
 0x3a0   : > { %8784 = vst [vmem:[#allocation210_spill] sm:$0xff] %v6535_v63  ;;  %v6537_v1 = vpop.permute.xlu1 %1699 }
 0x3a1   : > { %8785 = vst [vmem:[#allocation211_spill] sm:$0xff] %v6537_v1  ;;  %2016 = vrot.lane.b32.xlu0 %v6503_v56, %s8549_s24 }
 0x3a2   : > { %2018 = vrot.lane.b32.xlu1 %v6505_v15, %s8549_s24  ;;  %s8553_s24 = smov 91  }
 0x3a3   : > { %v6543_v14 = vpop.permute.xlu0 %1701 }
 0x3a4   : > { %8786 = vst [vmem:[#allocation212_spill] sm:$0xff] %v6543_v14  ;;  %v6545_v55 = vpop.permute.xlu1 %1703 }
 0x3a5   : > { %8787 = vst [vmem:[#allocation213_spill] sm:$0xff] %v6545_v55  ;;  %2049 = vrot.lane.b32.xlu0 %v6083_v0, %s8551_s21 }
 0x3a6   : > { %2051 = vrot.lane.b32.xlu1 %v6085_v46, %s8551_s21 }
 0x3a7   : > { %v6551_v53 = vpop.permute.xlu0 %1734 }
 0x3a8   : > { %8788 = vst [vmem:[#allocation214_spill] sm:$0xff] %v6551_v53  ;;  %v6553_v63 = vpop.permute.xlu1 %1736 }
 0x3a9   : > { %8789 = vst [vmem:[#allocation215_spill] sm:$0xff] %v6553_v63  ;;  %2053 = vrot.lane.b32.xlu0 %v6191_v42, %s8551_s21 }
 0x3aa   : > { %2055 = vrot.lane.b32.xlu1 %v6193_v44, %s8551_s21 }
 0x3ab   : > { %v6559_v1 = vpop.permute.xlu0 %1738 }
 0x3ac   : > { %8790 = vst [vmem:[#allocation216_spill] sm:$0xff] %v6559_v1  ;;  %v6561_v14 = vpop.permute.xlu1 %1740 }
 0x3ad   : > { %8791 = vst [vmem:[#allocation217_spill] sm:$0xff] %v6561_v14  ;;  %2057 = vrot.lane.b32.xlu0 %v6363_v33, %s8551_s21 }
 0x3ae   : > { %2059 = vrot.lane.b32.xlu1 %v6365_v34, %s8551_s21 }
 0x3af   : > { %v6567_v55 = vpop.permute.xlu0 %1742 }
 0x3b0   : > { %8792 = vst [vmem:[#allocation218_spill] sm:$0xff] %v6567_v55  ;;  %v6569_v53 = vpop.permute.xlu1 %1744 }
 0x3b1   : > { %8793 = vst [vmem:[#allocation219_spill] sm:$0xff] %v6569_v53  ;;  %2061 = vrot.lane.b32.xlu0 %v6503_v56, %s8551_s21 }
 0x3b2   : > { %2063 = vrot.lane.b32.xlu1 %v6505_v15, %s8551_s21  ;;  %s5319_s21 = smov 90  }
 0x3b3   : > { %v6575_v63 = vpop.permute.xlu0 %1746 }
 0x3b4   : > { %8794 = vst [vmem:[#allocation220_spill] sm:$0xff] %v6575_v63  ;;  %v6577_v1 = vpop.permute.xlu1 %1748 }
 0x3b5   : > { %8795 = vst [vmem:[#allocation221_spill] sm:$0xff] %v6577_v1  ;;  %2094 = vrot.lane.b32.xlu0 %v6083_v0, %s8553_s24 }
 0x3b6   : > { %2096 = vrot.lane.b32.xlu1 %v6085_v46, %s8553_s24 }
 0x3b7   : > { %v6583_v14 = vpop.permute.xlu0 %1779 }
 0x3b8   : > { %8796 = vst [vmem:[#allocation222_spill] sm:$0xff] %v6583_v14  ;;  %v6585_v55 = vpop.permute.xlu1 %1781 }
 0x3b9   : > { %8797 = vst [vmem:[#allocation223_spill] sm:$0xff] %v6585_v55  ;;  %2098 = vrot.lane.b32.xlu0 %v6191_v42, %s8553_s24 }
 0x3ba   : > { %2100 = vrot.lane.b32.xlu1 %v6193_v44, %s8553_s24 }
 0x3bb   : > { %v6591_v53 = vpop.permute.xlu0 %1783 }
 0x3bc   : > { %8798 = vst [vmem:[#allocation224_spill] sm:$0xff] %v6591_v53  ;;  %v6593_v63 = vpop.permute.xlu1 %1785 }
 0x3bd   : > { %8799 = vst [vmem:[#allocation225_spill] sm:$0xff] %v6593_v63  ;;  %2102 = vrot.lane.b32.xlu0 %v6363_v33, %s8553_s24 }
 0x3be   : > { %2104 = vrot.lane.b32.xlu1 %v6365_v34, %s8553_s24 }
 0x3bf   : > { %v6599_v1 = vpop.permute.xlu0 %1787 }
 0x3c0   : > { %8800 = vst [vmem:[#allocation226_spill] sm:$0xff] %v6599_v1  ;;  %v6601_v14 = vpop.permute.xlu1 %1789 }
 0x3c1   : > { %8801 = vst [vmem:[#allocation227_spill] sm:$0xff] %v6601_v14  ;;  %2106 = vrot.lane.b32.xlu0 %v6503_v56, %s8553_s24 }
 0x3c2   : > { %2108 = vrot.lane.b32.xlu1 %v6505_v15, %s8553_s24  ;;  %s5320_s24 = smov 89  }
 0x3c3   : > { %v6607_v55 = vpop.permute.xlu0 %1791 }
 0x3c4   : > { %8802 = vst [vmem:[#allocation228_spill] sm:$0xff] %v6607_v55  ;;  %v6609_v53 = vpop.permute.xlu1 %1793 }
 0x3c5   : > { %8803 = vst [vmem:[#allocation229_spill] sm:$0xff] %v6609_v53  ;;  %2139 = vrot.lane.b32.xlu0 %v6083_v0, %s5319_s21 }
 0x3c6   : > { %2141 = vrot.lane.b32.xlu1 %v6085_v46, %s5319_s21 }
 0x3c7   : > { %v6615_v63 = vpop.permute.xlu0 %1824 }
 0x3c8   : > { %8804 = vst [vmem:[#allocation230_spill] sm:$0xff] %v6615_v63  ;;  %v6617_v1 = vpop.permute.xlu1 %1826 }
 0x3c9   : > { %8805 = vst [vmem:[#allocation231_spill] sm:$0xff] %v6617_v1  ;;  %2143 = vrot.lane.b32.xlu0 %v6191_v42, %s5319_s21 }
 0x3ca   : > { %2145 = vrot.lane.b32.xlu1 %v6193_v44, %s5319_s21 }
 0x3cb   : > { %v6623_v14 = vpop.permute.xlu0 %1828 }
 0x3cc   : > { %8806 = vst [vmem:[#allocation232_spill] sm:$0xff] %v6623_v14  ;;  %v6625_v55 = vpop.permute.xlu1 %1830 }
 0x3cd   : > { %8807 = vst [vmem:[#allocation233_spill] sm:$0xff] %v6625_v55  ;;  %2147 = vrot.lane.b32.xlu0 %v6363_v33, %s5319_s21 }
 0x3ce   : > { %2149 = vrot.lane.b32.xlu1 %v6365_v34, %s5319_s21 }
 0x3cf   : > { %v6631_v53 = vpop.permute.xlu0 %1832 }
 0x3d0   : > { %8808 = vst [vmem:[#allocation234_spill] sm:$0xff] %v6631_v53  ;;  %v6633_v63 = vpop.permute.xlu1 %1834 }
 0x3d1   : > { %8809 = vst [vmem:[#allocation235_spill] sm:$0xff] %v6633_v63  ;;  %2151 = vrot.lane.b32.xlu0 %v6503_v56, %s5319_s21 }
 0x3d2   : > { %2153 = vrot.lane.b32.xlu1 %v6505_v15, %s5319_s21 }
 0x3d3   : > { %v6639_v1 = vpop.permute.xlu0 %1836 }
 0x3d4   : > { %8810 = vst [vmem:[#allocation236_spill] sm:$0xff] %v6639_v1  ;;  %v6641_v14 = vpop.permute.xlu1 %1838 }
 0x3d5   : > { %8811 = vst [vmem:[#allocation237_spill] sm:$0xff] %v6641_v14  ;;  %2184 = vrot.lane.b32.xlu0 %v6083_v0, %s5320_s24 }
 0x3d6   : > { %2186 = vrot.lane.b32.xlu1 %v6085_v46, %s5320_s24 }
 0x3d7   : > { %v6647_v55 = vpop.permute.xlu0 %1869 }
 0x3d8   : > { %8812 = vst [vmem:[#allocation238_spill] sm:$0xff] %v6647_v55  ;;  %v6649_v53 = vpop.permute.xlu1 %1871  ;;  %v6675_v55 = vld [vmem:[#allocation2 + $0x40] sm:$0xff] }
 0x3d9   : > { %8813 = vst [vmem:[#allocation239_spill] sm:$0xff] %v6649_v53  ;;  %2188 = vrot.lane.b32.xlu0 %v6191_v42, %s5320_s24  ;;  %v6687_v53 = vld [vmem:[#allocation2 + $0x50] sm:$0xff] }
 0x3da   : > { %2190 = vrot.lane.b32.xlu1 %v6193_v44, %s5320_s24 }
 0x3db   : > { %v6655_v63 = vpop.permute.xlu0 %1873 }
 0x3dc   : > { %8814 = vst [vmem:[#allocation240_spill] sm:$0xff] %v6655_v63  ;;  %v6657_v1 = vpop.permute.xlu1 %1875 }
 0x3dd   : > { %8815 = vst [vmem:[#allocation241_spill] sm:$0xff] %v6657_v1  ;;  %2192 = vrot.lane.b32.xlu0 %v6363_v33, %s5320_s24  ;;  %v6677_v33 = vld [vmem:[#allocation2 + $0x48] sm:$0xff] }
 0x3de   : > { %2194 = vrot.lane.b32.xlu1 %v6365_v34, %s5320_s24 }
 0x3df   : > { %v6663_v0 = vpop.permute.xlu0 %1877 }
 0x3e0   : > { %8816 = vst [vmem:[#allocation242_spill] sm:$0xff] %v6663_v0  ;;  %v6665_v46 = vpop.permute.xlu1 %1879  ;;  %v6699_v0 = vld [vmem:[#allocation2 + $0x60] sm:$0xff] }
 0x3e1   : > { %8817 = vst [vmem:[#allocation243_spill] sm:$0xff] %v6665_v46  ;;  %2196 = vrot.lane.b32.xlu0 %v6503_v56, %s5320_s24  ;;  %v6701_v46 = vld [vmem:[#allocation2 + $0x68] sm:$0xff] }
 0x3e2   : > { %2198 = vrot.lane.b32.xlu1 %v6505_v15, %s5320_s24  ;;  %v6689_v15 = vld [vmem:[#allocation2 + $0x58] sm:$0xff] }
 0x3e3   : > { %v6671_v42 = vpop.permute.xlu0 %1881 }
 0x3e4   : > { %8818 = vst [vmem:[#allocation244_spill] sm:$0xff] %v6671_v42  ;;  %v6673_v44 = vpop.permute.xlu1 %1883 }
 0x3e5   : > { %8819 = vst [vmem:[#allocation245_spill] sm:$0xff] %v6673_v44  ;;  %2237 = vrot.lane.b32.xlu0 %v6675_v55, %s8643_s30  ;;  %v6711_v44 = vld [vmem:[#allocation2 + $0x70] sm:$0xff] }
 0x3e6   : > { %2239 = vrot.lane.b32.xlu1 %v6677_v33, %s8643_s30 }
 0x3e7   : > { %v6683_v34 = vpop.permute.xlu0 %1914 }
 0x3e8   : > { %8820 = vst [vmem:[#allocation246_spill] sm:$0xff] %v6683_v34  ;;  %v6685_v56 = vpop.permute.xlu1 %1916  ;;  %v6713_v34 = vld [vmem:[#allocation2 + $0x78] sm:$0xff] }
 0x3e9   : > { %8821 = vst [vmem:[#allocation247_spill] sm:$0xff] %v6685_v56  ;;  %2241 = vrot.lane.b32.xlu0 %v6687_v53, %s8643_s30 }
 0x3ea   : > { %2243 = vrot.lane.b32.xlu1 %v6689_v15, %s8643_s30 }
 0x3eb   : > { %v6695_v63 = vpop.permute.xlu0 %1918 }
 0x3ec   : > { %8822 = vst [vmem:[#allocation248_spill] sm:$0xff] %v6695_v63  ;;  %v6697_v1 = vpop.permute.xlu1 %1920 }
 0x3ed   : > { %8823 = vst [vmem:[#allocation249_spill] sm:$0xff] %v6697_v1  ;;  %2245 = vrot.lane.b32.xlu0 %v6699_v0, %s8643_s30 }
 0x3ee   : > { %2247 = vrot.lane.b32.xlu1 %v6701_v46, %s8643_s30 }
 0x3ef   : > { %v6707_v14 = vpop.permute.xlu0 %1922 }
 0x3f0   : > { %8824 = vst [vmem:[#allocation250_spill] sm:$0xff] %v6707_v14  ;;  %v6709_v42 = vpop.permute.xlu1 %1924 }
 0x3f1   : > { %8825 = vst [vmem:[#allocation251_spill] sm:$0xff] %v6709_v42  ;;  %2249 = vrot.lane.b32.xlu0 %v6711_v44, %s8643_s30 }
 0x3f2   : > { %2251 = vrot.lane.b32.xlu1 %v6713_v34, %s8643_s30 }
 0x3f3   : > { %v6719_v56 = vpop.permute.xlu0 %1926 }
 0x3f4   : > { %8826 = vst [vmem:[#allocation252_spill] sm:$0xff] %v6719_v56  ;;  %v6721_v63 = vpop.permute.xlu1 %1928 }
 0x3f5   : > { %8827 = vst [vmem:[#allocation253_spill] sm:$0xff] %v6721_v63  ;;  %2281 = vrot.lane.b32.xlu0 %v6675_v55, %s8646_s23 }
 0x3f6   : > { %2283 = vrot.lane.b32.xlu1 %v6677_v33, %s8646_s23 }
 0x3f7   : > { %v6727_v1 = vpop.permute.xlu0 %1959 }
 0x3f8   : > { %8828 = vst [vmem:[#allocation254_spill] sm:$0xff] %v6727_v1  ;;  %v6729_v14 = vpop.permute.xlu1 %1961 }
 0x3f9   : > { %8829 = vst [vmem:[#allocation255_spill] sm:$0xff] %v6729_v14  ;;  %2285 = vrot.lane.b32.xlu0 %v6687_v53, %s8646_s23 }
 0x3fa   : > { %2287 = vrot.lane.b32.xlu1 %v6689_v15, %s8646_s23 }
 0x3fb   : > { %v6735_v42 = vpop.permute.xlu0 %1963 }
 0x3fc   : > { %8830 = vst [vmem:[#allocation256_spill] sm:$0xff] %v6735_v42  ;;  %v6737_v56 = vpop.permute.xlu1 %1965 }
 0x3fd   : > { %8831 = vst [vmem:[#allocation257_spill] sm:$0xff] %v6737_v56  ;;  %2289 = vrot.lane.b32.xlu0 %v6699_v0, %s8646_s23 }
 0x3fe   : > { %2291 = vrot.lane.b32.xlu1 %v6701_v46, %s8646_s23 }
 0x3ff   : > { %v6743_v63 = vpop.permute.xlu0 %1967 }
 0x400   : > { %8832 = vst [vmem:[#allocation258_spill] sm:$0xff] %v6743_v63  ;;  %v6745_v1 = vpop.permute.xlu1 %1969 }
 0x401   : > { %8833 = vst [vmem:[#allocation259_spill] sm:$0xff] %v6745_v1  ;;  %2293 = vrot.lane.b32.xlu0 %v6711_v44, %s8646_s23 }
 0x402   : > { %2295 = vrot.lane.b32.xlu1 %v6713_v34, %s8646_s23 }
 0x403   : > { %v6751_v14 = vpop.permute.xlu0 %1971 }
 0x404   : > { %8834 = vst [vmem:[#allocation260_spill] sm:$0xff] %v6751_v14  ;;  %v6753_v42 = vpop.permute.xlu1 %1973 }
 0x405   : > { %8835 = vst [vmem:[#allocation261_spill] sm:$0xff] %v6753_v42  ;;  %2325 = vrot.lane.b32.xlu0 %v6675_v55, %s8649_s27 }
 0x406   : > { %2327 = vrot.lane.b32.xlu1 %v6677_v33, %s8649_s27 }
 0x407   : > { %v6759_v56 = vpop.permute.xlu0 %2004 }
 0x408   : > { %8836 = vst [vmem:[#allocation262_spill] sm:$0xff] %v6759_v56  ;;  %v6761_v63 = vpop.permute.xlu1 %2006 }
 0x409   : > { %8837 = vst [vmem:[#allocation263_spill] sm:$0xff] %v6761_v63  ;;  %2329 = vrot.lane.b32.xlu0 %v6687_v53, %s8649_s27 }
 0x40a   : > { %2331 = vrot.lane.b32.xlu1 %v6689_v15, %s8649_s27 }
 0x40b   : > { %v6767_v1 = vpop.permute.xlu0 %2008 }
 0x40c   : > { %8838 = vst [vmem:[#allocation264_spill] sm:$0xff] %v6767_v1  ;;  %v6769_v14 = vpop.permute.xlu1 %2010 }
 0x40d   : > { %8839 = vst [vmem:[#allocation265_spill] sm:$0xff] %v6769_v14  ;;  %2333 = vrot.lane.b32.xlu0 %v6699_v0, %s8649_s27 }
 0x40e   : > { %2335 = vrot.lane.b32.xlu1 %v6701_v46, %s8649_s27 }
 0x40f   : > { %v6775_v42 = vpop.permute.xlu0 %2012 }
 0x410   : > { %8840 = vst [vmem:[#allocation266_spill] sm:$0xff] %v6775_v42  ;;  %v6777_v56 = vpop.permute.xlu1 %2014 }
 0x411   : > { %8841 = vst [vmem:[#allocation267_spill] sm:$0xff] %v6777_v56  ;;  %2337 = vrot.lane.b32.xlu0 %v6711_v44, %s8649_s27 }
 0x412   : > { %2339 = vrot.lane.b32.xlu1 %v6713_v34, %s8649_s27  ;;  %s8947_s27 = smov 101  }
 0x413   : > { %v6783_v63 = vpop.permute.xlu0 %2016 }
 0x414   : > { %8842 = vst [vmem:[#allocation268_spill] sm:$0xff] %v6783_v63  ;;  %v6785_v1 = vpop.permute.xlu1 %2018 }
 0x415   : > { %8843 = vst [vmem:[#allocation269_spill] sm:$0xff] %v6785_v1  ;;  %2369 = vrot.lane.b32.xlu0 %v6675_v55, %s8605_s14 }
 0x416   : > { %2371 = vrot.lane.b32.xlu1 %v6677_v33, %s8605_s14 }
 0x417   : > { %v6791_v14 = vpop.permute.xlu0 %2049 }
 0x418   : > { %8844 = vst [vmem:[#allocation270_spill] sm:$0xff] %v6791_v14  ;;  %v6793_v42 = vpop.permute.xlu1 %2051 }
 0x419   : > { %8845 = vst [vmem:[#allocation271_spill] sm:$0xff] %v6793_v42  ;;  %2373 = vrot.lane.b32.xlu0 %v6687_v53, %s8605_s14 }
 0x41a   : > { %2375 = vrot.lane.b32.xlu1 %v6689_v15, %s8605_s14 }
 0x41b   : > { %v6799_v56 = vpop.permute.xlu0 %2053 }
 0x41c   : > { %8846 = vst [vmem:[#allocation272_spill] sm:$0xff] %v6799_v56  ;;  %v6801_v63 = vpop.permute.xlu1 %2055 }
 0x41d   : > { %8847 = vst [vmem:[#allocation273_spill] sm:$0xff] %v6801_v63  ;;  %2377 = vrot.lane.b32.xlu0 %v6699_v0, %s8605_s14 }
 0x41e   : > { %2379 = vrot.lane.b32.xlu1 %v6701_v46, %s8605_s14 }
 0x41f   : > { %v6807_v1 = vpop.permute.xlu0 %2057 }
 0x420   : > { %8848 = vst [vmem:[#allocation274_spill] sm:$0xff] %v6807_v1  ;;  %v6809_v14 = vpop.permute.xlu1 %2059 }
 0x421   : > { %8849 = vst [vmem:[#allocation275_spill] sm:$0xff] %v6809_v14  ;;  %2381 = vrot.lane.b32.xlu0 %v6711_v44, %s8605_s14 }
 0x422   : > { %2383 = vrot.lane.b32.xlu1 %v6713_v34, %s8605_s14 }
 0x423   : > { %v6815_v42 = vpop.permute.xlu0 %2061 }
 0x424   : > { %8850 = vst [vmem:[#allocation276_spill] sm:$0xff] %v6815_v42  ;;  %v6817_v56 = vpop.permute.xlu1 %2063 }
 0x425   : > { %8851 = vst [vmem:[#allocation277_spill] sm:$0xff] %v6817_v56  ;;  %2413 = vrot.lane.b32.xlu0 %v6675_v55, %s8608_s17 }
 0x426   : > { %2415 = vrot.lane.b32.xlu1 %v6677_v33, %s8608_s17 }
 0x427   : > { %v6823_v63 = vpop.permute.xlu0 %2094 }
 0x428   : > { %8852 = vst [vmem:[#allocation278_spill] sm:$0xff] %v6823_v63  ;;  %v6825_v1 = vpop.permute.xlu1 %2096 }
 0x429   : > { %8853 = vst [vmem:[#allocation279_spill] sm:$0xff] %v6825_v1  ;;  %2417 = vrot.lane.b32.xlu0 %v6687_v53, %s8608_s17 }
 0x42a   : > { %2419 = vrot.lane.b32.xlu1 %v6689_v15, %s8608_s17 }
 0x42b   : > { %v6831_v14 = vpop.permute.xlu0 %2098 }
 0x42c   : > { %8854 = vst [vmem:[#allocation280_spill] sm:$0xff] %v6831_v14  ;;  %v6833_v42 = vpop.permute.xlu1 %2100 }
 0x42d   : > { %8855 = vst [vmem:[#allocation281_spill] sm:$0xff] %v6833_v42  ;;  %2421 = vrot.lane.b32.xlu0 %v6699_v0, %s8608_s17 }
 0x42e   : > { %2423 = vrot.lane.b32.xlu1 %v6701_v46, %s8608_s17 }
 0x42f   : > { %v6839_v56 = vpop.permute.xlu0 %2102 }
 0x430   : > { %8856 = vst [vmem:[#allocation282_spill] sm:$0xff] %v6839_v56  ;;  %v6841_v63 = vpop.permute.xlu1 %2104 }
 0x431   : > { %8857 = vst [vmem:[#allocation283_spill] sm:$0xff] %v6841_v63  ;;  %2425 = vrot.lane.b32.xlu0 %v6711_v44, %s8608_s17 }
 0x432   : > { %2427 = vrot.lane.b32.xlu1 %v6713_v34, %s8608_s17  ;;  %s9003_s17 = smov 103  }
 0x433   : > { %v6847_v1 = vpop.permute.xlu0 %2106 }
 0x434   : > { %8858 = vst [vmem:[#allocation284_spill] sm:$0xff] %v6847_v1  ;;  %v6849_v14 = vpop.permute.xlu1 %2108 }
 0x435   : > { %8859 = vst [vmem:[#allocation285_spill] sm:$0xff] %v6849_v14  ;;  %2457 = vrot.lane.b32.xlu0 %v6675_v55, %s8611_s18 }
 0x436   : > { %2459 = vrot.lane.b32.xlu1 %v6677_v33, %s8611_s18 }
 0x437   : > { %v6855_v42 = vpop.permute.xlu0 %2139 }
 0x438   : > { %8860 = vst [vmem:[#allocation286_spill] sm:$0xff] %v6855_v42  ;;  %v6857_v56 = vpop.permute.xlu1 %2141 }
 0x439   : > { %8861 = vst [vmem:[#allocation287_spill] sm:$0xff] %v6857_v56  ;;  %2461 = vrot.lane.b32.xlu0 %v6687_v53, %s8611_s18 }
 0x43a   : > { %2463 = vrot.lane.b32.xlu1 %v6689_v15, %s8611_s18 }
 0x43b   : > { %v6863_v63 = vpop.permute.xlu0 %2143 }
 0x43c   : > { %8862 = vst [vmem:[#allocation288_spill] sm:$0xff] %v6863_v63  ;;  %v6865_v1 = vpop.permute.xlu1 %2145 }
 0x43d   : > { %8863 = vst [vmem:[#allocation289_spill] sm:$0xff] %v6865_v1  ;;  %2465 = vrot.lane.b32.xlu0 %v6699_v0, %s8611_s18 }
 0x43e   : > { %2467 = vrot.lane.b32.xlu1 %v6701_v46, %s8611_s18 }
 0x43f   : > { %v6871_v14 = vpop.permute.xlu0 %2147 }
 0x440   : > { %8864 = vst [vmem:[#allocation290_spill] sm:$0xff] %v6871_v14  ;;  %v6873_v42 = vpop.permute.xlu1 %2149 }
 0x441   : > { %8865 = vst [vmem:[#allocation291_spill] sm:$0xff] %v6873_v42  ;;  %2469 = vrot.lane.b32.xlu0 %v6711_v44, %s8611_s18 }
 0x442   : > { %2471 = vrot.lane.b32.xlu1 %v6713_v34, %s8611_s18  ;;  %s9024_s18 = smov 95  }
 0x443   : > { %v6879_v56 = vpop.permute.xlu0 %2151 }
 0x444   : > { %8866 = vst [vmem:[#allocation292_spill] sm:$0xff] %v6879_v56  ;;  %v6881_v63 = vpop.permute.xlu1 %2153 }
 0x445   : > { %8867 = vst [vmem:[#allocation293_spill] sm:$0xff] %v6881_v63  ;;  %2501 = vrot.lane.b32.xlu0 %v6675_v55, %s8614_s16 }
 0x446   : > { %2503 = vrot.lane.b32.xlu1 %v6677_v33, %s8614_s16 }
 0x447   : > { %v6887_v1 = vpop.permute.xlu0 %2184 }
 0x448   : > { %8868 = vst [vmem:[#allocation294_spill] sm:$0xff] %v6887_v1  ;;  %v6889_v14 = vpop.permute.xlu1 %2186 }
 0x449   : > { %8869 = vst [vmem:[#allocation295_spill] sm:$0xff] %v6889_v14  ;;  %2505 = vrot.lane.b32.xlu0 %v6687_v53, %s8614_s16 }
 0x44a   : > { %2507 = vrot.lane.b32.xlu1 %v6689_v15, %s8614_s16 }
 0x44b   : > { %v6895_v42 = vpop.permute.xlu0 %2188 }
 0x44c   : > { %8870 = vst [vmem:[#allocation296_spill] sm:$0xff] %v6895_v42  ;;  %v6897_v56 = vpop.permute.xlu1 %2190 }
 0x44d   : > { %8871 = vst [vmem:[#allocation297_spill] sm:$0xff] %v6897_v56  ;;  %2509 = vrot.lane.b32.xlu0 %v6699_v0, %s8614_s16 }
 0x44e   : > { %2511 = vrot.lane.b32.xlu1 %v6701_v46, %s8614_s16 }
 0x44f   : > { %v6903_v63 = vpop.permute.xlu0 %2192 }
 0x450   : > { %8872 = vst [vmem:[#allocation298_spill] sm:$0xff] %v6903_v63  ;;  %v6905_v1 = vpop.permute.xlu1 %2194 }
 0x451   : > { %8873 = vst [vmem:[#allocation299_spill] sm:$0xff] %v6905_v1  ;;  %2513 = vrot.lane.b32.xlu0 %v6711_v44, %s8614_s16 }
 0x452   : > { %2515 = vrot.lane.b32.xlu1 %v6713_v34, %s8614_s16  ;;  %s8998_s16 = smov 94  }
 0x453   : > { %v6911_v14 = vpop.permute.xlu0 %2196 }
 0x454   : > { %8874 = vst [vmem:[#allocation300_spill] sm:$0xff] %v6911_v14  ;;  %v6913_v42 = vpop.permute.xlu1 %2198 }
 0x455   : > { %8875 = vst [vmem:[#allocation301_spill] sm:$0xff] %v6913_v42  ;;  %2545 = vrot.lane.b32.xlu0 %v6675_v55, %s8617_s13 }
 0x456   : > { %2547 = vrot.lane.b32.xlu1 %v6677_v33, %s8617_s13 }
 0x457   : > { %v6919_v56 = vpop.permute.xlu0 %2237 }
 0x458   : > { %v6921_v63 = vpop.permute.xlu1 %2239 }
 0x459   : > { %2549 = vrot.lane.b32.xlu0 %v6687_v53, %s8617_s13 }
 0x45a   : > { %2551 = vrot.lane.b32.xlu1 %v6689_v15, %s8617_s13 }
 0x45b   : > { %v6927_v1 = vpop.permute.xlu0 %2241 }
 0x45c   : > { %v6929_v14 = vpop.permute.xlu1 %2243 }
 0x45d   : > { %2553 = vrot.lane.b32.xlu0 %v6699_v0, %s8617_s13 }
 0x45e   : > { %2555 = vrot.lane.b32.xlu1 %v6701_v46, %s8617_s13 }
 0x45f   : > { %v6935_v42 = vpop.permute.xlu0 %2245 }
 0x460   : > { %v6937_v54 = vpop.permute.xlu1 %2247 }
 0x461   : > { %2557 = vrot.lane.b32.xlu0 %v6711_v44, %s8617_s13 }
 0x462   : > { %2559 = vrot.lane.b32.xlu1 %v6713_v34, %s8617_s13 }
 0x463   : > { %v6943_v43 = vpop.permute.xlu0 %2249 }
 0x464   : > { %v6945_v41 = vpop.permute.xlu1 %2251 }
 0x465   : > { %2589 = vrot.lane.b32.xlu0 %v6675_v55, %s8618_s12 }
 0x466   : > { %2591 = vrot.lane.b32.xlu1 %v6677_v33, %s8618_s12 }
 0x467   : > { %v6951_v35 = vpop.permute.xlu0 %2281 }
 0x468   : > { %v6953_v36 = vpop.permute.xlu1 %2283 }
 0x469   : > { %2593 = vrot.lane.b32.xlu0 %v6687_v53, %s8618_s12 }
 0x46a   : > { %2595 = vrot.lane.b32.xlu1 %v6689_v15, %s8618_s12 }
 0x46b   : > { %v6959_v16 = vpop.permute.xlu0 %2285 }
 0x46c   : > { %v6961_v17 = vpop.permute.xlu1 %2287 }
 0x46d   : > { %2597 = vrot.lane.b32.xlu0 %v6699_v0, %s8618_s12 }
 0x46e   : > { %2599 = vrot.lane.b32.xlu1 %v6701_v46, %s8618_s12 }
 0x46f   : > { %v2290_v2 = vpop.permute.xlu0 %2289 }
 0x470   : > { %v2292_v3 = vpop.permute.xlu1 %2291 }
 0x471   : > { %2601 = vrot.lane.b32.xlu0 %v6711_v44, %s8618_s12 }
 0x472   : > { %2603 = vrot.lane.b32.xlu1 %v6713_v34, %s8618_s12 }
 0x473   : > { %v2294_v47 = vpop.permute.xlu0 %2293 }
 0x474   : > { %v2296_v48 = vpop.permute.xlu1 %2295 }
 0x475   : > { %2633 = vrot.lane.b32.xlu0 %v6675_v55, %s8619_s15  ;;  %v2300_v5 = vsel %vm535_vm6, %v2294_v47, %v2296_v48  ;;  %v538_v47 = vsel %vm535_vm6, %v5983_v61, %v5985_v59  ;;  %v2298_v48 = vsel %vm535_vm6, %v6959_v16, %v6961_v17  ;;  %v2297_v59 = vsel %vm535_vm6, %v6951_v35, %v6953_v36  ;;  %v450_v16 = vld [vmem:[#allocation2] sm:$0xff] }
 0x476   : > { %2635 = vrot.lane.b32.xlu1 %v6677_v33, %s8619_s15  ;;  %v494_v35 = vsel %vm490_vm7, %v6139_v45, %v6141_v24  ;;  %v492_v45 = vsel %vm490_vm7, %v5803_v8, %v5805_v9  ;;  %v453_v8 = vld [vmem:[#allocation2 + $0x30] sm:$0xff] }
 0x477   : > { %v2326_v37 = vpop.permute.xlu0 %2325 }
 0x478   : > { %v2328_v38 = vpop.permute.xlu1 %2327 }
 0x479   : > { %2637 = vrot.lane.b32.xlu0 %v6687_v53, %s8619_s15 }
 0x47a   : > { %2639 = vrot.lane.b32.xlu1 %v6689_v15, %s8619_s15 }
 0x47b   : > { %v2330_v18 = vpop.permute.xlu0 %2329 }
 0x47c   : > { %v2332_v19 = vpop.permute.xlu1 %2331 }
 0x47d   : > { %2641 = vrot.lane.b32.xlu0 %v6699_v0, %s8619_s15 }
 0x47e   : > { %2643 = vrot.lane.b32.xlu1 %v6701_v46, %s8619_s15 }
 0x47f   : > { %v2334_v57 = vpop.permute.xlu0 %2333 }
 0x480   : > { %v2336_v58 = vpop.permute.xlu1 %2335 }
 0x481   : > { %2645 = vrot.lane.b32.xlu0 %v6711_v44, %s8619_s15  ;;  %v2343_v21 = vsel %vm580_vm5, %v2334_v57, %v2336_v58  ;;  %v2341_v58 = vsel %vm580_vm5, %v2326_v37, %v2328_v38  ;;  %v539_v37 = vsel %vm535_vm6, %v6147_v4, %v6149_v22  ;;  %v536_v4 = vsel %vm535_vm6, %v5639_v29, %v5641_v30 }
 0x482   : > { %2647 = vrot.lane.b32.xlu1 %v6713_v34, %s8619_s15  ;;  %v2255_v29 = vsel %vm490_vm7, %v6935_v42, %v6937_v54 }
 0x483   : > { %v2338_v25 = vpop.permute.xlu0 %2337 }
 0x484   : > { %v2340_v26 = vpop.permute.xlu1 %2339 }
 0x485   : > { %v2344_v39 = vsel %vm580_vm5, %v2338_v25, %v2340_v26  ;;  %2677 = vrot.lane.b32.xlu0 %v6675_v55, %s8570_s9  ;;  %v583_v25 = vsel %vm580_vm5, %v5991_v60, %v5993_v62  ;;  %v581_v62 = vsel %vm580_vm5, %v5647_v31, %v5649_v32  ;;  %v2299_v31 = vsel %vm535_vm6, %v2290_v2, %v2292_v3 }
 0x486   : > { %2679 = vrot.lane.b32.xlu1 %v6677_v33, %s8570_s9  ;;  %4305 = vmatprep.subr.mxu1 %v2344_v39  ;;  %v2342_v39 = vsel %vm580_vm5, %v2330_v18, %v2332_v19  ;;  %v537_v2 = vsel %vm535_vm6, %v5811_v10, %v5813_v11  ;;  %v2256_v10 = vsel %vm490_vm7, %v6943_v43, %v6945_v41 }
 0x487   : > { %4306 = vmatpush1.msra.mxu1 %v584_v40  ;;  %v6995_v20 = vpop.permute.xlu0 %2369  ;;  %v582_v40 = vsel %vm580_vm5, %v5819_v12, %v5821_v13  ;;  %v493_v41 = vsel %vm490_vm7, %v5975_v51, %v5977_v52  ;;  %v2254_v43 = vsel %vm490_vm7, %v6927_v1, %v6929_v14  ;;  %v2253_v51 = vsel %vm490_vm7, %v6919_v56, %v6921_v63  ;;  %v452_v13 = vld [vmem:[#allocation2 + $0x20] sm:$0xff] }
 0x488   : > { %v6998_v49 = vpop.permute.xlu1 %2371  ;;  %4307 = vmatprep.subr.mxu1 %v2343_v21  ;;  %v491_v11 = vsel %vm490_vm7, %v5631_v27, %v5633_v28  ;;  %v451_v27 = vld [vmem:[#allocation2 + $0x10] sm:$0xff]  ;;  %vm1075_vm5 = vcmask 932864  }
 0x489   : > { %4308 = vmatpush1.msra.mxu1 %v583_v25  ;;  %2681 = vrot.lane.b32.xlu0 %v6687_v53, %s8570_s9 }
 0x48a   : > { %2683 = vrot.lane.b32.xlu1 %v6689_v15, %s8570_s9  ;;  %4309 = vmatprep.subr.mxu1 %v2342_v39 }
 0x48b   : > { %4310 = vmatpush1.msra.mxu1 %v582_v40  ;;  %v7011_v57 = vpop.permute.xlu0 %2373 }
 0x48c   : > { %v7014_v60 = vpop.permute.xlu1 %2375  ;;  %4311 = vmatprep.subr.mxu1 %v2341_v58 }
 0x48d   : > { %4312 = vmatpush1.msra.mxu1 %v581_v62  ;;  %2685 = vrot.lane.b32.xlu0 %v6699_v0, %s8570_s9 }
 0x48e   : > { %2687 = vrot.lane.b32.xlu1 %v6701_v46, %s8570_s9  ;;  %4313 = vmatprep.subr.mxu1 %v2300_v5  ;;  %v764_v5 = vsel %vm760_vm8, %v6187_v6, %v6189_v7  ;;  %v8877_v6 = vld [vmem:[#allocation60_spill] sm:$0xff]  ;;  %v8878_v7 = vld [vmem:[#allocation59_spill] sm:$0xff] }
 0x48f   : > { %4314 = vmatpush1.msra.mxu1 %v539_v37  ;;  %v7027_v38 = vpop.permute.xlu0 %2377 }
 0x490   : > { %v7030_v32 = vpop.permute.xlu1 %2379  ;;  %4315 = vmatprep.subr.mxu1 %v2299_v31 }
 0x491   : > { %4316 = vmatpush1.msra.mxu1 %v538_v47  ;;  %2689 = vrot.lane.b32.xlu0 %v6711_v44, %s8570_s9 }
 0x492   : > { %2691 = vrot.lane.b32.xlu1 %v6713_v34, %s8570_s9  ;;  %4317 = vmatprep.subr.mxu1 %v2298_v48  ;;  %v8876_v48 = vld [vmem:[#allocation95_spill] sm:$0xff]  ;;  %s9097_s9 = smov 100  }
 0x493   : > { %4318 = vmatpush1.msra.mxu1 %v537_v2  ;;  %v7045_v3 = vpop.permute.xlu0 %2381  ;;  %v763_v2 = vsel %vm760_vm8, %v8876_v48, %v6025_v50 }
 0x494   : > { %v7050_v61 = vpop.permute.xlu1 %2383  ;;  %4319 = vmatprep.subr.mxu1 %v2297_v59 }
 0x495   : > { %4320 = vmatpush1.msra.mxu1 %v536_v4  ;;  %2721 = vrot.lane.b32.xlu0 %v6675_v55, %s8573_s10  ;;  %v762_v4 = vsel %vm760_vm8, %v8878_v7, %v8877_v6  ;;  %v2387_v7 = vsel %vm625_vm11, %v7027_v38, %v7030_v32  ;;  %v7290_v38 = vld [vmem:[#allocation2 + $0x78] sm:$0xff]  ;;  %v8901_v32 = vld [vmem:[#allocation54_spill] sm:$0xff] }
 0x496   : > { %2723 = vrot.lane.b32.xlu1 %v6677_v33, %s8573_s10  ;;  %4321 = vmatprep.subr.mxu1 %v2256_v10 }
 0x497   : > { %4322 = vmatpush1.msra.mxu1 %v494_v35  ;;  %v7065_v36 = vpop.permute.xlu0 %2413 }
 0x498   : > { %v7070_v30 = vpop.permute.xlu1 %2415  ;;  %4323 = vmatprep.subr.mxu1 %v2255_v29  ;;  %v8879_v29 = vld [vmem:[#allocation24_spill] sm:$0xff] }
 0x499   : > { %4324 = vmatpush1.msra.mxu1 %v493_v41  ;;  %2725 = vrot.lane.b32.xlu0 %v6687_v53, %s8573_s10  ;;  %v8880_v41 = vld [vmem:[#allocation23_spill] sm:$0xff]  ;;  %v2429_v48 = vsel %vm670_vm10, %v7065_v36, %v7070_v30  ;;  %v8898_v30 = vld [vmem:[#allocation122_spill] sm:$0xff] }
 0x49a   : > { %2727 = vrot.lane.b32.xlu1 %v6689_v15, %s8573_s10  ;;  %4325 = vmatprep.subr.mxu1 %v2254_v43  ;;  %v761_v43 = vsel %vm760_vm8, %v8880_v41, %v8879_v29  ;;  %v8897_v36 = vld [vmem:[#allocation123_spill] sm:$0xff]  ;;  %v8902_v41 = vld [vmem:[#allocation53_spill] sm:$0xff] }
 0x49b   : > { %4326 = vmatpush1.msra.mxu1 %v492_v45  ;;  %v7085_v54 = vpop.permute.xlu0 %2417  ;;  %v629_v6 = vsel %vm625_vm11, %v8898_v30, %v8897_v36  ;;  %v7283_v29 = vld [vmem:[#allocation2 + $0x70] sm:$0xff]  ;;  %v8908_v36 = vld [vmem:[#allocation102_spill] sm:$0xff] }
 0x49c   : > { %v7090_v52 = vpop.permute.xlu1 %2419  ;;  %4327 = vmatprep.subr.mxu1 %v2253_v51  ;;  %v8881_v51 = vld [vmem:[#allocation127_spill] sm:$0xff] }
 0x49d   : > { %4328 = vmatpush1.msra.mxu1 %v491_v11  ;;  %2729 = vrot.lane.b32.xlu0 %v6699_v0, %s8573_s10  ;;  %v8882_v11 = vld [vmem:[#allocation126_spill] sm:$0xff] }
 0x49e   : > { %2731 = vrot.lane.b32.xlu1 %v6701_v46, %s8573_s10  ;;  %4329 = vmatprep.subr.mxu1 %v6711_v44 }
 0x49f   : > { %4330 = vmatpush1.msra.mxu1 %v453_v8  ;;  %v7100_v9 = vpop.permute.xlu0 %2421  ;;  %v719_v8 = vsel %vm715_vm9, %v8882_v11, %v8881_v51  ;;  %v2385_v51 = vsel %vm625_vm11, %v6995_v20, %v6998_v49  ;;  %v8903_v11 = vld [vmem:[#allocation18_spill] sm:$0xff] }
 0x4a0   : > { %v7102_v12 = vpop.permute.xlu1 %2423  ;;  %4331 = vmatprep.subr.mxu1 %v6699_v0 }
 0x4a1   : > { %4332 = vmatpush1.msra.mxu1 %v452_v13  ;;  %2733 = vrot.lane.b32.xlu0 %v6711_v44, %s8573_s10 }
 0x4a2   : > { %2735 = vrot.lane.b32.xlu1 %v6713_v34, %s8573_s10  ;;  %4333 = vmatprep.subr.mxu1 %v6687_v53  ;;  %s9112_s10 = smov 92  }
 0x4a3   : > { %4334 = vmatpush1.msra.mxu1 %v451_v27  ;;  %v7110_v28 = vpop.permute.xlu0 %2425 }
 0x4a4   : > { %v7112_v14 = vpop.permute.xlu1 %2427  ;;  %4335 = vmatprep.subr.mxu1 %v6675_v55 }
 0x4a5   : > { %4336 = vmatpush1.msra.mxu1 %v450_v16  ;;  %2765 = vrot.lane.b32.xlu0 %v6675_v55, %s8576_s11 }
 0x4a6   : > { %2767 = vrot.lane.b32.xlu1 %v6677_v33, %s8576_s11 }
 0x4a7   : > { %v7119_v17 = vpop.permute.xlu0 %2457 }
 0x4a8   : > { %v7121_v18 = vpop.permute.xlu1 %2459 }
 0x4a9   : > { %2769 = vrot.lane.b32.xlu0 %v6687_v53, %s8576_s11 }
 0x4aa   : > { %2771 = vrot.lane.b32.xlu1 %v6689_v15, %s8576_s11 }
 0x4ab   : > { %v7127_v19 = vpop.permute.xlu0 %2461 }
 0x4ac   : > { %v7129_v21 = vpop.permute.xlu1 %2463 }
 0x4ad   : > { %2773 = vrot.lane.b32.xlu0 %v6699_v0, %s8576_s11 }
 0x4ae   : > { %2775 = vrot.lane.b32.xlu1 %v6701_v46, %s8576_s11 }
 0x4af   : > { %v2466_v22 = vpop.permute.xlu0 %2465 }
 0x4b0   : > { %v2468_v23 = vpop.permute.xlu1 %2467 }
 0x4b1   : > { %2777 = vrot.lane.b32.xlu0 %v6711_v44, %s8576_s11  ;;  %v2475_v13 = vsel %vm715_vm9, %v2466_v22, %v2468_v23  ;;  %v8886_v22 = vld [vmem:[#allocation57_spill] sm:$0xff] }
 0x4b2   : > { %2779 = vrot.lane.b32.xlu1 %v6713_v34, %s8576_s11 }
 0x4b3   : > { %v2470_v24 = vpop.permute.xlu0 %2469 }
 0x4b4   : > { %v2472_v26 = vpop.permute.xlu1 %2471 }
 0x4b5   : > { %2809 = vrot.lane.b32.xlu0 %v6675_v55, %s8579_s29  ;;  %v2476_v45 = vsel %vm715_vm9, %v2470_v24, %v2472_v26  ;;  %v8883_v24 = vld [vmem:[#allocation94_spill] sm:$0xff]  ;;  %v8884_v26 = vld [vmem:[#allocation93_spill] sm:$0xff] }
 0x4b6   : > { %2811 = vrot.lane.b32.xlu1 %v6677_v33, %s8579_s29 }
 0x4b7   : > { %v2502_v63 = vpop.permute.xlu0 %2501 }
 0x4b8   : > { %v2504_v1 = vpop.permute.xlu1 %2503 }
 0x4b9   : > { %2813 = vrot.lane.b32.xlu0 %v6687_v53, %s8579_s29  ;;  %v2517_v10 = vsel %vm760_vm8, %v2502_v63, %v2504_v1  ;;  %v718_v63 = vsel %vm715_vm9, %v8884_v26, %v8883_v24  ;;  %v2474_v1 = vsel %vm715_vm9, %v7127_v19, %v7129_v21  ;;  %v8887_v21 = vld [vmem:[#allocation22_spill] sm:$0xff]  ;;  %v3937_v24 = vld [vmem:[#allocation5] sm:$0xff]  ;;  %v7307_v26 = vld [vmem:[#allocation2 + $0x40] sm:$0xff] }
 0x4ba   : > { %2815 = vrot.lane.b32.xlu1 %v6689_v15, %s8579_s29 }
 0x4bb   : > { %v2506_v42 = vpop.permute.xlu0 %2505 }
 0x4bc   : > { %v2508_v56 = vpop.permute.xlu1 %2507 }
 0x4bd   : > { %2817 = vrot.lane.b32.xlu0 %v6699_v0, %s8579_s29  ;;  %v2518_v59 = vsel %vm760_vm8, %v2506_v42, %v2508_v56  ;;  %v8885_v42 = vld [vmem:[#allocation58_spill] sm:$0xff]  ;;  %v2473_v56 = vsel %vm715_vm9, %v7119_v17, %v7121_v18  ;;  %v8889_v17 = vld [vmem:[#allocation125_spill] sm:$0xff]  ;;  %v8890_v18 = vld [vmem:[#allocation124_spill] sm:$0xff] }
 0x4be   : > { %2819 = vrot.lane.b32.xlu1 %v6701_v46, %s8579_s29  ;;  %v717_v23 = vsel %vm715_vm9, %v8886_v22, %v8885_v42 }
 0x4bf   : > { %v2510_v25 = vpop.permute.xlu0 %2509 }
 0x4c0   : > { %v2512_v39 = vpop.permute.xlu1 %2511 }
 0x4c1   : > { %2821 = vrot.lane.b32.xlu0 %v6711_v44, %s8579_s29  ;;  %v2519_v37 = vsel %vm760_vm8, %v2510_v25, %v2512_v39 }
 0x4c2   : > { %2823 = vrot.lane.b32.xlu1 %v6713_v34, %s8579_s29  ;;  %s9062_s29 = smov 98  }
 0x4c3   : > { %v2514_v40 = vpop.permute.xlu0 %2513 }
 0x4c4   : > { %v2516_v58 = vpop.permute.xlu1 %2515 }
 0x4c5   : > { %v2520_v62 = vsel %vm760_vm8, %v2514_v40, %v2516_v58  ;;  %2853 = vrot.lane.b32.xlu0 %v6675_v55, %s8582_s28  ;;  %v674_v40 = vsel %vm670_vm10, %v8890_v18, %v8889_v17  ;;  %v2431_v58 = vsel %vm670_vm10, %v7100_v9, %v7102_v12  ;;  %v8894_v9 = vld [vmem:[#allocation55_spill] sm:$0xff]  ;;  %v7341_v17 = vld [vmem:[#allocation2 + $0x58] sm:$0xff]  ;;  %vm1030_vm8 = vcmask 941056  }
 0x4c6   : > { %4337 = vmatprep.subr.mxu1 %v2520_v62  ;;  %2855 = vrot.lane.b32.xlu1 %v6677_v33, %s8582_s28 }
 0x4c7   : > { %4338 = vmatpush2.msra.mxu1 %v764_v5  ;;  %v7164_v31 = vpop.permute.xlu0 %2545 }
 0x4c8   : > { %4339 = vmatprep.subr.mxu1 %v2519_v37  ;;  %v7166_v47 = vpop.permute.xlu1 %2547  ;;  %v2430_v37 = vsel %vm670_vm10, %v7085_v54, %v7090_v52  ;;  %v8895_v52 = vld [vmem:[#allocation20_spill] sm:$0xff] }
 0x4c9   : > { %4340 = vmatpush2.msra.mxu1 %v763_v2  ;;  %2857 = vrot.lane.b32.xlu0 %v6687_v53, %s8582_s28 }
 0x4ca   : > { %4341 = vmatprep.subr.mxu1 %v2518_v59  ;;  %2859 = vrot.lane.b32.xlu1 %v6689_v15, %s8582_s28 }
 0x4cb   : > { %4342 = vmatpush2.msra.mxu1 %v762_v4  ;;  %v7180_v35 = vpop.permute.xlu0 %2549 }
 0x4cc   : > { %4343 = vmatprep.subr.mxu1 %v2517_v10  ;;  %v7182_v50 = vpop.permute.xlu1 %2551 }
 0x4cd   : > { %4344 = vmatpush2.msra.mxu1 %v761_v43  ;;  %2861 = vrot.lane.b32.xlu0 %v6699_v0, %s8582_s28  ;;  %v627_v43 = vsel %vm625_vm11, %v8902_v41, %v8901_v32  ;;  %v8911_v41 = vld [vmem:[#allocation32_spill] sm:$0xff] }
 0x4ce   : > { %4345 = vmatprep.subr.mxu1 %v2476_v45  ;;  %2863 = vrot.lane.b32.xlu1 %v6701_v46, %s8582_s28  ;;  %v3938_v45 = vld [vmem:[#allocation5 + $0x8] sm:$0xff] }
 0x4cf   : > { %4346 = vmatpush2.msra.mxu1 %v719_v8  ;;  %v7196_v27 = vpop.permute.xlu0 %2553  ;;  %v8904_v8 = vld [vmem:[#allocation17_spill] sm:$0xff]  ;;  %4369 = vmatprep.mubr.f32.mxu1 %v3938_v45 }
 0x4d0   : > { %4347 = vmatprep.subr.mxu1 %v2475_v13  ;;  %v7198_v16 = vpop.permute.xlu1 %2555  ;;  %v626_v13 = vsel %vm625_vm11, %v8904_v8, %v8903_v11  ;;  %v8913_v8 = vld [vmem:[#allocation133_spill] sm:$0xff] }
 0x4d1   : > { %4348 = vmatpush2.msra.mxu1 %v718_v63  ;;  %2865 = vrot.lane.b32.xlu0 %v6711_v44, %s8582_s28  ;;  %v8888_v44 = vld [vmem:[#allocation21_spill] sm:$0xff]  ;;  %v7311_v63 = vld [vmem:[#allocation2 + $0x48] sm:$0xff] }
 0x4d2   : > { %4349 = vmatprep.subr.mxu1 %v2474_v1  ;;  %2867 = vrot.lane.b32.xlu1 %v6713_v34, %s8582_s28  ;;  %v716_v39 = vsel %vm715_vm9, %v8888_v44, %v8887_v21  ;;  %v2432_v34 = vsel %vm670_vm10, %v7110_v28, %v7112_v14  ;;  %v8891_v14 = vld [vmem:[#allocation92_spill] sm:$0xff]  ;;  %v7319_v1 = vld [vmem:[#allocation2 + $0x50] sm:$0xff]  ;;  %v7335_v44 = vld [vmem:[#allocation2 + $0x68] sm:$0xff]  ;;  %vm985_vm9 = vcmask 949248   ;;  %s9047_s28 = smov 97  }
 0x4d3   : > { %4350 = vmatpush2.msra.mxu1 %v717_v23  ;;  %v7216_v25 = vpop.permute.xlu0 %2557  ;;  %v7331_v23 = vld [vmem:[#allocation2 + $0x60] sm:$0xff] }
 0x4d4   : > { %4351 = vmatprep.subr.mxu1 %v2473_v56  ;;  %v7218_v19 = vpop.permute.xlu1 %2559 }
 0x4d5   : > { %4352 = vmatpush2.msra.mxu1 %v716_v39  ;;  %2897 = vrot.lane.b32.xlu0 %v6675_v55, %s8585_s20  ;;  %v8892_v55 = vld [vmem:[#allocation91_spill] sm:$0xff] }
 0x4d6   : > { %4353 = vmatprep.subr.mxu1 %v2432_v34  ;;  %2899 = vrot.lane.b32.xlu1 %v6677_v33, %s8585_s20  ;;  %v673_v5 = vsel %vm670_vm10, %v8892_v55, %v8891_v14  ;;  %v8893_v33 = vld [vmem:[#allocation56_spill] sm:$0xff] }
 0x4d7   : > { %4354 = vmatpush2.msra.mxu1 %v674_v40  ;;  %v7236_v62 = vpop.permute.xlu0 %2589  ;;  %v672_v12 = vsel %vm670_vm10, %v8894_v9, %v8893_v33 }
 0x4d8   : > { %4355 = vmatprep.subr.mxu1 %v2431_v58  ;;  %v7238_v28 = vpop.permute.xlu1 %2591 }
 0x4d9   : > { %4356 = vmatpush2.msra.mxu1 %v673_v5  ;;  %2901 = vrot.lane.b32.xlu0 %v6687_v53, %s8585_s20  ;;  %v8896_v53 = vld [vmem:[#allocation19_spill] sm:$0xff] }
 0x4da   : > { %4357 = vmatprep.subr.mxu1 %v2430_v37  ;;  %2903 = vrot.lane.b32.xlu1 %v6689_v15, %s8585_s20  ;;  %v671_v59 = vsel %vm670_vm10, %v8896_v53, %v8895_v52  ;;  %v2388_v15 = vsel %vm625_vm11, %v7045_v3, %v7050_v61  ;;  %v8899_v61 = vld [vmem:[#allocation90_spill] sm:$0xff]  ;;  %vm1300_vm10 = vcmask 891904  }
 0x4db   : > { %4358 = vmatpush2.msra.mxu1 %v672_v12  ;;  %v7256_v2 = vpop.permute.xlu0 %2593  ;;  %v8905_v12 = vld [vmem:[#allocation135_spill] sm:$0xff] }
 0x4dc   : > { %4359 = vmatprep.subr.mxu1 %v2429_v48  ;;  %v7258_v54 = vpop.permute.xlu1 %2595  ;;  %v8906_v48 = vld [vmem:[#allocation134_spill] sm:$0xff] }
 0x4dd   : > { %4360 = vmatpush2.msra.mxu1 %v671_v59  ;;  %2905 = vrot.lane.b32.xlu0 %v6699_v0, %s8585_s20  ;;  %v8900_v0 = vld [vmem:[#allocation89_spill] sm:$0xff]  ;;  %v944_v52 = vsel %vm940_vm12, %v8906_v48, %v8905_v12 }
 0x4de   : > { %4361 = vmatprep.subr.mxu1 %v2388_v15  ;;  %2907 = vrot.lane.b32.xlu1 %v6701_v46, %s8585_s20  ;;  %v628_v10 = vsel %vm625_vm11, %v8900_v0, %v8899_v61  ;;  %v2386_v46 = vsel %vm625_vm11, %v7011_v57, %v7014_v60  ;;  %v8907_v15 = vld [vmem:[#allocation103_spill] sm:$0xff]  ;;  %v8909_v61 = vld [vmem:[#allocation68_spill] sm:$0xff]  ;;  %v8920_v12 = vld [vmem:[#allocation29_spill] sm:$0xff]  ;;  %vm1255_vm11 = vcmask 900096  }
 0x4df   : > { %4362 = vmatpush2.msra.mxu1 %v629_v6  ;;  %v7276_v4 = vpop.permute.xlu0 %2597  ;;  %v943_v30 = vsel %vm940_vm12, %v8908_v36, %v8907_v15  ;;  %v8910_v0 = vld [vmem:[#allocation67_spill] sm:$0xff] }
 0x4e0   : > { %4363 = vmatprep.subr.mxu1 %v2387_v7  ;;  %v7278_v3 = vpop.permute.xlu1 %2599  ;;  %v8924_v36 = vld [vmem:[#allocation99_spill] sm:$0xff] }
 0x4e1   : > { %4364 = vmatpush2.msra.mxu1 %v628_v10  ;;  %2909 = vrot.lane.b32.xlu0 %v7283_v29, %s8585_s20  ;;  %v942_v10 = vsel %vm940_vm12, %v8910_v0, %v8909_v61  ;;  %v2607_v15 = vsel %vm850_vm14, %v7276_v4, %v7278_v3  ;;  %v8926_v61 = vld [vmem:[#allocation64_spill] sm:$0xff]  ;;  %v8927_v0 = vld [vmem:[#allocation63_spill] sm:$0xff]  ;;  %v2605_v3 = vsel %vm850_vm14, %v7236_v62, %v7238_v28 }
 0x4e2   : > { %4365 = vmatprep.subr.mxu1 %v2386_v46  ;;  %2911 = vrot.lane.b32.xlu1 %v7290_v38, %s8585_s20  ;;  %s9044_s20 = smov 96  }
 0x4e3   : > { %4366 = vmatpush2.msra.mxu1 %v627_v43  ;;  %v7300_v57 = vpop.permute.xlu0 %2601  ;;  %v8912_v43 = vld [vmem:[#allocation31_spill] sm:$0xff] }
 0x4e4   : > { %4367 = vmatprep.subr.mxu1 %v2385_v51  ;;  %v7302_v60 = vpop.permute.xlu1 %2603  ;;  %v941_v45 = vsel %vm940_vm12, %v8912_v43, %v8911_v41  ;;  %v8929_v41 = vld [vmem:[#allocation27_spill] sm:$0xff]  ;;  %v2564_v43 = vsel %vm805_vm15, %v7216_v25, %v7218_v19  ;;  %v2562_v19 = vsel %vm805_vm15, %v7180_v35, %v7182_v50 }
 0x4e5   : > { %4368 = vmatpush2.msra.mxu1 %v626_v13  ;;  %2941 = vrot.lane.b32.xlu0 %v7307_v26, %s8588_s19  ;;  %v8914_v13 = vld [vmem:[#allocation132_spill] sm:$0xff]  ;;  %v2608_v48 = vsel %vm850_vm14, %v7300_v57, %v7302_v60  ;;  %v2606_v60 = vsel %vm850_vm14, %v7256_v2, %v7258_v54 }
 0x4e6   : > { %4370 = vmatmul.mubr.f32.vlgmr.msra.gmra.mxu1 %v3937_v24  ;;  %2943 = vrot.lane.b32.xlu1 %v7311_v63, %s8588_s19  ;;  %v899_v24 = vsel %vm895_vm13, %v8914_v13, %v8913_v8  ;;  %v2563_v8 = vsel %vm805_vm15, %v7196_v27, %v7198_v16  ;;  %v8932_v13 = vld [vmem:[#allocation97_spill] sm:$0xff]  ;;  %v2561_v16 = vsel %vm805_vm15, %v7164_v31, %v7166_v47 }
 0x4e7   : > { %v7315_v49 = vpop.permute.xlu0 %2633 }
 0x4e8   : > { %v7317_v20 = vpop.permute.xlu1 %2635 }
 0x4e9   : > { %2945 = vrot.lane.b32.xlu0 %v7319_v1, %s8588_s19 }
 0x4ea   : > { %3041 = vrot.lane.b32.xlu1 %v7283_v29, %s8637_s1 }
 0x4eb   : > { %v7325_v42 = vpop.permute.xlu0 %2637 }
 0x4ec   : > { %v7327_v22 = vpop.permute.xlu1 %2639 }
 0x4ed   : > { %3043 = vrot.lane.b32.xlu0 %v7290_v38, %s8637_s1 }
 0x4ee   : > { %3037 = vrot.lane.b32.xlu1 %v7331_v23, %s8637_s1 }
 0x4ef   : > { %v2642_v56 = vpop.permute.xlu0 %2641 }
 0x4f0   : > { %v2644_v21 = vpop.permute.xlu1 %2643 }
 0x4f1   : > { %3039 = vrot.lane.b32.xlu0 %v7335_v44, %s8637_s1 }
 0x4f2   : > { %3033 = vrot.lane.b32.xlu1 %v7319_v1, %s8637_s1 }
 0x4f3   : > { %v2646_v39 = vpop.permute.xlu0 %2645 }
 0x4f4   : > { %v2648_v34 = vpop.permute.xlu1 %2647 }
 0x4f5   : > { %3035 = vrot.lane.b32.xlu0 %v7341_v17, %s8637_s1  ;;  %v2652_v11 = vsel %vm895_vm13, %v2646_v39, %v2648_v34  ;;  %v2650_v39 = vsel %vm895_vm13, %v7325_v42, %v7327_v22  ;;  %v8917_v34 = vld [vmem:[#allocation66_spill] sm:$0xff] }
 0x4f6   : > { %3029 = vrot.lane.b32.xlu1 %v7307_v26, %s8637_s1 }
 0x4f7   : > { %v2678_v18 = vpop.permute.xlu0 %2677 }
 0x4f8   : > { %v2680_v40 = vpop.permute.xlu1 %2679 }
 0x4f9   : > { %3031 = vrot.lane.b32.xlu0 %v7311_v63, %s8637_s1  ;;  %v2693_v32 = vsel %vm940_vm12, %v2678_v18, %v2680_v40  ;;  %v2651_v40 = vsel %vm895_vm13, %v2642_v56, %v2644_v21  ;;  %v2649_v21 = vsel %vm895_vm13, %v7315_v49, %v7317_v20  ;;  %s8938_s1 = smov 106  }
 0x4fa   : > { %2997 = vrot.lane.b32.xlu1 %v7283_v29, %s8634_s0 }
 0x4fb   : > { %v2682_v58 = vpop.permute.xlu0 %2681 }
 0x4fc   : > { %v2684_v14 = vpop.permute.xlu1 %2683 }
 0x4fd   : > { %2999 = vrot.lane.b32.xlu0 %v7290_v38, %s8634_s0  ;;  %v2694_v7 = vsel %vm940_vm12, %v2682_v58, %v2684_v14  ;;  %v8915_v58 = vld [vmem:[#allocation101_spill] sm:$0xff]  ;;  %v8916_v14 = vld [vmem:[#allocation100_spill] sm:$0xff] }
 0x4fe   : > { %2993 = vrot.lane.b32.xlu1 %v7331_v23, %s8634_s0 }
 0x4ff   : > { %v2686_v55 = vpop.permute.xlu0 %2685 }
 0x500   : > { %v2688_v5 = vpop.permute.xlu1 %2687 }
 0x501   : > { %2995 = vrot.lane.b32.xlu0 %v7335_v44, %s8634_s0  ;;  %v2695_v59 = vsel %vm940_vm12, %v2686_v55, %v2688_v5  ;;  %v898_v55 = vsel %vm895_vm13, %v8916_v14, %v8915_v58  ;;  %v8934_v58 = vld [vmem:[#allocation62_spill] sm:$0xff]  ;;  %v8935_v14 = vld [vmem:[#allocation61_spill] sm:$0xff] }
 0x502   : > { %2989 = vrot.lane.b32.xlu1 %v7319_v1, %s8634_s0 }
 0x503   : > { %v2690_v37 = vpop.permute.xlu0 %2689 }
 0x504   : > { %v2692_v33 = vpop.permute.xlu1 %2691 }
 0x505   : > { %2991 = vrot.lane.b32.xlu0 %v7341_v17, %s8634_s0  ;;  %v2696_v9 = vsel %vm940_vm12, %v2690_v37, %v2692_v33  ;;  %v8918_v37 = vld [vmem:[#allocation65_spill] sm:$0xff]  ;;  %vm1210_vm12 = vcmask 908288  }
 0x506   : > { %2985 = vrot.lane.b32.xlu1 %v7307_v26, %s8634_s0  ;;  %4388 = vmatprep.subr.mxu0 %v2696_v9  ;;  %v897_v33 = vsel %vm895_vm13, %v8918_v37, %v8917_v34  ;;  %v8919_v9 = vld [vmem:[#allocation30_spill] sm:$0xff]  ;;  %v8937_v34 = vld [vmem:[#allocation25_spill] sm:$0xff] }
 0x507   : > { %4389 = vmatpush1.msra.mxu0 %v944_v52  ;;  %v7367_v53 = vpop.permute.xlu0 %2721  ;;  %v896_v42 = vsel %vm895_vm13, %v8920_v12, %v8919_v9  ;;  %v8922_v52 = vld [vmem:[#allocation131_spill] sm:$0xff]  ;;  %vm1165_vm13 = vcmask 916480  }
 0x508   : > { %4390 = vmatprep.subr.mxu0 %v2695_v59  ;;  %v7373_v6 = vpop.permute.xlu1 %2723  ;;  %v8923_v59 = vld [vmem:[#allocation130_spill] sm:$0xff] }
 0x509   : > { %4391 = vmatpush1.msra.mxu0 %v943_v30  ;;  %2987 = vrot.lane.b32.xlu0 %v7311_v63, %s8634_s0  ;;  %s8921_s0 = smov 105   ;;  %v854_v49 = vsel %vm850_vm14, %v8923_v59, %v8922_v52  ;;  %v8925_v30 = vld [vmem:[#allocation98_spill] sm:$0xff] }
 0x50a   : > { %2953 = vrot.lane.b32.xlu1 %v7283_v29, %s8588_s19  ;;  %4392 = vmatprep.subr.mxu0 %v2694_v7  ;;  %v853_v7 = vsel %vm850_vm14, %v8925_v30, %v8924_v36  ;;  %v3940_v30 = vld [vmem:[#allocation5 + $0x18] sm:$0xff] }
 0x50b   : > { %4393 = vmatpush1.msra.mxu0 %v942_v10  ;;  %v7383_v46 = vpop.permute.xlu0 %2725  ;;  %v852_v10 = vsel %vm850_vm14, %v8927_v0, %v8926_v61  ;;  %4452 = vmatprep.mubr.f32.mxu0 %v3940_v30  ;;  %v5321_v61 = vmov -inf  }
 0x50c   : > { %4394 = vmatprep.subr.mxu0 %v2693_v32  ;;  %v7389_v51 = vpop.permute.xlu1 %2727  ;;  %v8928_v32 = vld [vmem:[#allocation28_spill] sm:$0xff]  ;;  %4733 = vst.msk [vmem:[#allocation3] sm:$0xf] %vm4732_vm2, %v5321_v61  ;;  %4747 = vst.msk [vmem:[#allocation3 + $0x8] sm:$0xf] %vm4732_vm2, %v5321_v61  ;;  %vm1390_vm2 = vcmask 875520  }
 0x50d   : > { %4395 = vmatpush1.msra.mxu0 %v941_v45  ;;  %2955 = vrot.lane.b32.xlu0 %v7290_v38, %s8588_s19  ;;  %v851_v2 = vsel %vm850_vm14, %v8929_v41, %v8928_v32  ;;  %v8930_v45 = vld [vmem:[#allocation129_spill] sm:$0xff]  ;;  %4735 = vst.msk [vmem:[#allocation3 + $0x4] sm:$0xf] %vm4734_vm3, %v5321_v61  ;;  %4748 = vst.msk [vmem:[#allocation3 + $0xc] sm:$0xf] %vm4734_vm3, %v5321_v61  ;;  %vm1480_vm14 = vcmask 859136  }
 0x50e   : > { %2949 = vrot.lane.b32.xlu1 %v7331_v23, %s8588_s19  ;;  %4396 = vmatprep.subr.mxu0 %v2652_v11  ;;  %v8931_v11 = vld [vmem:[#allocation128_spill] sm:$0xff]  ;;  %vm1345_vm3 = vcmask 883712  }
 0x50f   : > { %4397 = vmatpush1.msra.mxu0 %v899_v24  ;;  %v7399_v18 = vpop.permute.xlu0 %2729  ;;  %v809_v62 = vsel %vm805_vm15, %v8931_v11, %v8930_v45  ;;  %v8933_v24 = vld [vmem:[#allocation96_spill] sm:$0xff]  ;;  %v8942_v45 = vld [vmem:[#allocation110_spill] sm:$0xff] }
 0x510   : > { %4398 = vmatprep.subr.mxu0 %v2651_v40  ;;  %v7405_v5 = vpop.permute.xlu1 %2731  ;;  %v808_v40 = vsel %vm805_vm15, %v8933_v24, %v8932_v13  ;;  %v8943_v13 = vld [vmem:[#allocation76_spill] sm:$0xff]  ;;  %v8944_v24 = vld [vmem:[#allocation75_spill] sm:$0xff] }
 0x511   : > { %4399 = vmatpush1.msra.mxu0 %v898_v55  ;;  %2951 = vrot.lane.b32.xlu0 %v7335_v44, %s8588_s19  ;;  %v807_v55 = vsel %vm805_vm15, %v8935_v14, %v8934_v58  ;;  %v8945_v14 = vld [vmem:[#allocation40_spill] sm:$0xff] }
 0x512   : > { %2947 = vrot.lane.b32.xlu1 %v7341_v17, %s8588_s19  ;;  %4400 = vmatprep.subr.mxu0 %v2650_v39  ;;  %v8936_v39 = vld [vmem:[#allocation26_spill] sm:$0xff]  ;;  %s9027_s19 = smov 104  }
 0x513   : > { %4401 = vmatpush1.msra.mxu0 %v897_v33  ;;  %v7417_v56 = vpop.permute.xlu0 %2733  ;;  %v806_v37 = vsel %vm805_vm15, %v8937_v34, %v8936_v39  ;;  %vm1435_vm15 = vcmask 867328  }
 0x514   : > { %4402 = vmatprep.subr.mxu0 %v2649_v21  ;;  %v7425_v22 = vpop.permute.xlu1 %2735 }
 0x515   : > { %4403 = vmatpush1.msra.mxu0 %v896_v42  ;;  %3217 = vrot.lane.b32.xlu0 %v7283_v29, %s8921_s0 }
 0x516   : > { %3219 = vrot.lane.b32.xlu1 %v7290_v38, %s8921_s0  ;;  %4404 = vmatprep.subr.mxu0 %v2608_v48 }
 0x517   : > { %4405 = vmatpush1.msra.mxu0 %v854_v49  ;;  %v7437_v20 = vpop.permute.xlu0 %2765 }
 0x518   : > { %4406 = vmatprep.subr.mxu0 %v2607_v15  ;;  %v7445_v57 = vpop.permute.xlu1 %2767 }
 0x519   : > { %4407 = vmatpush1.msra.mxu0 %v853_v7  ;;  %3213 = vrot.lane.b32.xlu0 %v7331_v23, %s8921_s0 }
 0x51a   : > { %3215 = vrot.lane.b32.xlu1 %v7335_v44, %s8921_s0  ;;  %4408 = vmatprep.subr.mxu0 %v2606_v60 }
 0x51b   : > { %4409 = vmatpush1.msra.mxu0 %v852_v10  ;;  %v7457_v4 = vpop.permute.xlu0 %2769  ;;  %v8939_v10 = vld [vmem:[#allocation143_spill] sm:$0xff] }
 0x51c   : > { %4410 = vmatprep.subr.mxu0 %v2605_v3  ;;  %v7465_v54 = vpop.permute.xlu1 %2771  ;;  %v8940_v3 = vld [vmem:[#allocation142_spill] sm:$0xff] }
 0x51d   : > { %4411 = vmatpush1.msra.mxu0 %v851_v2  ;;  %3209 = vrot.lane.b32.xlu0 %v7319_v1, %s8921_s0  ;;  %v1124_v32 = vsel %vm1120_vm4, %v8940_v3, %v8939_v10  ;;  %v8954_v10 = vld [vmem:[#allocation38_spill] sm:$0xff]  ;;  %v8955_v3 = vld [vmem:[#allocation37_spill] sm:$0xff] }
 0x51e   : > { %3211 = vrot.lane.b32.xlu1 %v7341_v17, %s8921_s0  ;;  %4412 = vmatprep.subr.mxu0 %v2564_v43  ;;  %v8941_v43 = vld [vmem:[#allocation111_spill] sm:$0xff] }
 0x51f   : > { %4413 = vmatpush1.msra.mxu0 %v809_v62  ;;  %v7477_v28 = vpop.permute.xlu0 %2773  ;;  %v1123_v11 = vsel %vm1120_vm4, %v8942_v45, %v8941_v43  ;;  %v8957_v43 = vld [vmem:[#allocation138_spill] sm:$0xff] }
 0x520   : > { %4414 = vmatprep.subr.mxu0 %v2563_v8  ;;  %v7485_v25 = vpop.permute.xlu1 %2775 }
 0x521   : > { %4415 = vmatpush1.msra.mxu0 %v808_v40  ;;  %3205 = vrot.lane.b32.xlu0 %v7307_v26, %s8921_s0  ;;  %v1122_v40 = vsel %vm1120_vm4, %v8944_v24, %v8943_v13  ;;  %v8958_v13 = vld [vmem:[#allocation107_spill] sm:$0xff] }
 0x522   : > { %3207 = vrot.lane.b32.xlu1 %v7311_v63, %s8921_s0  ;;  %4416 = vmatprep.subr.mxu0 %v2562_v19 }
 0x523   : > { %4417 = vmatpush1.msra.mxu0 %v807_v55  ;;  %v7497_v27 = vpop.permute.xlu0 %2777  ;;  %v8946_v55 = vld [vmem:[#allocation39_spill] sm:$0xff] }
 0x524   : > { %4418 = vmatprep.subr.mxu0 %v2561_v16  ;;  %v7505_v35 = vpop.permute.xlu1 %2779  ;;  %v1121_v16 = vsel %vm1120_vm4, %v8946_v55, %v8945_v14  ;;  %v3957_v55 = vld [vmem:[#allocation5 + $0xa0] sm:$0xff] }
 0x525   : > { %4419 = vmatpush1.msra.mxu0 %v806_v37  ;;  %3173 = vrot.lane.b32.xlu0 %v7283_v29, %s8938_s1  ;;  %v8948_v37 = vld [vmem:[#allocation141_spill] sm:$0xff] }
 0x526   : > { %3175 = vrot.lane.b32.xlu1 %v7290_v38, %s8938_s1 }
 0x527   : > { %v7511_v50 = vpop.permute.xlu0 %2809 }
 0x528   : > { %v7513_v33 = vpop.permute.xlu1 %2811 }
 0x529   : > { %3169 = vrot.lane.b32.xlu0 %v7331_v23, %s8938_s1 }
 0x52a   : > { %3171 = vrot.lane.b32.xlu1 %v7335_v44, %s8938_s1 }
 0x52b   : > { %v7519_v31 = vpop.permute.xlu0 %2813 }
 0x52c   : > { %v7521_v47 = vpop.permute.xlu1 %2815 }
 0x52d   : > { %3165 = vrot.lane.b32.xlu0 %v7319_v1, %s8938_s1 }
 0x52e   : > { %3167 = vrot.lane.b32.xlu1 %v7341_v17, %s8938_s1 }
 0x52f   : > { %v7527_v21 = vpop.permute.xlu0 %2817 }
 0x530   : > { %v7529_v9 = vpop.permute.xlu1 %2819 }
 0x531   : > { %3161 = vrot.lane.b32.xlu0 %v7307_v26, %s8938_s1 }
 0x532   : > { %3163 = vrot.lane.b32.xlu1 %v7311_v63, %s8938_s1 }
 0x533   : > { %v2822_v12 = vpop.permute.xlu0 %2821 }
 0x534   : > { %v2824_v42 = vpop.permute.xlu1 %2823 }
 0x535   : > { %3129 = vrot.lane.b32.xlu0 %v7283_v29, %s8679_s8  ;;  %v2828_v34 = vsel %vm1075_vm5, %v2822_v12, %v2824_v42  ;;  %v7602_v42 = vld [vmem:[%s5435_s26] sm:$0xff]  ;;  %s8981_s26 = smov 102  }
 0x536   : > { %3131 = vrot.lane.b32.xlu1 %v7290_v38, %s8679_s8 }
 0x537   : > { %v2854_v48 = vpop.permute.xlu0 %2853 }
 0x538   : > { %v2856_v52 = vpop.permute.xlu1 %2855 }
 0x539   : > { %3125 = vrot.lane.b32.xlu0 %v7331_v23, %s8679_s8  ;;  %v2869_v58 = vsel %vm1120_vm4, %v2854_v48, %v2856_v52  ;;  %v2827_v52 = vsel %vm1075_vm5, %v7527_v21, %v7529_v9  ;;  %v8953_v21 = vld [vmem:[#allocation73_spill] sm:$0xff] }
 0x53a   : > { %3127 = vrot.lane.b32.xlu1 %v7335_v44, %s8679_s8 }
 0x53b   : > { %v2858_v59 = vpop.permute.xlu0 %2857 }
 0x53c   : > { %v2860_v49 = vpop.permute.xlu1 %2859 }
 0x53d   : > { %3121 = vrot.lane.b32.xlu0 %v7319_v1, %s8679_s8  ;;  %v2870_v8 = vsel %vm1120_vm4, %v2858_v59, %v2860_v49  ;;  %v8949_v59 = vld [vmem:[#allocation140_spill] sm:$0xff] }
 0x53e   : > { %3123 = vrot.lane.b32.xlu1 %v7341_v17, %s8679_s8  ;;  %v1079_v49 = vsel %vm1075_vm5, %v8949_v59, %v8948_v37 }
 0x53f   : > { %v2862_v15 = vpop.permute.xlu0 %2861 }
 0x540   : > { %v2864_v36 = vpop.permute.xlu1 %2863 }
 0x541   : > { %3117 = vrot.lane.b32.xlu0 %v7307_v26, %s8679_s8  ;;  %v2871_v2 = vsel %vm1120_vm4, %v2862_v15, %v2864_v36  ;;  %v8950_v15 = vld [vmem:[#allocation109_spill] sm:$0xff]  ;;  %v8951_v36 = vld [vmem:[#allocation108_spill] sm:$0xff] }
 0x542   : > { %3119 = vrot.lane.b32.xlu1 %v7311_v63, %s8679_s8  ;;  %v1078_v30 = vsel %vm1075_vm5, %v8951_v36, %v8950_v15  ;;  %s5322_s8 = smov 1   ;;  %v8964_v15 = vld [vmem:[#allocation137_spill] sm:$0xff]  ;;  %v4749_v36 = vrot.slane %v7602_v42, 4 }
 0x543   : > { %v2866_v7 = vpop.permute.xlu0 %2865 }
 0x544   : > { %v2868_v60 = vpop.permute.xlu1 %2867 }
 0x545   : > { %3085 = vrot.lane.b32.xlu0 %v7283_v29, %s8640_s2  ;;  %v2872_v0 = vsel %vm1120_vm4, %v2866_v7, %v2868_v60  ;;  %v2826_v7 = vsel %vm1075_vm5, %v7519_v31, %v7521_v47  ;;  %v8952_v60 = vld [vmem:[#allocation74_spill] sm:$0xff]  ;;  %v1076_v31 = vsel %vm1075_vm5, %v8955_v3, %v8954_v10  ;;  %v8969_v10 = vld [vmem:[#allocation69_spill] sm:$0xff]  ;;  %vm1660_vm4 = vcmask 826368  }
 0x546   : > { %3087 = vrot.lane.b32.xlu1 %v7290_v38, %s8640_s2  ;;  %4420 = vmatprep.subr.mxu0 %v2872_v0  ;;  %v1077_v9 = vsel %vm1075_vm5, %v8953_v21, %v8952_v60  ;;  %v2825_v0 = vsel %vm1075_vm5, %v7511_v50, %v7513_v33  ;;  %v3948_v33 = vld [vmem:[#allocation5 + $0x58] sm:$0xff]  ;;  %vm4742_vm5 = vcmask 1043464  }
 0x547   : > { %4421 = vmatpush2.msra.mxu0 %v1124_v32  ;;  %v7559_v41 = vpop.permute.xlu0 %2897  ;;  %v2784_v32 = vsel %vm1030_vm8, %v7497_v27, %v7505_v35  ;;  %4375 = vmatprep.mubr.f32.mxu1 %v3948_v33  ;;  %v8959_v27 = vld [vmem:[#allocation106_spill] sm:$0xff] }
 0x548   : > { %4422 = vmatprep.subr.mxu0 %v2871_v2  ;;  %v7565_v62 = vpop.permute.xlu1 %2899  ;;  %v8956_v2 = vld [vmem:[#allocation139_spill] sm:$0xff]  ;;  %v1033_v35 = vsel %vm1030_vm8, %v8959_v27, %v8958_v13  ;;  %v8971_v3 = vld [vmem:[#allocation150_spill] sm:$0xff] }
 0x549   : > { %4423 = vmatpush2.msra.mxu0 %v1123_v11  ;;  %3081 = vrot.lane.b32.xlu0 %v7331_v23, %s8640_s2  ;;  %v1034_v50 = vsel %vm1030_vm8, %v8957_v43, %v8956_v2  ;;  %v2783_v11 = vsel %vm1030_vm8, %v7477_v28, %v7485_v25  ;;  %v8960_v28 = vld [vmem:[#allocation72_spill] sm:$0xff]  ;;  %v8961_v25 = vld [vmem:[#allocation71_spill] sm:$0xff]  ;;  %v2737_v2 = vsel %vm985_vm9, %v7367_v53, %v7373_v6  ;;  %v8972_v43 = vld [vmem:[#allocation34_spill] sm:$0xff] }
 0x54a   : > { %3083 = vrot.lane.b32.xlu1 %v7335_v44, %s8640_s2  ;;  %4424 = vmatprep.subr.mxu0 %v2870_v8  ;;  %v3947_v8 = vld [vmem:[#allocation5 + $0x50] sm:$0xff]  ;;  %v1032_v14 = vsel %vm1030_vm8, %v8961_v25, %v8960_v28  ;;  %v8975_v13 = vld [vmem:[#allocation118_spill] sm:$0xff] }
 0x54b   : > { %4425 = vmatpush2.msra.mxu0 %v1122_v40  ;;  %v7575_v19 = vpop.permute.xlu0 %2901  ;;  %4376 = vmatmul.mubr.f32.gmra.mxu1 %v3947_v8  ;;  %v2782_v40 = vsel %vm1030_vm8, %v7457_v4, %v7465_v54  ;;  %v8962_v4 = vld [vmem:[#allocation36_spill] sm:$0xff]  ;;  %v8963_v54 = vld [vmem:[#allocation35_spill] sm:$0xff] }
 0x54c   : > { %4426 = vmatprep.subr.mxu0 %v2869_v58  ;;  %v7581_v39 = vpop.permute.xlu1 %2903  ;;  %v3958_v58 = vld [vmem:[#allocation5 + $0xa8] sm:$0xff]  ;;  %v1031_v37 = vsel %vm1030_vm8, %v8963_v54, %v8962_v4  ;;  %v8974_v8 = vld [vmem:[#allocation119_spill] sm:$0xff] }
 0x54d   : > { %4427 = vmatpush2.msra.mxu0 %v1121_v16  ;;  %3393 = vrot.lane.b32.xlu0 %v7283_v29, %s8947_s27  ;;  %v1303_v27 = vsel %vm1300_vm10, %v8975_v13, %v8974_v8  ;;  %v8980_v4 = vld [vmem:[#allocation47_spill] sm:$0xff] }
 0x54e   : > { %3395 = vrot.lane.b32.xlu1 %v7290_v38, %s8947_s27  ;;  %4428 = vmatprep.subr.mxu0 %v2828_v34  ;;  %v2781_v34 = vsel %vm1030_vm8, %v7437_v20, %v7445_v57  ;;  %v8965_v20 = vld [vmem:[#allocation136_spill] sm:$0xff]  ;;  %vm4743_vm8 = vcmask 7172  }
 0x54f   : > { %4429 = vmatpush2.msra.mxu0 %v1079_v49  ;;  %v7591_v48 = vpop.permute.xlu0 %2905  ;;  %4381 = vmatprep.mubr.f32.mxu1 %v3958_v58  ;;  %v2740_v49 = vsel %vm985_vm9, %v7417_v56, %v7425_v22  ;;  %v989_v57 = vsel %vm985_vm9, %v8965_v20, %v8964_v15  ;;  %v8966_v56 = vld [vmem:[#allocation105_spill] sm:$0xff]  ;;  %v8967_v22 = vld [vmem:[#allocation104_spill] sm:$0xff]  ;;  %v8977_v58 = vld [vmem:[#allocation83_spill] sm:$0xff] }
 0x550   : > { %4430 = vmatprep.subr.mxu0 %v2827_v52  ;;  %v7599_v12 = vpop.permute.xlu1 %2907  ;;  %4382 = vmatmul.mubr.f32.gmra.mxu1 %v3957_v55  ;;  %v3942_v52 = vld [vmem:[#allocation5 + $0x28] sm:$0xff]  ;;  %v988_v60 = vsel %vm985_vm9, %v8967_v22, %v8966_v56 }
 0x551   : > { %4431 = vmatpush2.msra.mxu0 %v1078_v30  ;;  %4736 = vrot.lane.b32.xlu0 %v7602_v42, %s5322_s8  ;;  %v2738_v42 = vsel %vm985_vm9, %v7383_v46, %v7389_v51  ;;  %v8973_v46 = vld [vmem:[#allocation33_spill] sm:$0xff]  ;;  %v8983_v15 = vld [vmem:[#allocation148_spill] sm:$0xff] }
 0x552   : > { %3077 = vrot.lane.b32.xlu1 %v7319_v1, %s8640_s2  ;;  %4432 = vmatprep.subr.mxu0 %v2826_v7  ;;  %v2739_v7 = vsel %vm985_vm9, %v7399_v18, %v7405_v5  ;;  %v8970_v5 = vld [vmem:[#allocation151_spill] sm:$0xff]  ;;  %v986_v51 = vsel %vm985_vm9, %v8973_v46, %v8972_v43  ;;  %v8985_v56 = vld [vmem:[#allocation116_spill] sm:$0xff] }
 0x553   : > { %4433 = vmatpush2.msra.mxu0 %v1077_v9  ;;  %v7614_v61 = vpop.permute.xlu0 %2909  ;;  %4535 = vmatprep.mubr.f32.mxu1 %v3942_v52  ;;  %v8982_v52 = vld [vmem:[#allocation149_spill] sm:$0xff] }
 0x554   : > { %4434 = vmatprep.subr.mxu0 %v2825_v0  ;;  %v7622_v47 = vpop.permute.xlu1 %2911  ;;  %v8968_v0 = vld [vmem:[#allocation70_spill] sm:$0xff]  ;;  %v1259_v20 = vsel %vm1255_vm11, %v8983_v15, %v8982_v52  ;;  %v2915_v15 = vsel %vm1165_vm13, %v7591_v48, %v7599_v12 }
 0x555   : > { %4435 = vmatpush2.msra.mxu0 %v1076_v31  ;;  %3079 = vrot.lane.b32.xlu0 %v7341_v17, %s8640_s2  ;;  %v987_v18 = vsel %vm985_vm9, %v8969_v10, %v8968_v0  ;;  %v1304_v31 = vsel %vm1300_vm10, %v8971_v3, %v8970_v5  ;;  %v8987_v0 = vld [vmem:[#allocation81_spill] sm:$0xff]  ;;  %vm4739_vm9 = vcmask 7168  }
 0x556   : > { %3389 = vrot.lane.b32.xlu1 %v7331_v23, %s8947_s27  ;;  %4436 = vmatprep.subr.mxu0 %v2784_v32 }
 0x557   : > { %4437 = vmatpush2.msra.mxu0 %v1034_v50  ;;  %v7634_v45 = vpop.permute.xlu0 %2941 }
 0x558   : > { %4438 = vmatprep.subr.mxu0 %v2783_v11  ;;  %v7642_v24 = vpop.permute.xlu1 %2943  ;;  %v3939_v11 = vld [vmem:[#allocation5 + $0x10] sm:$0xff] }
 0x559   : > { %4439 = vmatpush2.msra.mxu0 %v1033_v35  ;;  %3391 = vrot.lane.b32.xlu0 %v7335_v44, %s8947_s27 }
 0x55a   : > { %3073 = vrot.lane.b32.xlu1 %v7307_v26, %s8640_s2  ;;  %4440 = vmatprep.subr.mxu0 %v2782_v40  ;;  %v8976_v40 = vld [vmem:[#allocation84_spill] sm:$0xff] }
 0x55b   : > { %4441 = vmatpush2.msra.mxu0 %v1032_v14  ;;  %v7654_v16 = vpop.permute.xlu0 %2945  ;;  %v1302_v28 = vsel %vm1300_vm10, %v8977_v58, %v8976_v40  ;;  %v8994_v58 = vld [vmem:[#allocation80_spill] sm:$0xff] }
 0x55c   : > { %4442 = vmatprep.subr.mxu0 %v2781_v34  ;;  %v3042_v59 = vpop.permute.xlu1 %3041  ;;  %v8979_v34 = vld [vmem:[#allocation48_spill] sm:$0xff] }
 0x55d   : > { %4443 = vmatpush2.msra.mxu0 %v1031_v37  ;;  %3075 = vrot.lane.b32.xlu0 %v7311_v63, %s8640_s2  ;;  %s8978_s2 = smov 93   ;;  %v1301_v54 = vsel %vm1300_vm10, %v8980_v4, %v8979_v34  ;;  %v2957_v34 = vsel %vm1210_vm12, %v7634_v45, %v7642_v24  ;;  %v8996_v4 = vld [vmem:[#allocation44_spill] sm:$0xff] }
 0x55e   : > { %3385 = vrot.lane.b32.xlu1 %v7319_v1, %s8947_s27  ;;  %4444 = vmatprep.subr.mxu0 %v2740_v49 }
 0x55f   : > { %4445 = vmatpush2.msra.mxu0 %v989_v57  ;;  %v3044_v30 = vpop.permute.xlu0 %3043 }
 0x560   : > { %4446 = vmatprep.subr.mxu0 %v2739_v7  ;;  %v3038_v21 = vpop.permute.xlu1 %3037  ;;  %v3048_v9 = vsel %vm1300_vm10, %v3042_v59, %v3044_v30  ;;  %v8984_v7 = vld [vmem:[#allocation117_spill] sm:$0xff] }
 0x561   : > { %4447 = vmatpush2.msra.mxu0 %v988_v60  ;;  %3387 = vrot.lane.b32.xlu0 %v7341_v17, %s8947_s27  ;;  %v1258_v22 = vsel %vm1255_vm11, %v8985_v56, %v8984_v7  ;;  %v2913_v56 = vsel %vm1165_vm13, %v7559_v41, %v7565_v62 }
 0x562   : > { %4750 = vrot.lane.b32.xlu1 %v4749_v36, %s5322_s8  ;;  %4448 = vmatprep.subr.mxu0 %v2738_v42  ;;  %v8986_v42 = vld [vmem:[#allocation82_spill] sm:$0xff]  ;;  %s258_s8 = sand.u32 1, %s5267_s22  }
 0x563   : > { %4471 = vmatprep.subr.mxu1 %v3048_v9  ;;  %4449 = vmatpush2.msra.mxu0 %v987_v18  ;;  %v3040_v32 = vpop.permute.xlu0 %3039  ;;  %v1257_v10 = vsel %vm1255_vm11, %v8987_v0, %v8986_v42 }
 0x564   : > { %4472 = vmatpush1.msra.mxu1 %v1304_v31  ;;  %4450 = vmatprep.subr.mxu0 %v2737_v2  ;;  %v3034_v50 = vpop.permute.xlu1 %3033  ;;  %v3047_v33 = vsel %vm1300_vm10, %v3038_v21, %v3040_v32  ;;  %v8988_v31 = vld [vmem:[#allocation46_spill] sm:$0xff]  ;;  %v8989_v32 = vld [vmem:[#allocation45_spill] sm:$0xff] }
 0x565   : > { %4451 = vmatpush2.msra.mxu0 %v986_v51  ;;  %3381 = vrot.lane.b32.xlu0 %v7307_v26, %s8947_s27  ;;  %v1256_v2 = vsel %vm1255_vm11, %v8989_v32, %v8988_v31  ;;  %v9012_v31 = vld [vmem:[#allocation169_spill] sm:$0xff]  ;;  %v9013_v32 = vld [vmem:[#allocation168_spill] sm:$0xff] }
 0x566   : > { %3383 = vrot.lane.b32.xlu1 %v7311_v63, %s8947_s27  ;;  %4473 = vmatprep.subr.mxu1 %v3047_v33  ;;  %v8991_v33 = vld [vmem:[#allocation146_spill] sm:$0xff] }
 0x567   : > { %4474 = vmatpush1.msra.mxu1 %v1303_v27  ;;  %v3036_v53 = vpop.permute.xlu0 %3035  ;;  %4453 = vmatmul.mubr.f32.vlgmr.msra.gmra.mxu0 %v3939_v11 }
 0x568   : > { %v3030_v6 = vpop.permute.xlu1 %3029  ;;  %v3046_v35 = vsel %vm1300_vm10, %v3034_v50, %v3036_v53  ;;  %v8990_v50 = vld [vmem:[#allocation147_spill] sm:$0xff] }
 0x569   : > { %3745 = vrot.lane.b32.xlu0 %v7283_v29, %s8978_s2  ;;  %4475 = vmatprep.subr.mxu1 %v3046_v35  ;;  %v1214_v11 = vsel %vm1210_vm12, %v8991_v33, %v8990_v50  ;;  %v8992_v53 = vld [vmem:[#allocation115_spill] sm:$0xff]  ;;  %v9015_v33 = vld [vmem:[#allocation166_spill] sm:$0xff] }
 0x56a   : > { %3747 = vrot.lane.b32.xlu1 %v7290_v38, %s8978_s2  ;;  %4476 = vmatpush1.msra.mxu1 %v1302_v28  ;;  %v8995_v28 = vld [vmem:[#allocation79_spill] sm:$0xff] }
 0x56b   : > { %v3032_v25 = vpop.permute.xlu0 %3031  ;;  %v9014_v50 = vld [vmem:[#allocation167_spill] sm:$0xff] }
 0x56c   : > { %v2998_v14 = vpop.permute.xlu1 %2997  ;;  %v3045_v55 = vsel %vm1300_vm10, %v3030_v6, %v3032_v25  ;;  %v8993_v6 = vld [vmem:[#allocation114_spill] sm:$0xff]  ;;  %v1212_v25 = vsel %vm1210_vm12, %v8995_v28, %v8994_v58  ;;  %v9018_v58 = vld [vmem:[#allocation163_spill] sm:$0xff]  ;;  %vm7929_vm10 = vmor %vm4743_vm8, %vm4742_vm5  ;;  %vm2200_vm5 = vcmask 728064   ;;  %vm1795_vm8 = vcmask 801792  }
 0x56d   : > { %3349 = vrot.lane.b32.xlu0 %v7283_v29, %s8981_s26  ;;  %4477 = vmatprep.subr.mxu1 %v3045_v55  ;;  %v1213_v35 = vsel %vm1210_vm12, %v8993_v6, %v8992_v53  ;;  %v9019_v28 = vld [vmem:[#allocation162_spill] sm:$0xff] }
 0x56e   : > { %3351 = vrot.lane.b32.xlu1 %v7290_v38, %s8981_s26  ;;  %4478 = vmatpush1.msra.mxu1 %v1301_v54  ;;  %v8997_v54 = vld [vmem:[#allocation43_spill] sm:$0xff] }
 0x56f   : > { %v3000_v37 = vpop.permute.xlu0 %2999 }
 0x570   : > { %v2994_v59 = vpop.permute.xlu1 %2993  ;;  %v3004_v49 = vsel %vm1255_vm11, %v2998_v14, %v3000_v37  ;;  %v1211_v37 = vsel %vm1210_vm12, %v8997_v54, %v8996_v4  ;;  %v9020_v4 = vld [vmem:[#allocation161_spill] sm:$0xff]  ;;  %v9021_v54 = vld [vmem:[#allocation160_spill] sm:$0xff] }
 0x571   : > { %3741 = vrot.lane.b32.xlu0 %v7331_v23, %s8978_s2  ;;  %4479 = vmatprep.subr.mxu1 %v3004_v49  ;;  %v9000_v49 = vld [vmem:[#allocation144_spill] sm:$0xff] }
 0x572   : > { %3743 = vrot.lane.b32.xlu1 %v7335_v44, %s8978_s2  ;;  %4480 = vmatpush1.msra.mxu1 %v1259_v20  ;;  %v9001_v20 = vld [vmem:[#allocation113_spill] sm:$0xff] }
 0x573   : > { %v2996_v57 = vpop.permute.xlu0 %2995 }
 0x574   : > { %v2990_v36 = vpop.permute.xlu1 %2989  ;;  %v3003_v30 = vsel %vm1255_vm11, %v2994_v59, %v2996_v57  ;;  %v8999_v59 = vld [vmem:[#allocation145_spill] sm:$0xff]  ;;  %v9002_v57 = vld [vmem:[#allocation112_spill] sm:$0xff] }
 0x575   : > { %3345 = vrot.lane.b32.xlu0 %v7331_v23, %s8981_s26  ;;  %4481 = vmatprep.subr.mxu1 %v3003_v30  ;;  %v1169_v45 = vsel %vm1165_vm13, %v9000_v49, %v8999_v59  ;;  %v9005_v30 = vld [vmem:[#allocation77_spill] sm:$0xff] }
 0x576   : > { %3347 = vrot.lane.b32.xlu1 %v7335_v44, %s8981_s26  ;;  %4482 = vmatpush1.msra.mxu1 %v1258_v22  ;;  %v9006_v22 = vld [vmem:[#allocation42_spill] sm:$0xff] }
 0x577   : > { %v2992_v60 = vpop.permute.xlu0 %2991 }
 0x578   : > { %v2986_v21 = vpop.permute.xlu1 %2985  ;;  %v3002_v9 = vsel %vm1255_vm11, %v2990_v36, %v2992_v60  ;;  %v1168_v36 = vsel %vm1165_vm13, %v9002_v57, %v9001_v20  ;;  %v9007_v60 = vld [vmem:[#allocation41_spill] sm:$0xff] }
 0x579   : > { %3737 = vrot.lane.b32.xlu0 %v7319_v1, %s8978_s2  ;;  %4483 = vmatprep.subr.mxu1 %v3002_v9  ;;  %v9009_v9 = vld [vmem:[#allocation172_spill] sm:$0xff] }
 0x57a   : > { %3739 = vrot.lane.b32.xlu1 %v7341_v17, %s8978_s2  ;;  %4484 = vmatpush1.msra.mxu1 %v1257_v10  ;;  %v9010_v10 = vld [vmem:[#allocation171_spill] sm:$0xff] }
 0x57b   : > { %v2988_v18 = vpop.permute.xlu0 %2987 }
 0x57c   : > { %v2954_v5 = vpop.permute.xlu1 %2953  ;;  %v3001_v3 = vsel %vm1255_vm11, %v2986_v21, %v2988_v18  ;;  %v1166_v21 = vsel %vm1165_vm13, %v9007_v60, %v9006_v22  ;;  %v9011_v18 = vld [vmem:[#allocation170_spill] sm:$0xff]  ;;  %vm2020_vm11 = vcmask 760832  }
 0x57d   : > { %3341 = vrot.lane.b32.xlu0 %v7319_v1, %s8981_s26  ;;  %4485 = vmatprep.subr.mxu1 %v3001_v3 }
 0x57e   : > { %3343 = vrot.lane.b32.xlu1 %v7341_v17, %s8981_s26  ;;  %4486 = vmatpush1.msra.mxu1 %v1256_v2  ;;  %v1482_v2 = vsel %vm1480_vm14, %v9013_v32, %v9012_v31 }
 0x57f   : > { %v2956_v43 = vpop.permute.xlu0 %2955 }
 0x580   : > { %v2950_v46 = vpop.permute.xlu1 %2949  ;;  %v2960_v51 = vsel %vm1210_vm12, %v2954_v5, %v2956_v43  ;;  %v1483_v5 = vsel %vm1480_vm14, %v9011_v18, %v9010_v10 }
 0x581   : > { %3733 = vrot.lane.b32.xlu0 %v7307_v26, %s8978_s2  ;;  %4487 = vmatprep.subr.mxu1 %v2960_v51 }
 0x582   : > { %3735 = vrot.lane.b32.xlu1 %v7311_v63, %s8978_s2  ;;  %4488 = vmatpush1.msra.mxu1 %v1214_v11  ;;  %v1481_v11 = vsel %vm1480_vm14, %v9015_v33, %v9014_v50  ;;  %v7917_v33 = vld [vmem:[#allocation2 + $0x40] sm:$0xff]  ;;  %s5048_s2 = sshll.u32 %s258_s8, 6 }
 0x583   : > { %v2952_v8 = vpop.permute.xlu0 %2951 }
 0x584   : > { %v2948_v13 = vpop.permute.xlu1 %2947  ;;  %v2959_v27 = vsel %vm1210_vm12, %v2950_v46, %v2952_v8 }
 0x585   : > { %3337 = vrot.lane.b32.xlu0 %v7307_v26, %s8981_s26  ;;  %4489 = vmatprep.subr.mxu1 %v2959_v27  ;;  %v2958_v40 = vsel %vm1210_vm12, %v7654_v16, %v2948_v13  ;;  %v2916_v16 = vsel %vm1165_vm13, %v7614_v61, %v7622_v47  ;;  %v2914_v61 = vsel %vm1165_vm13, %v7575_v19, %v7581_v39  ;;  %v9004_v47 = vld [vmem:[#allocation78_spill] sm:$0xff]  ;;  %v9008_v39 = vld [vmem:[#allocation173_spill] sm:$0xff]  ;;  %v9017_v27 = vld [vmem:[#allocation164_spill] sm:$0xff]  ;;  %vm1615_vm12 = vcmask 834560  }
 0x586   : > { %3339 = vrot.lane.b32.xlu1 %v7311_v63, %s8981_s26  ;;  %4490 = vmatpush1.msra.mxu1 %v1213_v35  ;;  %v1167_v48 = vsel %vm1165_vm13, %v9005_v30, %v9004_v47  ;;  %v1484_v42 = vsel %vm1480_vm14, %v9009_v9, %v9008_v39  ;;  %v9016_v13 = vld [vmem:[#allocation165_spill] sm:$0xff]  ;;  %vm1975_vm13 = vcmask 769024   ;;  %s8405_s26 = scalar_lea.vmem [#allocation8], %s5048_s2 }
 0x587   : > { %v3218_v14 = vpop.permute.xlu0 %3217  ;;  %4491 = vmatprep.subr.mxu1 %v2958_v40  ;;  %v1439_v53 = vsel %vm1435_vm15, %v9017_v27, %v9016_v13  ;;  %v9039_v13 = vld [vmem:[#allocation204_spill] sm:$0xff] }
 0x588   : > { %v3220_v55 = vpop.permute.xlu1 %3219  ;;  %4492 = vmatpush1.msra.mxu1 %v1212_v25  ;;  %v1438_v25 = vsel %vm1435_vm15, %v9019_v28, %v9018_v58 }
 0x589   : > { %3701 = vrot.lane.b32.xlu0 %v7283_v29, %s8998_s16  ;;  %4493 = vmatprep.subr.mxu1 %v2957_v34  ;;  %v3224_v19 = vsel %vm1480_vm14, %v3218_v14, %v3220_v55 }
 0x58a   : > { %3703 = vrot.lane.b32.xlu1 %v7290_v38, %s8998_s16  ;;  %4494 = vmatpush1.msra.mxu1 %v1211_v37  ;;  %v1437_v37 = vsel %vm1435_vm15, %v9021_v54, %v9020_v4  ;;  %v7948_v54 = vld [vmem:[#allocation2 + $0x78] sm:$0xff] }
 0x58b   : > { %v3214_v24 = vpop.permute.xlu0 %3213  ;;  %4495 = vmatprep.subr.mxu1 %v2916_v16 }
 0x58c   : > { %v3216_v52 = vpop.permute.xlu1 %3215  ;;  %4496 = vmatpush1.msra.mxu1 %v1169_v45  ;;  %v9022_v45 = vld [vmem:[#allocation159_spill] sm:$0xff] }
 0x58d   : > { %3305 = vrot.lane.b32.xlu0 %v7283_v29, %s9003_s17  ;;  %4497 = vmatprep.subr.mxu1 %v2915_v15  ;;  %v3223_v0 = vsel %vm1480_vm14, %v3214_v24, %v3216_v52  ;;  %v9023_v24 = vld [vmem:[#allocation158_spill] sm:$0xff] }
 0x58e   : > { %3307 = vrot.lane.b32.xlu1 %v7290_v38, %s9003_s17  ;;  %4498 = vmatpush1.msra.mxu1 %v1168_v36  ;;  %v1436_v52 = vsel %vm1435_vm15, %v9023_v24, %v9022_v45  ;;  %v9026_v36 = vld [vmem:[#allocation156_spill] sm:$0xff]  ;;  %v9046_v45 = vld [vmem:[#allocation202_spill] sm:$0xff] }
 0x58f   : > { %v3210_v12 = vpop.permute.xlu0 %3209  ;;  %4499 = vmatprep.subr.mxu1 %v2914_v61 }
 0x590   : > { %v3212_v7 = vpop.permute.xlu1 %3211  ;;  %4500 = vmatpush1.msra.mxu1 %v1167_v48  ;;  %v9028_v48 = vld [vmem:[#allocation155_spill] sm:$0xff] }
 0x591   : > { %3697 = vrot.lane.b32.xlu0 %v7331_v23, %s8998_s16  ;;  %4501 = vmatprep.subr.mxu1 %v2913_v56  ;;  %v3222_v3 = vsel %vm1480_vm14, %v3210_v12, %v3212_v7  ;;  %v9029_v12 = vld [vmem:[#allocation154_spill] sm:$0xff] }
 0x592   : > { %3699 = vrot.lane.b32.xlu1 %v7335_v44, %s8998_s16  ;;  %4502 = vmatpush1.msra.mxu1 %v1166_v21  ;;  %v1393_v7 = vsel %vm1390_vm2, %v9029_v12, %v9028_v48  ;;  %v9030_v21 = vld [vmem:[#allocation88_spill] sm:$0xff] }
 0x593   : > { %v3206_v41 = vpop.permute.xlu0 %3205  ;;  %4503 = vmatprep.subr.mxu1 %v3224_v19 }
 0x594   : > { %v3208_v62 = vpop.permute.xlu1 %3207  ;;  %4504 = vmatpush2.msra.mxu1 %v1484_v42  ;;  %v9032_v42 = vld [vmem:[#allocation52_spill] sm:$0xff] }
 0x595   : > { %3301 = vrot.lane.b32.xlu0 %v7331_v23, %s9003_s17  ;;  %4505 = vmatprep.subr.mxu1 %v3223_v0  ;;  %v3221_v51 = vsel %vm1480_vm14, %v3206_v41, %v3208_v62  ;;  %v9033_v41 = vld [vmem:[#allocation51_spill] sm:$0xff]  ;;  %vm1570_vm14 = vcmask 842752  }
 0x596   : > { %3303 = vrot.lane.b32.xlu1 %v7335_v44, %s9003_s17  ;;  %4506 = vmatpush2.msra.mxu1 %v1483_v5  ;;  %v1391_v62 = vsel %vm1390_vm2, %v9033_v41, %v9032_v42  ;;  %v9035_v5 = vld [vmem:[#allocation152_spill] sm:$0xff]  ;;  %v9052_v42 = vld [vmem:[#allocation199_spill] sm:$0xff]  ;;  %v9053_v41 = vld [vmem:[#allocation198_spill] sm:$0xff] }
 0x597   : > { %v3174_v43 = vpop.permute.xlu0 %3173  ;;  %4507 = vmatprep.subr.mxu1 %v3222_v3 }
 0x598   : > { %v3176_v46 = vpop.permute.xlu1 %3175  ;;  %4508 = vmatpush2.msra.mxu1 %v1482_v2  ;;  %v9036_v2 = vld [vmem:[#allocation121_spill] sm:$0xff] }
 0x599   : > { %3693 = vrot.lane.b32.xlu0 %v7319_v1, %s8998_s16  ;;  %4509 = vmatprep.subr.mxu1 %v3221_v51  ;;  %v3180_v8 = vsel %vm1435_vm15, %v3174_v43, %v3176_v46  ;;  %v9037_v43 = vld [vmem:[#allocation120_spill] sm:$0xff] }
 0x59a   : > { %3695 = vrot.lane.b32.xlu1 %v7341_v17, %s8998_s16  ;;  %4510 = vmatpush2.msra.mxu1 %v1481_v11  ;;  %v1348_v46 = vsel %vm1345_vm3, %v9037_v43, %v9036_v2  ;;  %v9056_v2 = vld [vmem:[#allocation197_spill] sm:$0xff]  ;;  %v9057_v43 = vld [vmem:[#allocation196_spill] sm:$0xff] }
 0x59b   : > { %v3170_v6 = vpop.permute.xlu0 %3169  ;;  %4511 = vmatprep.subr.mxu1 %v3180_v8  ;;  %v9038_v8 = vld [vmem:[#allocation205_spill] sm:$0xff] }
 0x59c   : > { %v3172_v35 = vpop.permute.xlu1 %3171  ;;  %4512 = vmatpush2.msra.mxu1 %v1439_v53 }
 0x59d   : > { %3297 = vrot.lane.b32.xlu0 %v7319_v1, %s9003_s17  ;;  %v3179_v40 = vsel %vm1435_vm15, %v3170_v6, %v3172_v35 }
 0x59e   : > { %3299 = vrot.lane.b32.xlu1 %v7341_v17, %s9003_s17  ;;  %4513 = vmatprep.subr.mxu1 %v3179_v40 }
 0x59f   : > { %4514 = vmatpush2.msra.mxu1 %v1438_v25  ;;  %v3166_v14 = vpop.permute.xlu0 %3165  ;;  %v7940_v25 = vld [vmem:[#allocation2 + $0x70] sm:$0xff] }
 0x5a0   : > { %v3168_v55 = vpop.permute.xlu1 %3167 }
 0x5a1   : > { %3689 = vrot.lane.b32.xlu0 %v7307_v26, %s8998_s16  ;;  %v3178_v34 = vsel %vm1435_vm15, %v3166_v14, %v3168_v55  ;;  %v9042_v55 = vld [vmem:[#allocation86_spill] sm:$0xff] }
 0x5a2   : > { %3691 = vrot.lane.b32.xlu1 %v7311_v63, %s8998_s16  ;;  %4515 = vmatprep.subr.mxu1 %v3178_v34  ;;  %v9043_v34 = vld [vmem:[#allocation85_spill] sm:$0xff]  ;;  %s4968_s16 = sshll.u32 %s8405_s26, 4  ;;  %s8413_s16 = int_to_ptr.vmem [resolvable:$true] %s4968_s16 }
 0x5a3   : > { %4516 = vmatpush2.msra.mxu1 %v1437_v37  ;;  %v3162_v16 = vpop.permute.xlu0 %3161  ;;  %v1347_v4 = vsel %vm1345_vm3, %v9043_v34, %v9042_v55  ;;  %v9063_v34 = vld [vmem:[#allocation265_spill] sm:$0xff] }
 0x5a4   : > { %v3164_v59 = vpop.permute.xlu1 %3163 }
 0x5a5   : > { %3293 = vrot.lane.b32.xlu0 %v7307_v26, %s9003_s17  ;;  %v3177_v49 = vsel %vm1435_vm15, %v3162_v16, %v3164_v59  ;;  %v9025_v26 = vld [vmem:[#allocation157_spill] sm:$0xff]  ;;  %vm1930_vm15 = vcmask 777216  }
 0x5a6   : > { %3295 = vrot.lane.b32.xlu1 %v7311_v63, %s9003_s17  ;;  %4517 = vmatprep.subr.mxu1 %v3177_v49  ;;  %v1394_v61 = vsel %vm1390_vm2, %v9026_v36, %v9025_v26  ;;  %v9045_v49 = vld [vmem:[#allocation203_spill] sm:$0xff]  ;;  %v9048_v36 = vld [vmem:[#allocation50_spill] sm:$0xff]  ;;  %s5066_s17 = sshll.u32 %s5385_s25, 8  ;;  %s8426_s25 = scalar_lea.sflag [#allocation7], %s258_s8 }
 0x5a7   : > { %4518 = vmatpush2.msra.mxu1 %v1436_v52  ;;  %v3130_v15 = vpop.permute.xlu0 %3129  ;;  %v1663_v24 = vsel %vm1660_vm4, %v9046_v45, %v9045_v49  ;;  %v3941_v26 = vld [vmem:[#allocation5 + $0x20] sm:$0xff]  ;;  %v9065_v45 = vld [vmem:[#allocation193_spill] sm:$0xff] }
 0x5a8   : > { %v3132_v20 = vpop.permute.xlu1 %3131 }
 0x5a9   : > { %3657 = vrot.lane.b32.xlu0 %v7283_v29, %s9024_s18  ;;  %v3136_v57 = vsel %vm1390_vm2, %v3130_v15, %v3132_v20  ;;  %v7960_v20 = vld [vmem:[#allocation2 + $0x60] sm:$0xff] }
 0x5aa   : > { %3659 = vrot.lane.b32.xlu1 %v7290_v38, %s9024_s18  ;;  %4519 = vmatprep.subr.mxu1 %v3136_v57 }
 0x5ab   : > { %4520 = vmatpush2.msra.mxu1 %v1394_v61  ;;  %v3126_v63 = vpop.permute.xlu0 %3125  ;;  %v9049_v61 = vld [vmem:[#allocation49_spill] sm:$0xff] }
 0x5ac   : > { %v3128_v47 = vpop.permute.xlu1 %3127 }
 0x5ad   : > { %3261 = vrot.lane.b32.xlu0 %v7283_v29, %s9027_s19  ;;  %v3135_v30 = vsel %vm1390_vm2, %v3126_v63, %v3128_v47  ;;  %v9031_v29 = vld [vmem:[#allocation87_spill] sm:$0xff]  ;;  %v1346_v63 = vsel %vm1345_vm3, %v9049_v61, %v9048_v36  ;;  %v7968_v47 = vld [vmem:[#allocation2 + $0x68] sm:$0xff] }
 0x5ae   : > { %3263 = vrot.lane.b32.xlu1 %v7290_v38, %s9027_s19  ;;  %4521 = vmatprep.subr.mxu1 %v3135_v30  ;;  %v1392_v19 = vsel %vm1390_vm2, %v9031_v29, %v9030_v21  ;;  %v9067_v36 = vld [vmem:[#allocation263_spill] sm:$0xff]  ;;  %v9068_v61 = vld [vmem:[#allocation262_spill] sm:$0xff] }
 0x5af   : > { %4522 = vmatpush2.msra.mxu1 %v1393_v7  ;;  %v3122_v56 = vpop.permute.xlu0 %3121  ;;  %v9050_v7 = vld [vmem:[#allocation201_spill] sm:$0xff] }
 0x5b0   : > { %v3124_v22 = vpop.permute.xlu1 %3123 }
 0x5b1   : > { %3653 = vrot.lane.b32.xlu0 %v7331_v23, %s9024_s18  ;;  %v3134_v60 = vsel %vm1390_vm2, %v3122_v56, %v3124_v22  ;;  %v9051_v56 = vld [vmem:[#allocation200_spill] sm:$0xff] }
 0x5b2   : > { %3655 = vrot.lane.b32.xlu1 %v7335_v44, %s9024_s18  ;;  %4523 = vmatprep.subr.mxu1 %v3134_v60  ;;  %v1662_v22 = vsel %vm1660_vm4, %v9051_v56, %v9050_v7  ;;  %v9069_v7 = vld [vmem:[#allocation191_spill] sm:$0xff]  ;;  %v9070_v56 = vld [vmem:[#allocation190_spill] sm:$0xff] }
 0x5b3   : > { %4524 = vmatpush2.msra.mxu1 %v1392_v19  ;;  %v3118_v39 = vpop.permute.xlu0 %3117 }
 0x5b4   : > { %v3120_v38 = vpop.permute.xlu1 %3119 }
 0x5b5   : > { %3257 = vrot.lane.b32.xlu0 %v7331_v23, %s9027_s19  ;;  %v3133_v9 = vsel %vm1390_vm2, %v3118_v39, %v3120_v38  ;;  %v9034_v23 = vld [vmem:[#allocation153_spill] sm:$0xff]  ;;  %v7983_v39 = vld [vmem:[#allocation2 + $0x50] sm:$0xff]  ;;  %v7987_v38 = vld [vmem:[#allocation2 + $0x58] sm:$0xff]  ;;  %vm1525_vm2 = vcmask 850944  }
 0x5b6   : > { %3259 = vrot.lane.b32.xlu1 %v7335_v44, %s9027_s19  ;;  %4525 = vmatprep.subr.mxu1 %v3133_v9  ;;  %v1349_v3 = vsel %vm1345_vm3, %v9035_v5, %v9034_v23  ;;  %v9054_v23 = vld [vmem:[#allocation269_spill] sm:$0xff]  ;;  %v9055_v5 = vld [vmem:[#allocation268_spill] sm:$0xff] }
 0x5b7   : > { %4526 = vmatpush2.msra.mxu1 %v1391_v62  ;;  %v3086_v0 = vpop.permute.xlu0 %3085  ;;  %v1661_v62 = vsel %vm1660_vm4, %v9053_v41, %v9052_v42 }
 0x5b8   : > { %v3088_v10 = vpop.permute.xlu1 %3087 }
 0x5b9   : > { %3649 = vrot.lane.b32.xlu0 %v7319_v1, %s9024_s18  ;;  %v3092_v18 = vsel %vm1345_vm3, %v3086_v0, %v3088_v10 }
 0x5ba   : > { %3651 = vrot.lane.b32.xlu1 %v7341_v17, %s9024_s18  ;;  %4527 = vmatprep.subr.mxu1 %v3092_v18 }
 0x5bb   : > { %4528 = vmatpush2.msra.mxu1 %v1349_v3  ;;  %v3082_v44 = vpop.permute.xlu0 %3081  ;;  %v2024_v3 = vsel %vm2020_vm11, %v9055_v5, %v9054_v23 }
 0x5bc   : > { %v3084_v31 = vpop.permute.xlu1 %3083 }
 0x5bd   : > { %3253 = vrot.lane.b32.xlu0 %v7319_v1, %s9027_s19  ;;  %v3091_v32 = vsel %vm1345_vm3, %v3082_v44, %v3084_v31  ;;  %v7921_v1 = vld [vmem:[#allocation2 + $0x48] sm:$0xff] }
 0x5be   : > { %3255 = vrot.lane.b32.xlu1 %v7341_v17, %s9027_s19  ;;  %4529 = vmatprep.subr.mxu1 %v3091_v32  ;;  %v1664_v17 = vsel %vm1660_vm4, %v9039_v13, %v9038_v8  ;;  %v9058_v8 = vld [vmem:[#allocation267_spill] sm:$0xff]  ;;  %v9059_v13 = vld [vmem:[#allocation266_spill] sm:$0xff] }
 0x5bf   : > { %4530 = vmatpush2.msra.mxu1 %v1348_v46  ;;  %v3394_v51 = vpop.permute.xlu0 %3393  ;;  %v1619_v46 = vsel %vm1615_vm12, %v9057_v43, %v9056_v2 }
 0x5c0   : > { %v3396_v50 = vpop.permute.xlu1 %3395 }
 0x5c1   : > { %3645 = vrot.lane.b32.xlu0 %v7917_v33, %s9024_s18  ;;  %v3400_v11 = vsel %vm1660_vm4, %v3394_v51, %v3396_v50 }
 0x5c2   : > { %3647 = vrot.lane.b32.xlu1 %v7921_v1, %s9024_s18  ;;  %4554 = vmatprep.subr.mxu0 %v3400_v11 }
 0x5c3   : > { %4555 = vmatpush1.msra.mxu0 %v1664_v17  ;;  %v4737_v27 = vpop.permute.xlu0 %4736  ;;  %v2023_v17 = vsel %vm2020_vm11, %v9059_v13, %v9058_v8  ;;  %v3952_v8 = vld [vmem:[#allocation5 + $0x78] sm:$0xff]  ;;  %v9077_v13 = vld [vmem:[#allocation187_spill] sm:$0xff] }
 0x5c4   : > { %v4738_v6 = vrot.slane %v4737_v27, 4  ;;  %v3078_v35 = vpop.permute.xlu1 %3077 }
 0x5c5   : > { %3249 = vrot.lane.b32.xlu0 %v7917_v33, %s9027_s19 }
 0x5c6   : > { %v4740_v40 = vsel %vm4739_vm9, %v4738_v6, %v4737_v27  ;;  %3251 = vrot.lane.b32.xlu1 %v7921_v1, %s9027_s19 }
 0x5c7   : > { %4745 = vst.msk [vmem:[#allocation3] sm:$0xff] %vm7929_vm10, %v4740_v40  ;;  %v3080_v58 = vpop.permute.xlu0 %3079  ;;  %v9061_v40 = vld [vmem:[#allocation194_spill] sm:$0xff] }
 0x5c8   : > { %v3390_v28 = vpop.permute.xlu1 %3389  ;;  %v3090_v14 = vsel %vm1345_vm3, %v3078_v35, %v3080_v58  ;;  %v9060_v35 = vld [vmem:[#allocation195_spill] sm:$0xff] }
 0x5c9   : > { %3613 = vrot.lane.b32.xlu0 %v7940_v25, %s9044_s20  ;;  %4531 = vmatprep.subr.mxu1 %v3090_v14  ;;  %v1618_v58 = vsel %vm1615_vm12, %v9061_v40, %v9060_v35  ;;  %v3960_v35 = vld [vmem:[#allocation5 + $0xb8] sm:$0xff] }
 0x5ca   : > { %3615 = vrot.lane.b32.xlu1 %v7948_v54, %s9044_s20  ;;  %4532 = vmatpush2.msra.mxu1 %v1347_v4  ;;  %v9064_v4 = vld [vmem:[#allocation264_spill] sm:$0xff] }
 0x5cb   : > { %v3392_v37 = vpop.permute.xlu0 %3391 }
 0x5cc   : > { %v3074_v16 = vpop.permute.xlu1 %3073  ;;  %v3399_v59 = vsel %vm1660_vm4, %v3390_v28, %v3392_v37  ;;  %v2022_v37 = vsel %vm2020_vm11, %v9064_v4, %v9063_v34  ;;  %v9081_v34 = vld [vmem:[#allocation256_spill] sm:$0xff] }
 0x5cd   : > { %3569 = vrot.lane.b32.xlu0 %v7940_v25, %s9047_s28  ;;  %4556 = vmatprep.subr.mxu0 %v3399_v59 }
 0x5ce   : > { %3571 = vrot.lane.b32.xlu1 %v7948_v54, %s9047_s28  ;;  %4557 = vmatpush1.msra.mxu0 %v1663_v24  ;;  %v9066_v24 = vld [vmem:[#allocation192_spill] sm:$0xff] }
 0x5cf   : > { %v3076_v52 = vpop.permute.xlu0 %3075 }
 0x5d0   : > { %v3386_v15 = vpop.permute.xlu1 %3385  ;;  %v3089_v57 = vsel %vm1345_vm3, %v3074_v16, %v3076_v52  ;;  %v1617_v52 = vsel %vm1615_vm12, %v9066_v24, %v9065_v45  ;;  %v9082_v45 = vld [vmem:[#allocation185_spill] sm:$0xff]  ;;  %v9083_v24 = vld [vmem:[#allocation184_spill] sm:$0xff]  ;;  %vm1885_vm3 = vcmask 785408  }
 0x5d1   : > { %3609 = vrot.lane.b32.xlu0 %v7960_v20, %s9044_s20  ;;  %4533 = vmatprep.subr.mxu1 %v3089_v57 }
 0x5d2   : > { %3611 = vrot.lane.b32.xlu1 %v7968_v47, %s9044_s20  ;;  %4534 = vmatpush2.msra.mxu1 %v1346_v63  ;;  %v2021_v63 = vsel %vm2020_vm11, %v9068_v61, %v9067_v36  ;;  %v5323_v36 = vmov 0   ;;  %v9084_v61 = vld [vmem:[#allocation255_spill] sm:$0xff] }
 0x5d3   : > { %v3388_v30 = vpop.permute.xlu0 %3387  ;;  %4536 = vmatmul.mubr.f32.vlgmr.msra.gmra.mxu1 %v3941_v26  ;;  %5182 = vset.pattern.permute.xlu1 %v5323_v36 }
 0x5d4   : > { %v4751_v48 = vpop.permute.xlu1 %4750  ;;  %v3398_v12 = vsel %vm1660_vm4, %v3386_v15, %v3388_v30  ;;  %4541 = vmatprep.mubr.f32.mxu1 %v3952_v8  ;;  %5181 = vset.pattern.permute.xlu0 %v5323_v36  ;;  %v9096_v8 = vld [vmem:[#allocation178_spill] sm:$0xff] }
 0x5d5   : > { %v4752_v60 = vrot.slane %v4751_v48, 4  ;;  %3565 = vrot.lane.b32.xlu0 %v7960_v20, %s9047_s28  ;;  %4558 = vmatprep.subr.mxu0 %v3398_v12  ;;  %v9105_v36 = vld [vmem:[#allocation174_spill] sm:$0xff] }
 0x5d6   : > { %3567 = vrot.lane.b32.xlu1 %v7968_v47, %s9047_s28  ;;  %4559 = vmatpush1.msra.mxu0 %v1662_v22  ;;  %v1616_v22 = vsel %vm1615_vm12, %v9070_v56, %v9069_v7  ;;  %v9086_v56 = vld [vmem:[#allocation183_spill] sm:$0xff] }
 0x5d7   : > { %v4753_v21 = vsel %vm4739_vm9, %v4752_v60, %v4751_v48  ;;  %v3382_v29 = vpop.permute.xlu0 %3381  ;;  %vm2155_vm9 = vcmask 736256  }
 0x5d8   : > { %4755 = vst.msk [vmem:[#allocation3 + $0x8] sm:$0xff] %vm7929_vm10, %v4753_v21  ;;  %v3384_v19 = vpop.permute.xlu1 %3383  ;;  %vm1750_vm10 = vcmask 809984  }
 0x5d9   : > { %3605 = vrot.lane.b32.xlu0 %v7983_v39, %s9044_s20  ;;  %v3397_v9 = vsel %vm1660_vm4, %v3382_v29, %v3384_v19  ;;  %v9071_v19 = vld [vmem:[#allocation261_spill] sm:$0xff]  ;;  %vm1840_vm4 = vcmask 793600  }
 0x5da   : > { %3607 = vrot.lane.b32.xlu1 %v7987_v38, %s9044_s20  ;;  %4560 = vmatprep.subr.mxu0 %v3397_v9  ;;  %v9072_v9 = vld [vmem:[#allocation260_spill] sm:$0xff] }
 0x5db   : > { %4561 = vmatpush1.msra.mxu0 %v1661_v62  ;;  %v3746_v0 = vpop.permute.xlu0 %3745  ;;  %v1979_v42 = vsel %vm1975_vm13, %v9072_v9, %v9071_v19  ;;  %v9088_v9 = vld [vmem:[#allocation253_spill] sm:$0xff] }
 0x5dc   : > { %v3748_v10 = vpop.permute.xlu1 %3747 }
 0x5dd   : > { %3561 = vrot.lane.b32.xlu0 %v7983_v39, %s9047_s28  ;;  %v3752_v18 = vsel %vm2020_vm11, %v3746_v0, %v3748_v10  ;;  %v9073_v10 = vld [vmem:[#allocation189_spill] sm:$0xff] }
 0x5de   : > { %3563 = vrot.lane.b32.xlu1 %v7987_v38, %s9047_s28  ;;  %4637 = vmatprep.subr.mxu1 %v3752_v18  ;;  %v9074_v18 = vld [vmem:[#allocation188_spill] sm:$0xff] }
 0x5df   : > { %4638 = vmatpush1.msra.mxu1 %v2024_v3  ;;  %v3350_v44 = vpop.permute.xlu0 %3349  ;;  %v1574_v23 = vsel %vm1570_vm14, %v9074_v18, %v9073_v10  ;;  %v9090_v18 = vld [vmem:[#allocation181_spill] sm:$0xff] }
 0x5e0   : > { %v3352_v31 = vpop.permute.xlu1 %3351 }
 0x5e1   : > { %3601 = vrot.lane.b32.xlu0 %v7917_v33, %s9044_s20  ;;  %v3356_v32 = vsel %vm1615_vm12, %v3350_v44, %v3352_v31  ;;  %v9075_v31 = vld [vmem:[#allocation259_spill] sm:$0xff] }
 0x5e2   : > { %3603 = vrot.lane.b32.xlu1 %v7921_v1, %s9044_s20  ;;  %4562 = vmatprep.subr.mxu0 %v3356_v32  ;;  %v9076_v32 = vld [vmem:[#allocation258_spill] sm:$0xff]  ;;  %s8420_s20 = scalar_lea.hbm %s8472_s6, %s5066_s17 }
 0x5e3   : > { %4563 = vmatpush1.msra.mxu0 %v1619_v46  ;;  %v3742_v51 = vpop.permute.xlu0 %3741  ;;  %v1978_v2 = vsel %vm1975_vm13, %v9076_v32, %v9075_v31  ;;  %v3950_v46 = vld [vmem:[#allocation5 + $0x68] sm:$0xff]  ;;  %v9092_v32 = vld [vmem:[#allocation251_spill] sm:$0xff] }
 0x5e4   : > { %v3744_v50 = vpop.permute.xlu1 %3743  ;;  %4458 = vmatprep.mubr.f32.mxu0 %v3950_v46 }
 0x5e5   : > { %3557 = vrot.lane.b32.xlu0 %v7917_v33, %s9047_s28  ;;  %v3751_v11 = vsel %vm2020_vm11, %v3742_v51, %v3744_v50  ;;  %v3949_v50 = vld [vmem:[#allocation5 + $0x60] sm:$0xff] }
 0x5e6   : > { %3559 = vrot.lane.b32.xlu1 %v7921_v1, %s9047_s28  ;;  %4639 = vmatprep.subr.mxu1 %v3751_v11  ;;  %s5211_s28 = scalar_lea.vmem %s8413_s16, 1024 }
 0x5e7   : > { %4640 = vmatpush1.msra.mxu1 %v2023_v17  ;;  %v3346_v27 = vpop.permute.xlu0 %3345  ;;  %4459 = vmatmul.mubr.f32.gmra.mxu0 %v3949_v50  ;;  %v9078_v17 = vld [vmem:[#allocation186_spill] sm:$0xff]  ;;  %p5212_p6 = scmp.ne.s32.totalorder %s8413_s16, %s5211_s28 }
 0x5e8   : > { %v3348_v53 = vpop.permute.xlu1 %3347  ;;  %4464 = vmatprep.mubr.f32.mxu0 %v3960_v35  ;;  %v9099_v35 = vld [vmem:[#allocation248_spill] sm:$0xff] }
 0x5e9   : > { %3921 = vrot.lane.b32.xlu0 %v7940_v25, %s5320_s24  ;;  %v3355_v6 = vsel %vm1615_vm12, %v3346_v27, %v3348_v53  ;;  %v1573_v27 = vsel %vm1570_vm14, %v9078_v17, %v9077_v13  ;;  %v3951_v53 = vld [vmem:[#allocation5 + $0x70] sm:$0xff]  ;;  %p5213_p9 = pnand %p5212_p6, %p5402_p5 }
 0x5ea   : > { %3923 = vrot.lane.b32.xlu1 %v7948_v54, %s5320_s24  ;;  %4564 = vmatprep.subr.mxu0 %v3355_v6 }
 0x5eb   : > { %4565 = vmatpush1.msra.mxu0 %v1618_v58  ;;  %v3738_v28 = vpop.permute.xlu0 %3737  ;;  %4542 = vmatmul.mubr.f32.gmra.mxu1 %v3951_v53  ;;  %v3959_v58 = vld [vmem:[#allocation5 + $0xb0] sm:$0xff]  ;;  %p5214_p10 = pneg %p5213_p9 }
 0x5ec   : > { %v3740_v14 = vpop.permute.xlu1 %3739  ;;  %4465 = vmatmul.mubr.f32.gmra.mxu0 %v3959_v58 }
 0x5ed   : > { %3525 = vrot.lane.b32.xlu0 %v7940_v25, %s9062_s29  ;;  %v3750_v55 = vsel %vm2020_vm11, %v3738_v28, %v3740_v14  ;;  %v3962_v14 = vld [vmem:[#allocation5 + $0xc8] sm:$0xff] }
 0x5ee   : > { %3527 = vrot.lane.b32.xlu1 %v7948_v54, %s9062_s29  ;;  %4641 = vmatprep.subr.mxu1 %v3750_v55  ;;  %v9080_v55 = vld [vmem:[#allocation257_spill] sm:$0xff] }
 0x5ef   : > { %4642 = vmatpush1.msra.mxu1 %v2022_v37  ;;  %v3342_v16 = vpop.permute.xlu0 %3341  ;;  %v1977_v4 = vsel %vm1975_vm13, %v9081_v34, %v9080_v55  ;;  %v3961_v37 = vld [vmem:[#allocation5 + $0xc0] sm:$0xff]  ;;  %4547 = vmatprep.mubr.f32.mxu1 %v3962_v14  ;;  %v9100_v55 = vld [vmem:[#allocation177_spill] sm:$0xff]  ;;  %v9101_v34 = vld [vmem:[#allocation176_spill] sm:$0xff] }
 0x5f0   : > { %v3344_v59 = vpop.permute.xlu1 %3343  ;;  %4548 = vmatmul.mubr.f32.gmra.mxu1 %v3961_v37 }
 0x5f1   : > { %3917 = vrot.lane.b32.xlu0 %v7960_v20, %s5320_s24  ;;  %v3354_v49 = vsel %vm1615_vm12, %v3342_v16, %v3344_v59 }
 0x5f2   : > { %3919 = vrot.lane.b32.xlu1 %v7968_v47, %s5320_s24  ;;  %4566 = vmatprep.subr.mxu0 %v3354_v49 }
 0x5f3   : > { %4567 = vmatpush1.msra.mxu0 %v1617_v52  ;;  %v3734_v15 = vpop.permute.xlu0 %3733  ;;  %v1572_v52 = vsel %vm1570_vm14, %v9083_v24, %v9082_v45  ;;  %v9103_v45 = vld [vmem:[#allocation246_spill] sm:$0xff] }
 0x5f4   : > { %v3736_v57 = vpop.permute.xlu1 %3735 }
 0x5f5   : > { %3521 = vrot.lane.b32.xlu0 %v7960_v20, %s9062_s29  ;;  %v3749_v26 = vsel %vm2020_vm11, %v3734_v15, %v3736_v57  ;;  %vm2110_vm11 = vcmask 744448  }
 0x5f6   : > { %3523 = vrot.lane.b32.xlu1 %v7968_v47, %s9062_s29  ;;  %4643 = vmatprep.subr.mxu1 %v3749_v26 }
 0x5f7   : > { %4644 = vmatpush1.msra.mxu1 %v2021_v63  ;;  %v3338_v30 = vpop.permute.xlu0 %3337  ;;  %v9085_v63 = vld [vmem:[#allocation254_spill] sm:$0xff] }
 0x5f8   : > { %v3340_v48 = vpop.permute.xlu1 %3339 }
 0x5f9   : > { %3913 = vrot.lane.b32.xlu0 %v7983_v39, %s5320_s24  ;;  %v3353_v12 = vsel %vm1615_vm12, %v3338_v30, %v3340_v48  ;;  %v1976_v30 = vsel %vm1975_vm13, %v9085_v63, %v9084_v61  ;;  %vm1705_vm12 = vcmask 818176  }
 0x5fa   : > { %3915 = vrot.lane.b32.xlu1 %v7987_v38, %s5320_s24  ;;  %4568 = vmatprep.subr.mxu0 %v3353_v12 }
 0x5fb   : > { %4569 = vmatpush1.msra.mxu0 %v1616_v22  ;;  %v3702_v60 = vpop.permute.xlu0 %3701  ;;  %v9087_v22 = vld [vmem:[#allocation182_spill] sm:$0xff] }
 0x5fc   : > { %v3704_v21 = vpop.permute.xlu1 %3703 }
 0x5fd   : > { %3517 = vrot.lane.b32.xlu0 %v7983_v39, %s9062_s29  ;;  %v3708_v29 = vsel %vm1975_vm13, %v3702_v60, %v3704_v21  ;;  %v1571_v60 = vsel %vm1570_vm14, %v9087_v22, %v9086_v56  ;;  %v9107_v56 = vld [vmem:[#allocation244_spill] sm:$0xff] }
 0x5fe   : > { %3519 = vrot.lane.b32.xlu1 %v7987_v38, %s9062_s29  ;;  %4645 = vmatprep.subr.mxu1 %v3708_v29 }
 0x5ff   : > { %4646 = vmatpush1.msra.mxu1 %v1979_v42  ;;  %v3306_v41 = vpop.permute.xlu0 %3305  ;;  %v9089_v42 = vld [vmem:[#allocation252_spill] sm:$0xff] }
 0x600   : > { %v3308_v62 = vpop.permute.xlu1 %3307 }
 0x601   : > { %3909 = vrot.lane.b32.xlu0 %v7917_v33, %s5320_s24  ;;  %v3312_v0 = vsel %vm1570_vm14, %v3306_v41, %v3308_v62  ;;  %v1934_v41 = vsel %vm1930_vm15, %v9089_v42, %v9088_v9  ;;  %v9109_v9 = vld [vmem:[#allocation236_spill] sm:$0xff] }
 0x602   : > { %3911 = vrot.lane.b32.xlu1 %v7921_v1, %s5320_s24  ;;  %4570 = vmatprep.subr.mxu0 %v3312_v0  ;;  %s9079_s24 = smov 99  }
 0x603   : > { %4571 = vmatpush1.msra.mxu0 %v1574_v23  ;;  %v3698_v5 = vpop.permute.xlu0 %3697  ;;  %v9091_v23 = vld [vmem:[#allocation180_spill] sm:$0xff] }
 0x604   : > { %v3700_v3 = vpop.permute.xlu1 %3699 }
 0x605   : > { %3513 = vrot.lane.b32.xlu0 %v7917_v33, %s9062_s29  ;;  %v3707_v44 = vsel %vm1975_vm13, %v3698_v5, %v3700_v3  ;;  %v1529_v5 = vsel %vm1525_vm2, %v9091_v23, %v9090_v18  ;;  %v9111_v18 = vld [vmem:[#allocation242_spill] sm:$0xff] }
 0x606   : > { %3515 = vrot.lane.b32.xlu1 %v7921_v1, %s9062_s29  ;;  %4647 = vmatprep.subr.mxu1 %v3707_v44  ;;  %s5325_s29 = smov [#allocation8]  }
 0x607   : > { %4648 = vmatpush1.msra.mxu1 %v1978_v2  ;;  %v3302_v43 = vpop.permute.xlu0 %3301  ;;  %v9093_v2 = vld [vmem:[#allocation250_spill] sm:$0xff] }
 0x608   : > { %v3304_v51 = vpop.permute.xlu1 %3303 }
 0x609   : > { %3877 = vrot.lane.b32.xlu0 %v7940_v25, %s5319_s21  ;;  %v3311_v11 = vsel %vm1570_vm14, %v3302_v43, %v3304_v51  ;;  %v1933_v43 = vsel %vm1930_vm15, %v9093_v2, %v9092_v32  ;;  %v9114_v32 = vld [vmem:[#allocation234_spill] sm:$0xff] }
 0x60a   : > { %3879 = vrot.lane.b32.xlu1 %v7948_v54, %s5319_s21  ;;  %4572 = vmatprep.subr.mxu0 %v3311_v11  ;;  %v9095_v11 = vld [vmem:[#allocation179_spill] sm:$0xff] }
 0x60b   : > { %4573 = vmatpush1.msra.mxu0 %v1573_v27  ;;  %v3694_v6 = vpop.permute.xlu0 %3693  ;;  %v1528_v13 = vsel %vm1525_vm2, %v9096_v8, %v9095_v11  ;;  %v9116_v11 = vld [vmem:[#allocation240_spill] sm:$0xff] }
 0x60c   : > { %v3696_v40 = vpop.permute.xlu1 %3695 }
 0x60d   : > { %3481 = vrot.lane.b32.xlu0 %v7940_v25, %s9079_s24  ;;  %v3706_v28 = vsel %vm1975_vm13, %v3694_v6, %v3696_v40  ;;  %v9098_v6 = vld [vmem:[#allocation249_spill] sm:$0xff] }
 0x60e   : > { %3483 = vrot.lane.b32.xlu1 %v7948_v54, %s9079_s24  ;;  %4649 = vmatprep.subr.mxu1 %v3706_v28  ;;  %v1932_v40 = vsel %vm1930_vm15, %v9099_v35, %v9098_v6 }
 0x60f   : > { %4650 = vmatpush1.msra.mxu1 %v1977_v4  ;;  %v3298_v16 = vpop.permute.xlu0 %3297  ;;  %v1527_v4 = vsel %vm1525_vm2, %v9101_v34, %v9100_v55  ;;  %v9121_v55 = vld [vmem:[#allocation231_spill] sm:$0xff]  ;;  %v9122_v34 = vld [vmem:[#allocation230_spill] sm:$0xff] }
 0x610   : > { %v3300_v59 = vpop.permute.xlu1 %3299 }
 0x611   : > { %3873 = vrot.lane.b32.xlu0 %v7960_v20, %s5319_s21  ;;  %v3310_v49 = vsel %vm1570_vm14, %v3298_v16, %v3300_v59 }
 0x612   : > { %3875 = vrot.lane.b32.xlu1 %v7968_v47, %s5319_s21  ;;  %4574 = vmatprep.subr.mxu0 %v3310_v49  ;;  %v9102_v49 = vld [vmem:[#allocation247_spill] sm:$0xff] }
 0x613   : > { %4575 = vmatpush1.msra.mxu0 %v1572_v52  ;;  %v3690_v15 = vpop.permute.xlu0 %3689  ;;  %v1931_v24 = vsel %vm1930_vm15, %v9103_v45, %v9102_v49  ;;  %v9123_v49 = vld [vmem:[#allocation301_spill] sm:$0xff]  ;;  %v9124_v45 = vld [vmem:[#allocation300_spill] sm:$0xff] }
 0x614   : > { %v3692_v57 = vpop.permute.xlu1 %3691 }
 0x615   : > { %3477 = vrot.lane.b32.xlu0 %v7960_v20, %s9079_s24  ;;  %v3705_v26 = vsel %vm1975_vm13, %v3690_v15, %v3692_v57  ;;  %vm2065_vm13 = vcmask 752640  }
 0x616   : > { %3479 = vrot.lane.b32.xlu1 %v7968_v47, %s9079_s24  ;;  %4651 = vmatprep.subr.mxu1 %v3705_v26  ;;  %v9104_v26 = vld [vmem:[#allocation175_spill] sm:$0xff] }
 0x617   : > { %4652 = vmatpush1.msra.mxu1 %v1976_v30  ;;  %v3294_v48 = vpop.permute.xlu0 %3293  ;;  %v1526_v61 = vsel %vm1525_vm2, %v9105_v36, %v9104_v26  ;;  %v3944_v30 = vld [vmem:[#allocation5 + $0x38] sm:$0xff] }
 0x618   : > { %v3296_v12 = vpop.permute.xlu1 %3295  ;;  %4618 = vmatprep.mubr.f32.mxu0 %v3944_v30 }
 0x619   : > { %3869 = vrot.lane.b32.xlu0 %v7983_v39, %s5319_s21  ;;  %v3309_v7 = vsel %vm1570_vm14, %v3294_v48, %v3296_v12  ;;  %vm5324_vm14 = vmmov 0  }
 0x61a   : > { %3871 = vrot.lane.b32.xlu1 %v7987_v38, %s5319_s21  ;;  %4576 = vmatprep.subr.mxu0 %v3309_v7  ;;  %v9106_v7 = vld [vmem:[#allocation245_spill] sm:$0xff] }
 0x61b   : > { %4577 = vmatpush1.msra.mxu0 %v1571_v60  ;;  %v3658_v21 = vpop.permute.xlu0 %3657  ;;  %v1889_v22 = vsel %vm1885_vm3, %v9107_v56, %v9106_v7  ;;  %v4870_v56 = vld [vmem:[%s8471_s5] sm:$0xff] }
 0x61c   : > { %v3660_v29 = vpop.permute.xlu1 %3659 }
 0x61d   : > { %3473 = vrot.lane.b32.xlu0 %v7983_v39, %s9079_s24  ;;  %v3664_v19 = vsel %vm1930_vm15, %v3658_v21, %v3660_v29 }
 0x61e   : > { %3475 = vrot.lane.b32.xlu1 %v7987_v38, %s9079_s24  ;;  %4653 = vmatprep.subr.mxu1 %v3664_v19  ;;  %v9108_v19 = vld [vmem:[#allocation237_spill] sm:$0xff] }
 0x61f   : > { %4654 = vmatpush1.msra.mxu1 %v1934_v41  ;;  %v3262_v62 = vpop.permute.xlu0 %3261  ;;  %v1844_v42 = vsel %vm1840_vm4, %v9109_v9, %v9108_v19 }
 0x620   : > { %v3264_v0 = vpop.permute.xlu1 %3263 }
 0x621   : > { %3865 = vrot.lane.b32.xlu0 %v7917_v33, %s5319_s21  ;;  %v3268_v10 = vsel %vm1525_vm2, %v3262_v62, %v3264_v0 }
 0x622   : > { %3867 = vrot.lane.b32.xlu1 %v7921_v1, %s5319_s21  ;;  %4578 = vmatprep.subr.mxu0 %v3268_v10  ;;  %s9094_s21 = smov 91   ;;  %v9110_v10 = vld [vmem:[#allocation243_spill] sm:$0xff] }
 0x623   : > { %4579 = vmatpush1.msra.mxu0 %v1529_v5  ;;  %v3654_v3 = vpop.permute.xlu0 %3653  ;;  %v1888_v23 = vsel %vm1885_vm3, %v9111_v18, %v9110_v10 }
 0x624   : > { %v3656_v44 = vpop.permute.xlu1 %3655 }
 0x625   : > { %3469 = vrot.lane.b32.xlu0 %v7917_v33, %s9079_s24  ;;  %v3663_v31 = vsel %vm1930_vm15, %v3654_v3, %v3656_v44 }
 0x626   : > { %3471 = vrot.lane.b32.xlu1 %v7921_v1, %s9079_s24  ;;  %4655 = vmatprep.subr.mxu1 %v3663_v31  ;;  %v9113_v31 = vld [vmem:[#allocation235_spill] sm:$0xff]  ;;  %s5215_s24 = sshll.u32 %s5325_s29, 4  ;;  %s5216_s24 = int_to_ptr.vmem [resolvable:$false] %s5215_s24 }
 0x627   : > { %4656 = vmatpush1.msra.mxu1 %v1933_v43  ;;  %v3258_v46 = vpop.permute.xlu0 %3257  ;;  %v1843_v2 = vsel %vm1840_vm4, %v9114_v32, %v9113_v31  ;;  %p5218_p11 = scmp.lt.s32.totalorder %s8413_s16, %s5216_s24 }
 0x628   : > { %v3260_v51 = vpop.permute.xlu1 %3259 }
 0x629   : > { %3833 = vrot.lane.b32.xlu0 %v7940_v25, %s9094_s21  ;;  %v3267_v50 = vsel %vm1525_vm2, %v3258_v46, %v3260_v51  ;;  %v3946_v46 = vld [vmem:[#allocation5 + $0x48] sm:$0xff] }
 0x62a   : > { %3835 = vrot.lane.b32.xlu1 %v7948_v54, %s9094_s21  ;;  %4580 = vmatprep.subr.mxu0 %v3267_v50  ;;  %v9115_v50 = vld [vmem:[#allocation241_spill] sm:$0xff] }
 0x62b   : > { %4581 = vmatpush1.msra.mxu0 %v1528_v13  ;;  %v3650_v17 = vpop.permute.xlu0 %3649  ;;  %4701 = vmatprep.mubr.f32.mxu1 %v3946_v46  ;;  %v1887_v8 = vsel %vm1885_vm3, %v9116_v11, %v9115_v50  ;;  %v9134_v46 = vld [vmem:[#allocation224_spill] sm:$0xff] }
 0x62c   : > { %v3652_v27 = vpop.permute.xlu1 %3651 }
 0x62d   : > { %3437 = vrot.lane.b32.xlu0 %v7940_v25, %s9097_s9  ;;  %v3662_v53 = vsel %vm1930_vm15, %v3650_v17, %v3652_v27  ;;  %v9117_v27 = vld [vmem:[#allocation233_spill] sm:$0xff] }
 0x62e   : > { %3439 = vrot.lane.b32.xlu1 %v7948_v54, %s9097_s9  ;;  %4657 = vmatprep.subr.mxu1 %v3662_v53 }
 0x62f   : > { %4658 = vmatpush1.msra.mxu1 %v1932_v40  ;;  %v3254_v58 = vpop.permute.xlu0 %3253  ;;  %v9119_v40 = vld [vmem:[#allocation239_spill] sm:$0xff] }
 0x630   : > { %v3256_v28 = vpop.permute.xlu1 %3255 }
 0x631   : > { %3829 = vrot.lane.b32.xlu0 %v7960_v20, %s9094_s21  ;;  %v3266_v14 = vsel %vm1525_vm2, %v3254_v58, %v3256_v28 }
 0x632   : > { %3831 = vrot.lane.b32.xlu1 %v7968_v47, %s9094_s21  ;;  %4582 = vmatprep.subr.mxu0 %v3266_v14  ;;  %v8243_v14 = vld [vmem:[#allocation3] sm:$0xff] }
 0x633   : > { %4583 = vmatpush1.msra.mxu0 %v1527_v4  ;;  %v3646_v37 = vpop.permute.xlu0 %3645  ;;  %v1841_v4 = vsel %vm1840_vm4, %v9122_v34, %v9121_v55 }
 0x634   : > { %v3648_v16 = vpop.permute.xlu1 %3647 }
 0x635   : > { %3433 = vrot.lane.b32.xlu0 %v7960_v20, %s9097_s9  ;;  %v3661_v59 = vsel %vm1930_vm15, %v3646_v37, %v3648_v16  ;;  %v8253_v16 = vld [vmem:[#allocation3 + $0x8] sm:$0xff] }
 0x636   : > { %3435 = vrot.lane.b32.xlu1 %v7968_v47, %s9097_s9  ;;  %4659 = vmatprep.subr.mxu1 %v3661_v59 }
 0x637   : > { %4660 = vmatpush1.msra.mxu1 %v1931_v24  ;;  %v3250_v52 = vpop.permute.xlu0 %3249  ;;  %v2204_v24 = vsel %vm2200_vm5, %v9124_v45, %v9123_v49 }
 0x638   : > { %v3252_v15 = vpop.permute.xlu1 %3251 }
 0x639   : > { %3825 = vrot.lane.b32.xlu0 %v7983_v39, %s9094_s21  ;;  %v3265_v57 = vsel %vm1525_vm2, %v3250_v52, %v3252_v15  ;;  %v4287_v52 = vld [vmem:[%s8470_s4] sm:$0xff] }
 0x63a   : > { %3827 = vrot.lane.b32.xlu1 %v7987_v38, %s9094_s21  ;;  %4584 = vmatprep.subr.mxu0 %v3265_v57  ;;  %v4288_v57 = vld [vmem:[%s8470_s4 + $0x8] sm:$0xff] }
 0x63b   : > { %4585 = vmatpush1.msra.mxu0 %v1526_v61  ;;  %v3614_v63 = vpop.permute.xlu0 %3613  ;;  %v9125_v61 = vld [vmem:[#allocation229_spill] sm:$0xff] }
 0x63c   : > { %v3616_v48 = vpop.permute.xlu1 %3615 }
 0x63d   : > { %3429 = vrot.lane.b32.xlu0 %v7983_v39, %s9097_s9  ;;  %v3620_v12 = vsel %vm1885_vm3, %v3614_v63, %v3616_v48  ;;  %v9126_v63 = vld [vmem:[#allocation228_spill] sm:$0xff] }
 0x63e   : > { %3431 = vrot.lane.b32.xlu1 %v7987_v38, %s9097_s9  ;;  %4661 = vmatprep.subr.mxu1 %v3620_v12  ;;  %v1799_v30 = vsel %vm1795_vm8, %v9126_v63, %v9125_v61  ;;  %v4289_v12 = vld [vmem:[%s8470_s4 + $0x10] sm:$0xff]  ;;  %v9146_v63 = vld [vmem:[#allocation218_spill] sm:$0xff] }
 0x63f   : > { %4662 = vmatpush1.msra.mxu1 %v1889_v22  ;;  %v3570_v60 = vpop.permute.xlu0 %3569  ;;  %v9145_v61 = vld [vmem:[#allocation219_spill] sm:$0xff] }
 0x640   : > { %v3572_v21 = vpop.permute.xlu1 %3571 }
 0x641   : > { %3821 = vrot.lane.b32.xlu0 %v7917_v33, %s9094_s21  ;;  %v3576_v29 = vsel %vm1840_vm4, %v3570_v60, %v3572_v21  ;;  %v9127_v60 = vld [vmem:[#allocation299_spill] sm:$0xff]  ;;  %v9128_v21 = vld [vmem:[#allocation298_spill] sm:$0xff] }
 0x642   : > { %3823 = vrot.lane.b32.xlu1 %v7921_v1, %s9094_s21  ;;  %4586 = vmatprep.subr.mxu0 %v3576_v29  ;;  %v2203_v29 = vsel %vm2200_vm5, %v9128_v21, %v9127_v60  ;;  %s5217_s21 = scalar_lea.vmem %s5216_s24, 2048 }
 0x643   : > { %4587 = vmatpush2.msra.mxu0 %v1844_v42  ;;  %v3610_v41 = vpop.permute.xlu0 %3609  ;;  %p5219_p12 = scmp.lt.s32.totalorder %s5217_s21, %s5211_s28 }
 0x644   : > { %v3612_v62 = vpop.permute.xlu1 %3611 }
 0x645   : > { %3425 = vrot.lane.b32.xlu0 %v7917_v33, %s9097_s9  ;;  %v3619_v0 = vsel %vm1885_vm3, %v3610_v41, %v3612_v62  ;;  %v9129_v41 = vld [vmem:[#allocation227_spill] sm:$0xff]  ;;  %v9130_v62 = vld [vmem:[#allocation226_spill] sm:$0xff]  ;;  %p5220_p13 = por %p5219_p12, %p5218_p11 }
 0x646   : > { %3427 = vrot.lane.b32.xlu1 %v7921_v1, %s9097_s9  ;;  %4663 = vmatprep.subr.mxu1 %v3619_v0  ;;  %v1798_v0 = vsel %vm1795_vm8, %v9130_v62, %v9129_v41 }
 0x647   : > { %4664 = vmatpush1.msra.mxu1 %v1888_v23  ;;  %v3566_v5 = vpop.permute.xlu0 %3565  ;;  %p5221_p0 = pnand %p5220_p13, %p5214_p10 }
 0x648   : > { %v3568_v3 = vpop.permute.xlu1 %3567 }
 0x649   : > { %3789 = vrot.lane.b32.xlu0 %v7940_v25, %s9112_s10  ;;  %v3575_v44 = vsel %vm1840_vm4, %v3566_v5, %v3568_v3  ;;  %v9131_v5 = vld [vmem:[#allocation297_spill] sm:$0xff]  ;;  %v9132_v3 = vld [vmem:[#allocation296_spill] sm:$0xff] }
 0x64a   : > { %3791 = vrot.lane.b32.xlu1 %v7948_v54, %s9112_s10  ;;  %4588 = vmatprep.subr.mxu0 %v3575_v44  ;;  %v2202_v44 = vsel %vm2200_vm5, %v9132_v3, %v9131_v5 }
 0x64b   : > { %4589 = vmatpush2.msra.mxu0 %v1843_v2  ;;  %v3606_v43 = vpop.permute.xlu0 %3605 }
 0x64c   : > { %v3608_v51 = vpop.permute.xlu1 %3607 }
 0x64d   : > { %3785 = vrot.lane.b32.xlu0 %v7960_v20, %s9112_s10  ;;  %v3618_v25 = vsel %vm1885_vm3, %v3606_v43, %v3608_v51  ;;  %v9118_v20 = vld [vmem:[#allocation232_spill] sm:$0xff]  ;;  %v9133_v43 = vld [vmem:[#allocation225_spill] sm:$0xff] }
 0x64e   : > { %3787 = vrot.lane.b32.xlu1 %v7968_v47, %s9112_s10  ;;  %4665 = vmatprep.subr.mxu1 %v3618_v25  ;;  %v1842_v53 = vsel %vm1840_vm4, %v9118_v20, %v9117_v27  ;;  %v1797_v51 = vsel %vm1795_vm8, %v9134_v46, %v9133_v43 }
 0x64f   : > { %4666 = vmatpush1.msra.mxu1 %v1887_v8  ;;  %v3562_v54 = vpop.permute.xlu0 %3561  ;;  %v9135_v8 = vld [vmem:[#allocation295_spill] sm:$0xff] }
 0x650   : > { %v3564_v13 = vpop.permute.xlu1 %3563 }
 0x651   : > { %3781 = vrot.lane.b32.xlu0 %v7983_v39, %s9112_s10  ;;  %v3574_v17 = vsel %vm1840_vm4, %v3562_v54, %v3564_v13  ;;  %v9120_v39 = vld [vmem:[#allocation238_spill] sm:$0xff] }
 0x652   : > { %3783 = vrot.lane.b32.xlu1 %v7987_v38, %s9112_s10  ;;  %4590 = vmatprep.subr.mxu0 %v3574_v17  ;;  %v1886_v58 = vsel %vm1885_vm3, %v9120_v39, %v9119_v40  ;;  %v9136_v54 = vld [vmem:[#allocation294_spill] sm:$0xff] }
 0x653   : > { %4591 = vmatpush2.msra.mxu0 %v1842_v53  ;;  %v3602_v6 = vpop.permute.xlu0 %3601  ;;  %v2201_v13 = vsel %vm2200_vm5, %v9136_v54, %v9135_v8  ;;  %v9137_v53 = vld [vmem:[#allocation223_spill] sm:$0xff] }
 0x654   : > { %v3604_v47 = vpop.permute.xlu1 %3603 }
 0x655   : > { %3777 = vrot.lane.b32.xlu0 %v7917_v33, %s9112_s10  ;;  %v3617_v35 = vsel %vm1885_vm3, %v3602_v6, %v3604_v47  ;;  %v9138_v6 = vld [vmem:[#allocation222_spill] sm:$0xff] }
 0x656   : > { %3779 = vrot.lane.b32.xlu1 %v7921_v1, %s9112_s10  ;;  %4667 = vmatprep.subr.mxu1 %v3617_v35  ;;  %v1796_v47 = vsel %vm1795_vm8, %v9138_v6, %v9137_v53 }
 0x657   : > { %4668 = vmatpush1.msra.mxu1 %v1886_v58  ;;  %v3558_v28 = vpop.permute.xlu0 %3557  ;;  %v9139_v58 = vld [vmem:[#allocation293_spill] sm:$0xff] }
 0x658   : > { %v3560_v38 = vpop.permute.xlu1 %3559 }
 0x659   : > { %4758 = vrot.lane.b32.xlu0 %v8243_v14, %s8643_s30  ;;  %v3573_v33 = vsel %vm1840_vm4, %v3558_v28, %v3560_v38  ;;  %v9140_v28 = vld [vmem:[#allocation292_spill] sm:$0xff] }
 0x65a   : > { %4764 = vrot.lane.b32.xlu1 %v8243_v14, %s8646_s23  ;;  %4592 = vmatprep.subr.mxu0 %v3573_v33  ;;  %v2159_v38 = vsel %vm2155_vm9, %v9140_v28, %v9139_v58 }
 0x65b   : > { %4593 = vmatpush2.msra.mxu0 %v1841_v4  ;;  %v3922_v1 = vpop.permute.xlu0 %3921  ;;  %v9141_v4 = vld [vmem:[#allocation221_spill] sm:$0xff] }
 0x65c   : > { %v3924_v37 = vpop.permute.xlu1 %3923 }
 0x65d   : > { %4857 = vrot.lane.b32.xlu0 %v8253_v16, %s8643_s30  ;;  %v3928_v59 = vsel %vm2200_vm5, %v3922_v1, %v3924_v37  ;;  %v9142_v1 = vld [vmem:[#allocation220_spill] sm:$0xff] }
 0x65e   : > { %4863 = vrot.lane.b32.xlu1 %v8253_v16, %s8646_s23  ;;  %4669 = vmatprep.subr.mxu1 %v3928_v59  ;;  %v1754_v37 = vsel %vm1750_vm10, %v9142_v1, %v9141_v4 }
 0x65f   : > { %4670 = vmatpush2.msra.mxu1 %v2204_v24  ;;  %v3526_v15 = vpop.permute.xlu0 %3525  ;;  %v9143_v24 = vld [vmem:[#allocation291_spill] sm:$0xff] }
 0x660   : > { %v3528_v26 = vpop.permute.xlu1 %3527 }
 0x661   : > { %v3532_v36 = vsel %vm1795_vm8, %v3526_v15, %v3528_v26  ;;  %4292 = vperm.xlu0 %5181, %v4287_v52   ;;  %v9144_v52 = vld [vmem:[#allocation290_spill] sm:$0xff] }
 0x662   : > { %4594 = vmatprep.subr.mxu0 %v3532_v36  ;;  %4297 = vperm.xlu1 %5182, %v4288_v57   ;;  %v2158_v15 = vsel %vm2155_vm9, %v9144_v52, %v9143_v24 }
 0x663   : > { %4595 = vmatpush2.msra.mxu0 %v1799_v30  ;;  %v3918_v48 = vpop.permute.xlu0 %3917  ;;  %v1753_v30 = vsel %vm1750_vm10, %v9146_v63, %v9145_v61 }
 0x664   : > { %v3920_v7 = vpop.permute.xlu1 %3919 }
 0x665   : > { %v3927_v22 = vsel %vm2200_vm5, %v3918_v48, %v3920_v7  ;;  %4774 = vperm.xlu0 %5181, %v4870_v56  }
 0x666   : > { %4671 = vmatprep.subr.mxu1 %v3927_v22  ;;  %4302 = vperm.xlu1 %5182, %v4289_v12   ;;  %v9148_v22 = vld [vmem:[#allocation288_spill] sm:$0xff] }
 0x667   : > { %4672 = vmatpush2.msra.mxu1 %v2203_v29  ;;  %v3522_v19 = vpop.permute.xlu0 %3521 }
 0x668   : > { %v3524_v9 = vpop.permute.xlu1 %3523 }
 0x669   : > { %v3531_v42 = vsel %vm1795_vm8, %v3522_v19, %v3524_v9  ;;  %v9149_v9 = vld [vmem:[#allocation217_spill] sm:$0xff] }
 0x66a   : > { %4596 = vmatprep.subr.mxu0 %v3531_v42  ;;  %4873 = vperm.xlu1 %5182, %v4870_v56   ;;  %v9147_v56 = vld [vmem:[#allocation289_spill] sm:$0xff]  ;;  %v9150_v42 = vld [vmem:[#allocation216_spill] sm:$0xff] }
 0x66b   : > { %4597 = vmatpush2.msra.mxu0 %v1798_v0  ;;  %v3914_v10 = vpop.permute.xlu0 %3913  ;;  %v2157_v60 = vsel %vm2155_vm9, %v9148_v22, %v9147_v56  ;;  %v1752_v41 = vsel %vm1750_vm10, %v9150_v42, %v9149_v9  ;;  %v9170_v9 = vld [vmem:[#allocation206_spill] sm:$0xff] }
 0x66c   : > { %v3916_v18 = vpop.permute.xlu1 %3915 }
 0x66d   : > { %v3926_v23 = vsel %vm2200_vm5, %v3914_v10, %v3916_v18  ;;  %v9151_v18 = vld [vmem:[#allocation287_spill] sm:$0xff] }
 0x66e   : > { %4673 = vmatprep.subr.mxu1 %v3926_v23  ;;  %v9152_v23 = vld [vmem:[#allocation286_spill] sm:$0xff] }
 0x66f   : > { %4674 = vmatpush2.msra.mxu1 %v2202_v44  ;;  %v3518_v31 = vpop.permute.xlu0 %3517  ;;  %v2156_v5 = vsel %vm2155_vm9, %v9152_v23, %v9151_v18  ;;  %v3953_v23 = vld [vmem:[#allocation5 + $0x80] sm:$0xff] }
 0x670   : > { %v3520_v32 = vpop.permute.xlu1 %3519 }
 0x671   : > { %v3530_v2 = vsel %vm1795_vm8, %v3518_v31, %v3520_v32  ;;  %v9153_v32 = vld [vmem:[#allocation215_spill] sm:$0xff] }
 0x672   : > { %4598 = vmatprep.subr.mxu0 %v3530_v2  ;;  %v9154_v2 = vld [vmem:[#allocation214_spill] sm:$0xff] }
 0x673   : > { %4599 = vmatpush2.msra.mxu0 %v1797_v51  ;;  %v3910_v25 = vpop.permute.xlu0 %3909  ;;  %v1751_v43 = vsel %vm1750_vm10, %v9154_v2, %v9153_v32 }
 0x674   : > { %v3912_v50 = vpop.permute.xlu1 %3911 }
 0x675   : > { %v3925_v11 = vsel %vm2200_vm5, %v3910_v25, %v3912_v50  ;;  %v9155_v50 = vld [vmem:[#allocation285_spill] sm:$0xff] }
 0x676   : > { %4675 = vmatprep.subr.mxu1 %v3925_v11  ;;  %v9156_v11 = vld [vmem:[#allocation284_spill] sm:$0xff] }
 0x677   : > { %4676 = vmatpush2.msra.mxu1 %v2201_v13  ;;  %v3514_v17 = vpop.permute.xlu0 %3513  ;;  %v2114_v8 = vsel %vm2110_vm11, %v9156_v11, %v9155_v50 }
 0x678   : > { %v3516_v27 = vpop.permute.xlu1 %3515 }
 0x679   : > { %v3529_v20 = vsel %vm1795_vm8, %v3514_v17, %v3516_v27  ;;  %v9157_v27 = vld [vmem:[#allocation213_spill] sm:$0xff] }
 0x67a   : > { %4600 = vmatprep.subr.mxu0 %v3529_v20  ;;  %v9158_v20 = vld [vmem:[#allocation212_spill] sm:$0xff] }
 0x67b   : > { %4601 = vmatpush2.msra.mxu0 %v1796_v47  ;;  %v3878_v35 = vpop.permute.xlu0 %3877  ;;  %v1709_v53 = vsel %vm1705_vm12, %v9158_v20, %v9157_v27 }
 0x67c   : > { %v3880_v40 = vpop.permute.xlu1 %3879 }
 0x67d   : > { %v3884_v39 = vsel %vm2155_vm9, %v3878_v35, %v3880_v40  ;;  %v9159_v40 = vld [vmem:[#allocation283_spill] sm:$0xff] }
 0x67e   : > { %4677 = vmatprep.subr.mxu1 %v3884_v39  ;;  %v9160_v39 = vld [vmem:[#allocation282_spill] sm:$0xff] }
 0x67f   : > { %4678 = vmatpush2.msra.mxu1 %v2159_v38  ;;  %v3482_v33 = vpop.permute.xlu0 %3481  ;;  %v2113_v58 = vsel %vm2110_vm11, %v9160_v39, %v9159_v40  ;;  %v9179_v40 = vld [vmem:[#allocation270_spill] sm:$0xff] }
 0x680   : > { %v3484_v55 = vpop.permute.xlu1 %3483 }
 0x681   : > { %v3488_v34 = vsel %vm1750_vm10, %v3482_v33, %v3484_v55  ;;  %v9161_v55 = vld [vmem:[#allocation211_spill] sm:$0xff] }
 0x682   : > { %4602 = vmatprep.subr.mxu0 %v3488_v34  ;;  %v9162_v34 = vld [vmem:[#allocation210_spill] sm:$0xff] }
 0x683   : > { %4603 = vmatpush2.msra.mxu0 %v1754_v37  ;;  %v3874_v59 = vpop.permute.xlu0 %3873  ;;  %v1708_v4 = vsel %vm1705_vm12, %v9162_v34, %v9161_v55  ;;  %v3955_v34 = vld [vmem:[#allocation5 + $0x90] sm:$0xff] }
 0x684   : > { %v3876_v49 = vpop.permute.xlu1 %3875 }
 0x685   : > { %v3883_v45 = vsel %vm2155_vm9, %v3874_v59, %v3876_v49  ;;  %v9163_v49 = vld [vmem:[#allocation281_spill] sm:$0xff] }
 0x686   : > { %4679 = vmatprep.subr.mxu1 %v3883_v45  ;;  %v9164_v45 = vld [vmem:[#allocation280_spill] sm:$0xff] }
 0x687   : > { %4680 = vmatpush2.msra.mxu1 %v2158_v15  ;;  %v3478_v57 = vpop.permute.xlu0 %3477  ;;  %v2112_v24 = vsel %vm2110_vm11, %v9164_v45, %v9163_v49 }
 0x688   : > { %v3480_v26 = vpop.permute.xlu1 %3479 }
 0x689   : > { %v3487_v36 = vsel %vm1750_vm10, %v3478_v57, %v3480_v26  ;;  %v9165_v26 = vld [vmem:[#allocation209_spill] sm:$0xff] }
 0x68a   : > { %4604 = vmatprep.subr.mxu0 %v3487_v36  ;;  %v9166_v36 = vld [vmem:[#allocation208_spill] sm:$0xff] }
 0x68b   : > { %4605 = vmatpush2.msra.mxu0 %v1753_v30  ;;  %v3870_v48 = vpop.permute.xlu0 %3869  ;;  %v1707_v61 = vsel %vm1705_vm12, %v9166_v36, %v9165_v26  ;;  %v4770_v26 = vld [vmem:[%s8469_s3] sm:$0xff] }
 0x68c   : > { %v3872_v12 = vpop.permute.xlu1 %3871 }
 0x68d   : > { %v3882_v7 = vsel %vm2155_vm9, %v3870_v48, %v3872_v12  ;;  %v9167_v12 = vld [vmem:[#allocation279_spill] sm:$0xff] }
 0x68e   : > { %4681 = vmatprep.subr.mxu1 %v3882_v7  ;;  %v9168_v7 = vld [vmem:[#allocation278_spill] sm:$0xff] }
 0x68f   : > { %4682 = vmatpush2.msra.mxu1 %v2157_v60  ;;  %v3474_v21 = vpop.permute.xlu0 %3473  ;;  %v2111_v56 = vsel %vm2110_vm11, %v9168_v7, %v9167_v12  ;;  %v4454_v12 = vpop.f32.mrf.mxu0 }
 0x690   : > { %v3476_v29 = vpop.permute.xlu1 %3475 }
 0x691   : > { %v3486_v19 = vsel %vm1750_vm10, %v3474_v21, %v3476_v29  ;;  %v3943_v29 = vld [vmem:[#allocation5 + $0x30] sm:$0xff] }
 0x692   : > { %4606 = vmatprep.subr.mxu0 %v3486_v19  ;;  %v9169_v19 = vld [vmem:[#allocation207_spill] sm:$0xff] }
 0x693   : > { %4607 = vmatpush2.msra.mxu0 %v1752_v41  ;;  %v3866_v62 = vpop.permute.xlu0 %3865  ;;  %v1706_v42 = vsel %vm1705_vm12, %v9170_v9, %v9169_v19  ;;  %v3954_v41 = vld [vmem:[#allocation5 + $0x88] sm:$0xff] }
 0x694   : > { %v3868_v0 = vpop.permute.xlu1 %3867 }
 0x695   : > { %v3881_v10 = vsel %vm2155_vm9, %v3866_v62, %v3868_v0 }
 0x696   : > { %4683 = vmatprep.subr.mxu1 %v3881_v10  ;;  %v9171_v10 = vmov 0.0  }
 0x697   : > { %4684 = vmatpush2.msra.mxu1 %v2156_v5  ;;  %v3470_v3 = vpop.permute.xlu0 %3469  ;;  %v9172_v5 = vld [vmem:[#allocation277_spill] sm:$0xff] }
 0x698   : > { %v3472_v44 = vpop.permute.xlu1 %3471 }
 0x699   : > { %v3485_v31 = vsel %vm1750_vm10, %v3470_v3, %v3472_v44  ;;  %v9173_v3 = vld [vmem:[#allocation276_spill] sm:$0xff] }
 0x69a   : > { %4608 = vmatprep.subr.mxu0 %v3485_v31  ;;  %v2069_v44 = vsel %vm2065_vm13, %v9173_v3, %v9172_v5  ;;  %v3964_v31 = vld [vmem:[#allocation5 + $0xd8] sm:$0xff] }
 0x69b   : > { %4609 = vmatpush2.msra.mxu0 %v1751_v43  ;;  %v3834_v46 = vpop.permute.xlu0 %3833 }
 0x69c   : > { %v3836_v51 = vpop.permute.xlu1 %3835 }
 0x69d   : > { %v3840_v25 = vsel %vm2110_vm11, %v3834_v46, %v3836_v51  ;;  %v3963_v46 = vld [vmem:[#allocation5 + $0xd0] sm:$0xff]  ;;  %v9174_v51 = vld [vmem:[#allocation275_spill] sm:$0xff] }
 0x69e   : > { %4685 = vmatprep.subr.mxu1 %v3840_v25  ;;  %v9175_v25 = vld [vmem:[#allocation274_spill] sm:$0xff] }
 0x69f   : > { %4686 = vmatpush2.msra.mxu1 %v2114_v8  ;;  %v3438_v54 = vpop.permute.xlu0 %3437  ;;  %v2068_v50 = vsel %vm2065_vm13, %v9175_v25, %v9174_v51 }
 0x6a0   : > { %v3440_v13 = vpop.permute.xlu1 %3439 }
 0x6a1   : > { %v3444_v17 = vsel %vm1705_vm12, %v3438_v54, %v3440_v13  ;;  %v9176_v13 = vld [vmem:[#allocation273_spill] sm:$0xff] }
 0x6a2   : > { %4610 = vmatprep.subr.mxu0 %v3444_v17  ;;  %v9177_v17 = vld [vmem:[#allocation272_spill] sm:$0xff] }
 0x6a3   : > { %4611 = vmatpush2.msra.mxu0 %v1709_v53  ;;  %v3830_v6 = vpop.permute.xlu0 %3829  ;;  %v2067_v27 = vsel %vm2065_vm13, %v9177_v17, %v9176_v13 }
 0x6a4   : > { %v3832_v47 = vpop.permute.xlu1 %3831 }
 0x6a5   : > { %v3839_v35 = vsel %vm2110_vm11, %v3830_v6, %v3832_v47  ;;  %v3945_v47 = vld [vmem:[#allocation5 + $0x40] sm:$0xff] }
 0x6a6   : > { %4687 = vmatprep.subr.mxu1 %v3839_v35  ;;  %v9178_v35 = vld [vmem:[#allocation271_spill] sm:$0xff] }
 0x6a7   : > { %4688 = vmatpush2.msra.mxu1 %v2113_v58  ;;  %v3434_v28 = vpop.permute.xlu0 %3433  ;;  %v2066_v39 = vsel %vm2065_vm13, %v9179_v40, %v9178_v35  ;;  %v3956_v58 = vld [vmem:[#allocation5 + $0x98] sm:$0xff] }
 0x6a8   : > { %v3436_v38 = vpop.permute.xlu1 %3435 }
 0x6a9   : > { %v3443_v33 = vsel %vm1705_vm12, %v3434_v28, %v3436_v38 }
 0x6aa   : > { %4612 = vmatprep.subr.mxu0 %v3443_v33 }
 0x6ab   : > { %4613 = vmatpush2.msra.mxu0 %v1708_v4  ;;  %v3826_v1 = vpop.permute.xlu0 %3825 }
 0x6ac   : > { %v3828_v37 = vpop.permute.xlu1 %3827 }
 0x6ad   : > { %v3838_v59 = vsel %vm2110_vm11, %v3826_v1, %v3828_v37  ;;  %v3966_v1 = vld [vmem:[#allocation5 + $0xe8] sm:$0xff] }
 0x6ae   : > { %4689 = vmatprep.subr.mxu1 %v3838_v59 }
 0x6af   : > { %4690 = vmatpush2.msra.mxu1 %v2112_v24  ;;  %v3430_v52 = vpop.permute.xlu0 %3429 }
 0x6b0   : > { %v3432_v15 = vpop.permute.xlu1 %3431 }
 0x6b1   : > { %v3442_v57 = vsel %vm1705_vm12, %v3430_v52, %v3432_v15 }
 0x6b2   : > { %4614 = vmatprep.subr.mxu0 %v3442_v57  ;;  %v3965_v57 = vld [vmem:[#allocation5 + $0xe0] sm:$0xff] }
 0x6b3   : > { %4615 = vmatpush2.msra.mxu0 %v1707_v61  ;;  %v3822_v63 = vpop.permute.xlu0 %3821 }
 0x6b4   : > { %v3824_v30 = vpop.permute.xlu1 %3823 }
 0x6b5   : > { %v3837_v48 = vsel %vm2110_vm11, %v3822_v63, %v3824_v30  ;;  %v4371_v30 = vpop.f32.mrf.mxu1 }
 0x6b6   : > { %4691 = vmatprep.subr.mxu1 %v3837_v48 }
 0x6b7   : > { %4692 = vmatpush2.msra.mxu1 %v2111_v56  ;;  %v3426_v22 = vpop.permute.xlu0 %3425  ;;  %v4373_v48 = vpop.f32.mrf.mxu1 }
 0x6b8   : > { %v3428_v60 = vpop.permute.xlu1 %3427  ;;  %v4456_v56 = vpop.f32.mrf.mxu0 }
 0x6b9   : > { %v3441_v21 = vsel %vm1705_vm12, %v3426_v22, %v3428_v60 }
 0x6ba   : > { %4616 = vmatprep.subr.mxu0 %v3441_v21  ;;  %v4460_v60 = vpop.f32.mrf.mxu0 }
 0x6bb   : > { %4617 = vmatpush2.msra.mxu0 %v1706_v42  ;;  %v3790_v62 = vpop.permute.xlu0 %3789 }
 0x6bc   : > { %4619 = vmatmul.mubr.f32.vlgmr.msra.gmra.mxu0 %v3943_v29  ;;  %v3792_v0 = vpop.permute.xlu1 %3791  ;;  %5071 = vmatprep.subr.mxu0 %v9171_v10  ;;  %v4462_v29 = vpop.f32.mrf.mxu0 }
 0x6bd   : > { %v3796_v18 = vsel %vm2065_vm13, %v3790_v62, %v3792_v0  ;;  %4624 = vmatprep.mubr.f32.mxu0 %v3954_v41 }
 0x6be   : > { %4693 = vmatprep.subr.mxu1 %v3796_v18  ;;  %v4466_v9 = vpop.f32.mrf.mxu0 }
 0x6bf   : > { %4694 = vmatpush2.msra.mxu1 %v2069_v44  ;;  %v3786_v32 = vpop.permute.xlu0 %3785 }
 0x6c0   : > { %4625 = vmatmul.mubr.f32.gmra.mxu0 %v3953_v23  ;;  %v3788_v2 = vpop.permute.xlu1 %3787  ;;  %v4468_v41 = vpop.f32.mrf.mxu0 }
 0x6c1   : > { %v3795_v43 = vsel %vm2065_vm13, %v3786_v32, %v3788_v2  ;;  %4630 = vmatprep.mubr.f32.mxu0 %v3964_v31 }
 0x6c2   : > { %4695 = vmatprep.subr.mxu1 %v3795_v43 }
 0x6c3   : > { %4696 = vmatpush2.msra.mxu1 %v2068_v50  ;;  %v3782_v11 = vpop.permute.xlu0 %3781 }
 0x6c4   : > { %4631 = vmatmul.mubr.f32.gmra.mxu0 %v3963_v46  ;;  %v3784_v8 = vpop.permute.xlu1 %3783 }
 0x6c5   : > { %v3794_v54 = vsel %vm2065_vm13, %v3782_v11, %v3784_v8  ;;  %5073 = vmatprep.mubr.msk.f32.mxu0 %vm5324_vm14, %v9171_v10 }
 0x6c6   : > { %4697 = vmatprep.subr.mxu1 %v3794_v54 }
 0x6c7   : > { %4698 = vmatpush2.msra.mxu1 %v2067_v27  ;;  %v3778_v20 = vpop.permute.xlu0 %3777 }
 0x6c8   : > { %v3780_v53 = vpop.permute.xlu1 %3779 }
 0x6c9   : > { %v3793_v6 = vsel %vm2065_vm13, %v3778_v20, %v3780_v53 }
 0x6ca   : > { %4699 = vmatprep.subr.mxu1 %v3793_v6 }
 0x6cb   : > { %4700 = vmatpush2.msra.mxu1 %v2066_v39  ;;  %v4759_v28 = vpop.permute.xlu0 %4758 }
 0x6cc   : > { %v4760_v38 = vrot.slane %v4759_v28, 4  ;;  %4702 = vmatmul.mubr.f32.vlgmr.msra.gmra.mxu1 %v3945_v47  ;;  %v4765_v33 = vpop.permute.xlu1 %4764 }
 0x6cd   : > { %v4766_v55 = vrot.slane %v4765_v33, 4  ;;  %4707 = vmatprep.mubr.f32.mxu1 %v3956_v58 }
 0x6ce   : > { %v4761_v4 = vsel %vm490_vm7, %v4759_v28, %v4760_v38 }
 0x6cf   : > { %v4763_v37 = vmax.f32 %v8243_v14, %v4761_v4  ;;  %v4858_v59 = vpop.permute.xlu0 %4857  ;;  %v4767_v49 = vsel %vm535_vm6, %v4765_v33, %v4766_v55 }
 0x6d0   : > { %v4859_v45 = vrot.slane %v4858_v59, 4  ;;  %4708 = vmatmul.mubr.f32.gmra.mxu1 %v3955_v34  ;;  %v4864_v24 = vpop.permute.xlu1 %4863 }
 0x6d1   : > { %v4769_v52 = vmax.f32 %v4763_v37, %v4767_v49  ;;  %v4865_v15 = vrot.slane %v4864_v24, 4  ;;  %4713 = vmatprep.mubr.f32.mxu1 %v3966_v1 }
 0x6d2   : > { %v4860_v36 = vsel %vm490_vm7, %v4858_v59, %v4859_v45 }
 0x6d3   : > { %v4862_v61 = vmax.f32 %v8253_v16, %v4860_v36  ;;  %5072 = vmatpush3.msk.msra.mxu0 %vm288_vm0, %v4769_v52  ;;  %v4866_v14 = vsel %vm535_vm6, %v4864_v24, %v4865_v15  ;;  %v4377_v16 = vpop.f32.mrf.mxu1 }
 0x6d4   : > { %4714 = vmatmul.mubr.f32.gmra.mxu1 %v3965_v57  ;;  %5074 = vmatmul.mubr.msk.f32.vlgmr.msra.gmra.mxu0 %vm275_vm1, %v4770_v26 }
 0x6d5   : > { %v4868_v63 = vmax.f32 %v4862_v61, %v4866_v14  ;;  %5076 = vmatprep.subr.mxu0 %v9171_v10  ;;  %5078 = vmatprep.mubr.msk.f32.mxu0 %vm5324_vm14, %v9171_v10  ;;  %v4379_v7 = vpop.f32.mrf.mxu1 }
 0x6d7   : > { %5077 = vmatpush3.msk.msra.mxu0 %vm288_vm0, %v4868_v63  ;;  %v4383_v22 = vpop.f32.mrf.mxu1 }
 0x6d8   : > { %5079 = vmatmul.mubr.msk.f32.vlgmr.msra.gmra.mxu0 %vm275_vm1, %v4770_v26 }
 0x6d9   : > { %v4385_v21 = vpop.f32.mrf.mxu1 }
 0x6db   : > { %v4537_v19 = vpop.f32.mrf.mxu1 }
 0x6dc   : > { %v4293_v0 = vpop.permute.xlu0 %4292 }
 0x6dd   : > { %v4539_v42 = vpop.f32.mrf.mxu1  ;;  %v4298_v18 = vpop.permute.xlu1 %4297  ;;  %v4372_v23 = vadd.f32 %v4371_v30, %v4293_v0  ;;  %v4374_v44 = vadd.f32 %v4373_v48, %v4293_v0 }
 0x6de   : > { %v4378_v32 = vadd.f32 %v4377_v16, %v4298_v18  ;;  %v4380_v43 = vadd.f32 %v4379_v7, %v4298_v18 }
 0x6df   : > { %v4543_v62 = vpop.f32.mrf.mxu1  ;;  %v4455_v31 = vadd.f32 %v4454_v12, %v4372_v23  ;;  %v4457_v25 = vadd.f32 %v4456_v56, %v4374_v44 }
 0x6e0   : > { %v4461_v11 = vadd.f32 %v4460_v60, %v4378_v32  ;;  %v4463_v54 = vadd.f32 %v4462_v29, %v4380_v43  ;;  %v4775_v61 = vpop.permute.xlu0 %4774 }
 0x6e1   : > { %v4545_v5 = vpop.f32.mrf.mxu1  ;;  %v4303_v46 = vpop.permute.xlu1 %4302  ;;  %v4538_v50 = vadd.f32 %v4537_v19, %v4455_v31  ;;  %v4540_v27 = vadd.f32 %v4539_v42, %v4457_v25 }
 0x6e2   : > { %v4384_v8 = vadd.f32 %v4383_v22, %v4303_v46  ;;  %v4386_v20 = vadd.f32 %v4385_v21, %v4303_v46  ;;  %v4544_v47 = vadd.f32 %v4543_v62, %v4461_v11  ;;  %v4546_v58 = vadd.f32 %v4545_v5, %v4463_v54 }
 0x6e3   : > { %v4549_v2 = vpop.f32.mrf.mxu1 }
 0x6e4   : > { %v4467_v35 = vadd.f32 %v4466_v9, %v4384_v8  ;;  %v4469_v33 = vadd.f32 %v4468_v41, %v4386_v20 }
 0x6e5   : > { %v4551_v13 = vpop.f32.mrf.mxu1  ;;  %v4874_v29 = vpop.permute.xlu1 %4873 }
 0x6e6   : > { %v4550_v37 = vadd.f32 %v4549_v2, %v4467_v35  ;;  %v4552_v15 = vadd.f32 %v4551_v13, %v4469_v33 }
 0x77c   : > { %v4620_v10 = vpop.f32.mrf.mxu0 }
 0x77d   : > { %v4621_v53 = vadd.f32 %v4620_v10, %v4538_v50 }
 0x77e   : > { %v4622_v3 = vpop.f32.mrf.mxu0 }
 0x77f   : > { %v4623_v40 = vadd.f32 %v4622_v3, %v4540_v27 }
 0x780   : > { %v4626_v51 = vpop.f32.mrf.mxu0 }
 0x781   : > { %v4627_v55 = vadd.f32 %v4626_v51, %v4544_v47 }
 0x782   : > { %v4628_v17 = vpop.f32.mrf.mxu0 }
 0x783   : > { %v4629_v59 = vadd.f32 %v4628_v17, %v4546_v58 }
 0x784   : > { %v4632_v28 = vpop.f32.mrf.mxu0 }
 0x785   : > { %v4633_v57 = vadd.f32 %v4632_v28, %v4550_v37 }
 0x786   : > { %v4634_v24 = vpop.f32.mrf.mxu0 }
 0x787   : > { %v4635_v30 = vadd.f32 %v4634_v24, %v4552_v15 }
 0x78c   : > { %v4703_v6 = vpop.f32.mrf.mxu1 }
 0x78d   : > { %v4704_v39 = vadd.f32 %v4703_v6, %v4621_v53 }
 0x78e   : > { %v4705_v38 = vpop.f32.mrf.mxu1 }
 0x78f   : > { %v4720_v34 = vmax.f32 %v4704_v39, 0.0  ;;  %v4706_v4 = vadd.f32 %v4705_v38, %v4623_v40 }
 0x790   : > { %v4709_v1 = vpop.f32.mrf.mxu1 }
 0x791   : > { %4726 = vst [vmem:[%s8405_s26] sm:$0xff] %v4720_v34  ;;  %v4721_v49 = vmax.f32 %v4706_v4, 0.0  ;;  %v4710_v45 = vadd.f32 %v4709_v1, %v4627_v55 }
 0x792   : > { %v4711_v52 = vpop.f32.mrf.mxu1 }
 0x793   : > { %4727 = vst [vmem:[%s8405_s26 + $0x8] sm:$0xff] %v4721_v49  ;;  %v4722_v26 = vmax.f32 %v4710_v45, 0.0  ;;  %v4712_v36 = vadd.f32 %v4711_v52, %v4629_v59 }
 0x794   : > { %v4715_v14 = vpop.f32.mrf.mxu1  ;;  %v4849_v63 = vpop.f32.mrf.mxu0 }
 0x795   : > { %4728 = vst [vmem:[%s8405_s26 + $0x10] sm:$0xff] %v4722_v26  ;;  %v4723_v48 = vmax.f32 %v4712_v36, 0.0  ;;  %v4716_v16 = vadd.f32 %v4715_v14, %v4633_v57  ;;  %v4850_v12 = vadd.f32 %v4849_v63, %v4775_v61 }
 0x796   : > { %v4717_v7 = vpop.f32.mrf.mxu1  ;;  %v5075_v56 = vpop.f32.mrf.mxu0 }
 0x797   : > { %4729 = vst [vmem:[%s8405_s26 + $0x18] sm:$0xff] %v4723_v48  ;;  %v4724_v22 = vmax.f32 %v4716_v16, 0.0  ;;  %v4718_v60 = vadd.f32 %v4717_v7, %v4635_v30  ;;  %v4853_v21 = vmax.f32 %v4850_v12, 0.0 }
 0x798   : > { %v4948_v19 = vpop.f32.mrf.mxu0 }
 0x799   : > { %4730 = vst [vmem:[%s8405_s26 + $0x20] sm:$0xff] %v4724_v22  ;;  %v4725_v9 = vmax.f32 %v4718_v60, 0.0  ;;  %v4949_v42 = vadd.f32 %v4948_v19, %v4874_v29  ;;  %4854 = vst [vmem:[%s8405_s26 + $0x30] sm:$0xff] %v4853_v21 }
 0x79a   : > { %v5080_v41 = vpop.f32.mrf.mxu0 }
 0x79b   : > { %4731 = vst [vmem:[%s8405_s26 + $0x28] sm:$0xff] %v4725_v9  ;;  %v4952_v62 = vmax.f32 %v4949_v42, 0.0 }
 0x79d   : > { %4953 = vst [vmem:[%s8405_s26 + $0x38] sm:$0xff] %v4952_v62 }
 0x79e   : > { %5224 = shalt.err (!%p5221_p0)
}
 0x79f   : > { %s5225_s9 = scalar_lea.hbm %s8420_s20, 1024  ;;  %s5229_s12 = scalar_lea.hbm %s8472_s6, 2048 }
 0x7a0   : > { %p5226_p1 = scmp.ne.s32.totalorder %s8420_s20, %s5225_s9  ;;  %p5230_p4 = scmp.lt.s32.totalorder %s8420_s20, %s8472_s6 }
 0x7a1   : > { %p5231_p7 = scmp.lt.s32.totalorder %s5229_s12, %s5225_s9 }
 0x7a2   : > { %p5227_p2 = pnand %p5226_p1, %p5402_p5 }
 0x7a3   : > { %p5232_p8 = por %p5231_p7, %p5230_p4 }
 0x7a4   : > { %p5228_p3 = pneg %p5227_p2 }
 0x7a6   : > { %p5233_p6 = pnand %p5232_p8, %p5228_p3 }
 0x7a8   : > { %5236 = shalt.err (!%p5233_p6)
}
 0x7a9   : > { %s5326_s23 = smov 256   ;;  %s5327_s30 = smov 512  }
 0x7aa   : > { %s5328_s15 = smov 16  }
 0x7ab   : > { %5085 = dma.vmem_to_hbm [thread:$0]  (%p5402_p5), %s8413_s16, 1024, %s8420_s20, %s8426_s25, %s5326_s23, %s5327_s30, %s5328_s15  }
 0x7ac PF: > { %s9180_s0 = sld [smem:[#allocation13_spill]] }
 0x7ad   : > { %s9181_s1 = sld [smem:[#allocation11_spill]] }
 0x7ae   : > { %s9182_s27 = sld [smem:[#allocation16_spill]] }
 0x7b2   : > { %p5097_p9 = scmp.ge.s32.totalorder %s9180_s0, 2 }
 0x7b3   : > { %s4983_s8 = sand.u32 1, %s9181_s1  }
 0x7b4   : > { %p9183_p10 = scmp.ne.s32.totalorder %s9182_s27, 0  ;;  %s4984_s2 = scalar_lea.sflag [#allocation7], %s4983_s8 }
 0x7b6   : > { %p5092_p11 = pnand %p5097_p9, %p9183_p10 }
 0x7b8   : > { %p5093_p12 = pneg %p5092_p11 }
 0x7ba   : > { %5258 = dma.done.wait (%p5093_p12), %s4984_s2, 1024  }
 0x7bb   : > { %5260 = vsyncadd (%p5093_p12), %s4984_s2, 4294966272  ;;  %s9184_s24 = sld [smem:[#allocation14_spill]]  ;;  %s9187_s21 = smov %s5267_s22 }
 0x7bc   : > { %s9185_s26 = sld [smem:[#allocation12_spill]] }
 0x7bd   : > { %s9186_s23 = sld [smem:[#allocation15_spill]] }
 0x7c1   : > { %p17_p13 = scmp.ge.s32.totalorder %s9184_s24, 4  }
 0x7c2   : > { %s9188_s22 = smov %s9185_s26 }
 0x7c3   :  { %19 = sbr.rel (!%p17_p13) target bundleno = 8 (0x8), region = 86 }
 0x7c8   :  { %4989 = vsyncpa [#allocation6], 1 }
 0x7c9   :  { %4991 = vsyncpa [#allocation6 + $0x1], 1 }
 0x7ca   :  { %4992 = vsyncpa [#allocation7], 1 }
 0x7cb   :  { %4994 = vsyncpa [#allocation7 + $0x1], 1 }

</bundles_post_ra>
